<compile_context>
chip_gen: v5e
topology: v5e:2x2
jax: 0.10.0
libtpu: 0.0.40
codegen_flags: <defaults>
</compile_context>

<pallas_src>
import functools

import jax
import jax.numpy as jnp
from jax.experimental import pallas as pl
from jax.experimental.pallas import tpu as pltpu


# ---------------------------------------------------------------------------
# helpers
# ---------------------------------------------------------------------------
_VMEM_LIMIT_BYTES = 48 * 1024 * 1024          # safe on v7x (64 MiB physical)
_TILED_VMEM_BUDGET = 40 * 1024 * 1024         # per-call working-set budget
_FUSED_VMEM_BUDGET = 36 * 1024 * 1024         # gate for the resident-A path


def _round_up(x: int, m: int) -> int:
    return (x + m - 1) // m * m


def _pick_tile(dim: int, max_tile: int = 512) -> int:
    """Largest multiple of 128 <= max_tile that divides `dim` (dim % 128 == 0)."""
    t = min(max_tile, dim)
    t = max(128, (t // 128) * 128)
    while dim % t != 0:
        t -= 128
    return t


def _tiled_vmem_bytes(tm: int, tn: int, tk: int, out_bytes: int) -> int:
    acc = tm * tn * 4
    a = 2 * tm * tk * 2          # double-buffered bf16 A tile
    b = 2 * tk * tn * 2          # double-buffered bf16 B tile
    out = 2 * tm * tn * out_bytes
    bias = 2 * tn * 4
    return acc + a + b + out + bias


def _fused_vmem_bytes(n_pad: int, fin_pad: int, h_pad: int, num_layers: int) -> int:
    a = 2 * n_pad * n_pad * 2                                   # resident A (bf16)
    x = 2 * n_pad * fin_pad * 2
    w = 2 * (fin_pad * h_pad + max(num_layers - 1, 0) * h_pad * h_pad) * 2
    out = 2 * n_pad * h_pad * 4
    interm = n_pad * h_pad * (4 + 4 + 2) + n_pad * fin_pad * 2  # XW/agg/h values
    return a + x + w + out + interm


# ---------------------------------------------------------------------------
# Fused whole-encoder kernel: A resident in VMEM, single pallas_call
# ---------------------------------------------------------------------------
def _fused_encoder_kernel(*refs, num_layers: int):
    if num_layers > 1:
        a_ref, x_ref, w0_ref, wrest_ref, b_ref, slope_ref, o_ref = refs
    else:
        a_ref, x_ref, w0_ref, b_ref, slope_ref, o_ref = refs

    a = a_ref[...]                       # (n_pad, n_pad) bf16, resident in VMEM
    h = x_ref[...]                       # (n_pad, fin_pad) bf16

    for l in range(num_layers):
        w = w0_ref[...] if l == 0 else wrest_ref[l - 1]
        xw = jnp.dot(h, w, preferred_element_type=jnp.float32)          # feature transform
        agg = jnp.dot(a, xw.astype(jnp.bfloat16),                       # aggregation (HBM-free)
                      preferred_element_type=jnp.float32)
        agg = agg + b_ref[l].astype(jnp.float32)                        # (1, h_pad) broadcast
        if l < num_layers - 1:
            s = slope_ref[l, 0]                                         # shared PReLU scalar
            agg = jnp.where(agg > 0, agg, s * agg)
            h = agg.astype(jnp.bfloat16)
        else:
            o_ref[...] = agg.astype(o_ref.dtype)


def fused_encoder(a_bf16, x_bf16, params, n_pad, fin_pad, h_pad):
    num_layers = len(params)
    w0 = params[0][0].astype(jnp.bfloat16)
    b = jnp.stack([p[1] for p in params]).reshape(num_layers, 1, h_pad)
    slope = jnp.stack([jnp.asarray(p[2], jnp.float32) for p in params]).reshape(num_layers, 1)

    inputs = [a_bf16, x_bf16, w0]
    in_specs = [pl.BlockSpec(memory_space=pltpu.MemorySpace.VMEM)] * 3
    if num_layers > 1:
        wrest = jnp.stack([p[0] for p in params[1:]]).astype(jnp.bfloat16)
        inputs.append(wrest)
        in_specs.append(pl.BlockSpec(memory_space=pltpu.MemorySpace.VMEM))
    inputs += [b, slope]
    in_specs += [pl.BlockSpec(memory_space=pltpu.MemorySpace.VMEM),
                 pl.BlockSpec(memory_space=pltpu.MemorySpace.SMEM)]

    kernel = functools.partial(_fused_encoder_kernel, num_layers=num_layers)
    return pl.pallas_call(
        kernel,
        out_shape=jax.ShapeDtypeStruct((n_pad, h_pad), jnp.float32),
        in_specs=in_specs,
        out_specs=pl.BlockSpec(memory_space=pltpu.MemorySpace.VMEM),
        compiler_params=pltpu.CompilerParams(vmem_limit_bytes=_VMEM_LIMIT_BYTES),
    )(*inputs)


# ---------------------------------------------------------------------------
# Tiled matmul kernel with optional fused bias + PReLU epilogue (large graphs)
# ---------------------------------------------------------------------------
def _mm_kernel(*refs, apply_epilogue: bool, apply_prelu: bool):
    if apply_epilogue:
        a_ref, b_ref, bias_ref, slope_ref, o_ref, acc_ref = refs
    else:
        a_ref, b_ref, o_ref, acc_ref = refs

    k = pl.program_id(2)

    @pl.when(k == 0)
    def _init():
        acc_ref[...] = jnp.zeros_like(acc_ref)

    acc_ref[...] += jnp.dot(a_ref[...], b_ref[...],
                            preferred_element_type=jnp.float32)

    @pl.when(k == pl.num_programs(2) - 1)
    def _finalize():
        h = acc_ref[...]
        if apply_epilogue:
            h = h + bias_ref[...].astype(jnp.float32)
            if apply_prelu:
                s = slope_ref[0, 0]
                h = jnp.where(h > 0, h, s * h)
        o_ref[...] = h.astype(o_ref.dtype)


def tiled_matmul(a, b, bias=None, slope=None, apply_prelu=False,
                 out_dtype=jnp.float32, prefer_full_n=False):
    """out = a @ b (+ bias (+ PReLU)).  All dims must be multiples of 128."""
    m, kdim = a.shape
    _, n = b.shape
    out_bytes = jnp.dtype(out_dtype).itemsize

    # >=2 row blocks whenever possible so v7x megacore shards the i axis.
    max_tm = min(512, m // 2) if m >= 256 else m
    tm = _pick_tile(m, max_tm)
    tk = _pick_tile(kdim, 512)

    # Full-width N tile: stream each A row-strip from HBM exactly once.
    if prefer_full_n and _tiled_vmem_bytes(tm, n, tk, out_bytes) <= _TILED_VMEM_BUDGET:
        tn = n
    else:
        tn = _pick_tile(n, 512)
        while _tiled_vmem_bytes(tm, tn, tk, out_bytes) > _TILED_VMEM_BUDGET and tn > 128:
            tn = _pick_tile(n, tn - 128)

    grid = (m // tm, n // tn, kdim // tk)
    apply_epilogue = bias is not None
    kernel = functools.partial(_mm_kernel,
                               apply_epilogue=apply_epilogue,
                               apply_prelu=apply_prelu)

    in_specs = [
        pl.BlockSpec((tm, tk), lambda i, j, k: (i, k)),      # A tile
        pl.BlockSpec((tk, tn), lambda i, j, k: (k, j)),      # B tile
    ]
    inputs = [a, b]
    if apply_epilogue:
        in_specs.append(pl.BlockSpec((1, tn), lambda i, j, k: (0, j)))       # bias
        in_specs.append(pl.BlockSpec(memory_space=pltpu.MemorySpace.SMEM))   # slope
        inputs += [bias, slope]

    return pl.pallas_call(
        kernel,
        out_shape=jax.ShapeDtypeStruct((m, n), out_dtype),
        grid_spec=pltpu.PrefetchScalarGridSpec(
            num_scalar_prefetch=0,
            grid=grid,
            in_specs=in_specs,
            out_specs=pl.BlockSpec((tm, tn), lambda i, j, k: (i, j)),
            scratch_shapes=[pltpu.VMEM((tm, tn), jnp.float32)],
        ),
        compiler_params=pltpu.CompilerParams(
            dimension_semantics=("parallel", "parallel", "arbitrary"),
            vmem_limit_bytes=_VMEM_LIMIT_BYTES,
        ),
    )(*inputs)


def gcn_layer(a_bf16, x_bf16, w_bf16, bias, slope, apply_prelu, out_dtype):
    """One GCN layer (tiled path).  Bias + PReLU fused into the 2nd matmul."""
    fin_pad, h_pad = w_bf16.shape
    if fin_pad <= h_pad:
        # H = A @ (X W) + b : the N^2 matmul runs at width min(Fin, H)
        xw = tiled_matmul(x_bf16, w_bf16, out_dtype=jnp.bfloat16)
        return tiled_matmul(a_bf16, xw, bias=bias, slope=slope,
                            apply_prelu=apply_prelu, out_dtype=out_dtype,
                            prefer_full_n=True)
    else:
        # H = (A @ X) W + b : cheaper when Fin > H
        ax = tiled_matmul(a_bf16, x_bf16, out_dtype=jnp.bfloat16,
                          prefer_full_n=True)
        return tiled_matmul(ax, w_bf16, bias=bias, slope=slope,
                            apply_prelu=apply_prelu, out_dtype=out_dtype)


# ---------------------------------------------------------------------------
# Glue: GCN symmetric normalization (PyG gcn_norm / add_remaining_self_loops)
# Cache the result across steps when edge_index is static.
# ---------------------------------------------------------------------------
def gcn_normalized_adjacency(edge_index, num_nodes, padded_nodes):
    src, dst = edge_index[0], edge_index[1]
    # A[dst, src] so that (A @ x)[dst] = sum over incoming edges (src -> dst)
    adj = jnp.zeros((padded_nodes, padded_nodes), jnp.float32).at[dst, src].add(1.0)
    diag = jnp.arange(num_nodes)
    adj = adj.at[diag, diag].set(1.0)                  # add_remaining_self_loops, fill=1
    deg = adj.sum(axis=1)                              # in-degree (incl. self loop)
    dinv = jnp.where(deg > 0, jax.lax.rsqrt(deg), 0.0)
    return dinv[:, None] * adj * dinv[None, :]


# ---------------------------------------------------------------------------
# Encoder: parameter init (pre-padded to 128 lanes) + forward
# ---------------------------------------------------------------------------
def init_encoder_params(key, n_in, n_h, num_layers):
    """GCNConv: glorot-uniform weight [Fin, Fout], zero bias, PReLU slope 0.25.
    Weights/bias are zero-padded to multiples of 128 (lane-dense); padding never
    affects real outputs (padded rows/cols are zero)."""
    params = []
    n_h_pad = _round_up(n_h, 128)
    for l in range(num_layers):
        fin = n_in if l == 0 else n_h
        fin_pad = _round_up(fin, 128)
        key, wkey = jax.random.split(key)
        limit = (6.0 / (fin + n_h)) ** 0.5
        w = jax.random.uniform(wkey, (fin, n_h), jnp.float32, -limit, limit)
        w_pad = jnp.zeros((fin_pad, n_h_pad), jnp.float32).at[:fin, :n_h].set(w)
        b = jnp.zeros((n_h_pad,), jnp.float32)
        slope = jnp.asarray(0.25, jnp.float32)
        params.append((w_pad, b, slope))
    return params


def encoder_forward(params, x, edge_index, n_h, a_bf16=None, force_tiled=False):
    num_layers = len(params)
    num_nodes, n_in = x.shape
    n_pad = _round_up(num_nodes, 512)      # 512-multiple: big lane/sublane-dense tiles
    fin_pad = _round_up(n_in, 128)
    h_pad = _round_up(n_h, 128)

    if a_bf16 is None:                     # caller may cache this across steps
        a_bf16 = gcn_normalized_adjacency(edge_index, num_nodes, n_pad).astype(jnp.bfloat16)

    h0 = jnp.zeros((n_pad, fin_pad), jnp.float32).at[:num_nodes, :n_in].set(x)
    h0 = h0.astype(jnp.bfloat16)

    use_fused = (not force_tiled) and (
        _fused_vmem_bytes(n_pad, fin_pad, h_pad, num_layers) <= _FUSED_VMEM_BUDGET)

    if use_fused:
        out = fused_encoder(a_bf16, h0, params, n_pad, fin_pad, h_pad)
    else:
        h = h0
        for l, (w, b, slope) in enumerate(params):
            is_last = l == num_layers - 1
            h = gcn_layer(a_bf16, h, w.astype(jnp.bfloat16),
                          b[None, :], jnp.reshape(slope, (1, 1)),
                          apply_prelu=not is_last,
                          out_dtype=jnp.float32 if is_last else jnp.bfloat16)
        out = h

    return out[:num_nodes, :n_h]


# ---------------------------------------------------------------------------
if __name__ == "__main__":
    key = jax.random.PRNGKey(0)

    num_nodes = 64
    n_in = 16
    n_h = 32
    num_layers = 2
    num_edges = 200

    k_x, k_src, k_dst, k_params = jax.random.split(key, 4)
    x = jax.random.normal(k_x, (num_nodes, n_in), jnp.float32)
    src = jax.random.randint(k_src, (num_edges,), 0, num_nodes, jnp.int32)
    dst = jax.random.randint(k_dst, (num_edges,), 0, num_nodes, jnp.int32)
    edge_index = jnp.stack([src, dst], axis=0)          # [2, E]

    params = init_encoder_params(k_params, n_in, n_h, num_layers)

    # Fused (resident-A) path — default for graphs this size.
    out = encoder_forward(params, x, edge_index, n_h)
    jax.block_until_ready(out)
    assert out.shape == (num_nodes, n_h) and out.dtype == jnp.float32

    # Tiled large-graph path; cross-check consistency with the fused path.
    out_tiled = encoder_forward(params, x, edge_index, n_h, force_tiled=True)
    jax.block_until_ready(out_tiled)
    assert out_tiled.shape == (num_nodes, n_h)
    assert bool(jnp.allclose(out, out_tiled, rtol=2e-2, atol=2e-2))

    print("KERNEL_OK")
</pallas_src>

<mosaic_0001>
module attributes {stable_mosaic.version = 11 : i64} {
  func.func @_fused_encoder_kernel(%arg0: memref<512x512xbf16, #tpu.memory_space<vmem>>, %arg1: memref<512x128xbf16, #tpu.memory_space<vmem>>, %arg2: memref<128x128xbf16, #tpu.memory_space<vmem>>, %arg3: memref<1x128x128xbf16, #tpu.memory_space<vmem>>, %arg4: memref<2x1x128xf32, #tpu.memory_space<vmem>>, %arg5: memref<2x1xf32, #tpu.memory_space<smem>>, %arg6: memref<512x128xf32, #tpu.memory_space<vmem>>) attributes {dimension_semantics = [], scalar_prefetch = 0 : i64, scratch_operands = 0 : i64, tpu.core_type = #tpu.core_type<tc>} {
    %c0 = arith.constant 0 : index
    %c0_0 = arith.constant 0 : index
    %0 = vector.load %arg0[%c0, %c0_0] : memref<512x512xbf16, #tpu.memory_space<vmem>>, vector<512x512xbf16>
    %c0_1 = arith.constant 0 : index
    %c0_2 = arith.constant 0 : index
    %1 = vector.load %arg1[%c0_1, %c0_2] : memref<512x128xbf16, #tpu.memory_space<vmem>>, vector<512x128xbf16>
    %c0_3 = arith.constant 0 : index
    %c0_4 = arith.constant 0 : index
    %2 = vector.load %arg2[%c0_3, %c0_4] : memref<128x128xbf16, #tpu.memory_space<vmem>>, vector<128x128xbf16>
    %cst = arith.constant dense<0.000000e+00> : vector<512x128xf32>
    %3 = tpu.matmul %1, %2, %cst {dimension_numbers = #tpu.dot_dimension_numbers<[1], [0], [0], [1], [0, 0, 1, 1], [], []>} : vector<512x128xbf16>, vector<128x128xbf16>, vector<512x128xf32> -> vector<512x128xf32>
    %4 = arith.truncf %3 : vector<512x128xf32> to vector<512x128xbf16>
    %cst_5 = arith.constant dense<0.000000e+00> : vector<512x128xf32>
    %5 = tpu.matmul %0, %4, %cst_5 {dimension_numbers = #tpu.dot_dimension_numbers<[1], [0], [0], [1], [0, 0, 1, 1], [], []>} : vector<512x512xbf16>, vector<512x128xbf16>, vector<512x128xf32> -> vector<512x128xf32>
    %c0_6 = arith.constant 0 : index
    %c0_7 = arith.constant 0 : index
    %c0_8 = arith.constant 0 : index
    %6 = vector.load %arg4[%c0_6, %c0_7, %c0_8] : memref<2x1x128xf32, #tpu.memory_space<vmem>>, vector<1x1x128xf32>
    %7 = vector.shape_cast %6 : vector<1x1x128xf32> to vector<1x128xf32>
    %8 = vector.broadcast %7 : vector<1x128xf32> to vector<512x128xf32>
    %9 = arith.addf %5, %8 : vector<512x128xf32>
    %c0_9 = arith.constant 0 : index
    %c0_10 = arith.constant 0 : index
    %10 = memref.load %arg5[%c0_9, %c0_10] : memref<2x1xf32, #tpu.memory_space<smem>>
    %cst_11 = arith.constant 0.000000e+00 : f32
    %11 = vector.broadcast %cst_11 : f32 to vector<512x128xf32>
    %12 = arith.cmpf ogt, %9, %11 : vector<512x128xf32>
    %13 = vector.broadcast %10 : f32 to vector<512x128xf32>
    %14 = arith.mulf %13, %9 : vector<512x128xf32>
    %15 = arith.select %12, %9, %14 : vector<512x128xi1>, vector<512x128xf32>
    %16 = arith.truncf %15 : vector<512x128xf32> to vector<512x128xbf16>
    %c0_12 = arith.constant 0 : index
    %c0_13 = arith.constant 0 : index
    %c0_14 = arith.constant 0 : index
    %17 = vector.load %arg3[%c0_12, %c0_13, %c0_14] : memref<1x128x128xbf16, #tpu.memory_space<vmem>>, vector<1x128x128xbf16>
    %18 = vector.shape_cast %17 : vector<1x128x128xbf16> to vector<128x128xbf16>
    %cst_15 = arith.constant dense<0.000000e+00> : vector<512x128xf32>
    %19 = tpu.matmul %16, %18, %cst_15 {dimension_numbers = #tpu.dot_dimension_numbers<[1], [0], [0], [1], [0, 0, 1, 1], [], []>} : vector<512x128xbf16>, vector<128x128xbf16>, vector<512x128xf32> -> vector<512x128xf32>
    %20 = arith.truncf %19 : vector<512x128xf32> to vector<512x128xbf16>
    %cst_16 = arith.constant dense<0.000000e+00> : vector<512x128xf32>
    %21 = tpu.matmul %0, %20, %cst_16 {dimension_numbers = #tpu.dot_dimension_numbers<[1], [0], [0], [1], [0, 0, 1, 1], [], []>} : vector<512x512xbf16>, vector<512x128xbf16>, vector<512x128xf32> -> vector<512x128xf32>
    %c1 = arith.constant 1 : index
    %c0_17 = arith.constant 0 : index
    %c0_18 = arith.constant 0 : index
    %22 = vector.load %arg4[%c1, %c0_17, %c0_18] : memref<2x1x128xf32, #tpu.memory_space<vmem>>, vector<1x1x128xf32>
    %23 = vector.shape_cast %22 : vector<1x1x128xf32> to vector<1x128xf32>
    %24 = vector.broadcast %23 : vector<1x128xf32> to vector<512x128xf32>
    %25 = arith.addf %21, %24 : vector<512x128xf32>
    %c0_19 = arith.constant 0 : index
    %c0_20 = arith.constant 0 : index
    %26 = vector.load %arg6[%c0_19, %c0_20] : memref<512x128xf32, #tpu.memory_space<vmem>>, vector<512x128xf32>
    tpu.vector_store %arg6[%c0_19, %c0_20], %25 {strides = array<i32>} : memref<512x128xf32, #tpu.memory_space<vmem>>, vector<512x128xf32>,
    return
  }
}

</mosaic_0001>

<bundles_post_ra>
// kernel: tpu_custom_call.1
= control target key start
LH: loop header
LB: loop body
LE: loop exit
PB: predicated region body
PF: predicated region fallthrough
CT: control target
= control target key end

     0   :  { %11 = vsyncpa [#allocation3], 0  ;;  %s5850_s0 = inlined_call_operand.hbm [shape: bf16[512,512], index: 0, kind: input, shape index: {}]   ;;  %s5851_s1 = inlined_call_operand.hbm [shape: bf16[512,128], index: 1, kind: input, shape index: {}]   ;;  %s5852_s2 = inlined_call_operand.hbm [shape: bf16[128,128], index: 2, kind: input, shape index: {}]   ;;  %s5853_s3 = inlined_call_operand.hbm [shape: bf16[1,128,128], index: 3, kind: input, shape index: {}]   ;;  %s5854_s4 = inlined_call_operand.vmem [shape: f32[2,1,128], index: 4, kind: input, shape index: {}]   ;;  %s5855_s5 = inlined_call_operand.vmem [shape: f32[2,1], index: 5, kind: input, shape index: {}]   ;;  %s5856_s6 = inlined_call_operand.hbm [shape: f32[512,128], index: 6, kind: output, shape index: {}]  }
   0x1   :  { %12 = vsyncpa [#allocation7], 0 }
   0x2   :  { %13 = vsyncpa [#allocation10], 0 }
   0x3   :  { %14 = vsyncpa [#allocation5], 0  ;;  %s33_s23 = sshll.u32 %s5851_s1, 4  ;;  %s34_s23 = int_to_ptr.hbm [resolvable:$true] %s33_s23 }
   0x4   :  { %15 = vsyncpa [#allocation4], 0  ;;  %s4383_s24 = smov [#allocation6]   ;;  %s20_s28 = sshll.u32 %s5850_s0, 4  ;;  %s21_s28 = int_to_ptr.hbm [resolvable:$true] %s20_s28 }
   0x5   :  { %s35_s25 = sshll.u32 %s4383_s24, 4  ;;  %s4384_s29 = smov 64   ;;  %s36_s25 = int_to_ptr.vmem [resolvable:$true] %s35_s25 }
   0x6   :  { %s4385_s30 = smov 4   ;;  %s4386_s7 = smov [#allocation2]  }
   0x7   :  { %41 = dma.hbm_to_vmem [thread:$0]  %s34_s23, 4096, %s36_s25, [#allocation7], %s4384_s29, %s4384_s29, %s4385_s30  }
   0x8   :  { %s22_s8 = sshll.u32 %s4386_s7, 4  ;;  %s4387_s9 = smov 256   ;;  %s23_s8 = int_to_ptr.vmem [resolvable:$true] %s22_s8 }
   0x9   :  { %s4388_s10 = smov 16   ;;  %s46_s12 = sshll.u32 %s5852_s2, 4  ;;  %s47_s12 = int_to_ptr.hbm [resolvable:$true] %s46_s12 }
   0xa   :  { %28 = dma.hbm_to_vmem [thread:$0]  %s21_s28, 16384, %s23_s8, [#allocation3], %s4387_s9, %s4387_s9, %s4388_s10  }
   0xb   :  { %s4389_s13 = smov [#allocation8]   ;;  %s59_s16 = sshll.u32 %s5853_s3, 4  ;;  %s60_s16 = int_to_ptr.hbm [resolvable:$true] %s59_s16 }
   0xc   :  { %s48_s14 = sshll.u32 %s4389_s13, 4  ;;  %s4390_s17 = smov [#allocation9]   ;;  %s49_s14 = int_to_ptr.vmem [resolvable:$true] %s48_s14 }
   0xd   :  { %54 = dma.hbm_to_vmem [thread:$0]  %s47_s12, 1024, %s49_s14, [#allocation7], %s4384_s29, %s4384_s29, %s4385_s30  }
   0xe   :  { %s61_s18 = sshll.u32 %s4390_s17, 4  ;;  %s75_s21 = sshll.u32 %s5855_s5, 4  ;;  %s62_s18 = int_to_ptr.vmem [resolvable:$true] %s61_s18  ;;  %s76_s21 = int_to_ptr.vmem [resolvable:$true] %s75_s21 }
   0xf   :  { %67 = dma.hbm_to_vmem [thread:$0]  %s60_s16, 1024, %s62_s18, [#allocation10], %s4384_s29, %s4384_s29, %s4385_s30  }
  0x10   :  { %s4391_s2 = smov [#allocation11]  }
  0x11   :  { %78 = dma.vmem_to_smem %s76_s21, 32, %s4391_s2, [#allocation5]  }
  0x12   :  { %4373 = dma.done.wait [#allocation3], 16384  }
  0x13   :  { %4374 = vsyncadd [#allocation3], 4294950912 }
  0x14   :  { %4375 = dma.done.wait [#allocation7], 5120  }
  0x15   :  { %4376 = vsyncadd [#allocation7], 4294962176 }
  0x16   :  { %4377 = dma.done.wait [#allocation10], 1024  }
  0x17   :  { %4378 = vsyncadd [#allocation10], 4294966272 }
  0x18   :  { %4379 = dma.done.wait [#allocation5], 32  }
  0x19   :  { %4380 = vsyncadd [#allocation5], 4294967264 }
  0x1a   :  { %99 = sfence }
  0x1b   :  { %v4199_v0 = vld [vmem:[#allocation8 + $0x38] sm:$0xff]  ;;  %v4198_v1 = vld [vmem:[#allocation8 + $0x30] sm:$0xff]  ;;  %v4197_v2 = vld [vmem:[#allocation8 + $0x28] sm:$0xff]  ;;  %s2069_s22 = sld [smem:[#allocation11]]  ;;  %s3311_s10 = sshll.u32 %s5856_s6, 4  ;;  %s3312_s10 = int_to_ptr.hbm [resolvable:$true] %s3311_s10 }
  0x1c   :  { %548 = vmatpush.bf16.msra.mxu0 %v4199_v0  ;;  %4208 = vmatpush.bf16.msra.mxu2 %v4199_v0  ;;  %v4196_v3 = vld [vmem:[#allocation8 + $0x20] sm:$0xff]  ;;  %v4195_v4 = vld [vmem:[#allocation8 + $0x18] sm:$0xff]  ;;  %v4194_v5 = vld [vmem:[#allocation8 + $0x10] sm:$0xff]  ;;  %s4393_s1 = smov 128   ;;  %s4394_s11 = smov 8  }
  0x1d   :  { %v4193_v6 = vld [vmem:[#allocation8 + $0x8] sm:$0xff]  ;;  %v4192_v7 = vld [vmem:[#allocation8] sm:$0xff]  ;;  %v4162_v12 = vld [vmem:[#allocation6 + $0x10] sm:$0xff] }
  0x1e   :  { %v4160_v8 = vld [vmem:[#allocation6] sm:$0xff]  ;;  %v4161_v10 = vld [vmem:[#allocation6 + $0x8] sm:$0xff]  ;;  %v4178_v13 = vld [vmem:[#allocation6 + $0x90] sm:$0xff] }
  0x1f   :  { %v4176_v9 = vld [vmem:[#allocation6 + $0x80] sm:$0xff]  ;;  %v4177_v11 = vld [vmem:[#allocation6 + $0x88] sm:$0xff]  ;;  %v4163_v14 = vld [vmem:[#allocation6 + $0x18] sm:$0xff] }
  0x20   :  { %549 = vmatpush.bf16.msra.mxu0 %v4198_v1  ;;  %4209 = vmatpush.bf16.msra.mxu2 %v4198_v1  ;;  %v4179_v15 = vld [vmem:[#allocation6 + $0x98] sm:$0xff]  ;;  %v4164_v16 = vld [vmem:[#allocation6 + $0x20] sm:$0xff]  ;;  %v4165_v18 = vld [vmem:[#allocation6 + $0x28] sm:$0xff] }
  0x21   :  { %v4180_v17 = vld [vmem:[#allocation6 + $0xa0] sm:$0xff]  ;;  %v4181_v19 = vld [vmem:[#allocation6 + $0xa8] sm:$0xff]  ;;  %v4166_v20 = vld [vmem:[#allocation6 + $0x30] sm:$0xff] }
  0x22   :  { %v4182_v21 = vld [vmem:[#allocation6 + $0xb0] sm:$0xff]  ;;  %v4167_v22 = vld [vmem:[#allocation6 + $0x38] sm:$0xff]  ;;  %v4168_v24 = vld [vmem:[#allocation6 + $0x40] sm:$0xff] }
  0x23   :  { %v4183_v23 = vld [vmem:[#allocation6 + $0xb8] sm:$0xff]  ;;  %v4184_v25 = vld [vmem:[#allocation6 + $0xc0] sm:$0xff]  ;;  %v4169_v31 = vld [vmem:[#allocation6 + $0x48] sm:$0xff] }
  0x24   :  { %550 = vmatpush.bf16.msra.mxu0 %v4197_v2  ;;  %4210 = vmatpush.bf16.msra.mxu2 %v4197_v2  ;;  %v4185_v32 = vld [vmem:[#allocation6 + $0xc8] sm:$0xff]  ;;  %v4170_v38 = vld [vmem:[#allocation6 + $0x50] sm:$0xff]  ;;  %v4171_v45 = vld [vmem:[#allocation6 + $0x58] sm:$0xff] }
  0x25   :  { %v4186_v39 = vld [vmem:[#allocation6 + $0xd0] sm:$0xff]  ;;  %v4187_v46 = vld [vmem:[#allocation6 + $0xd8] sm:$0xff]  ;;  %v4172_v52 = vld [vmem:[#allocation6 + $0x60] sm:$0xff] }
  0x26   :  { %v4188_v53 = vld [vmem:[#allocation6 + $0xe0] sm:$0xff]  ;;  %v4173_v58 = vld [vmem:[#allocation6 + $0x68] sm:$0xff]  ;;  %v4174_v0 = vld [vmem:[#allocation6 + $0x70] sm:$0xff] }
  0x27   :  { %v4189_v59 = vld [vmem:[#allocation6 + $0xe8] sm:$0xff]  ;;  %v4190_v1 = vld [vmem:[#allocation6 + $0xf0] sm:$0xff] }
  0x28   :  { %551 = vmatpush.bf16.msra.mxu0 %v4196_v3  ;;  %4211 = vmatpush.bf16.msra.mxu2 %v4196_v3 }
  0x2c   :  { %552 = vmatpush.bf16.msra.mxu0 %v4195_v4  ;;  %4212 = vmatpush.bf16.msra.mxu2 %v4195_v4 }
  0x30   :  { %553 = vmatpush.bf16.msra.mxu0 %v4194_v5  ;;  %4213 = vmatpush.bf16.msra.mxu2 %v4194_v5 }
  0x34   :  { %554 = vmatpush.bf16.msra.mxu0 %v4193_v6  ;;  %4214 = vmatpush.bf16.msra.mxu2 %v4193_v6  ;;  %v4175_v6 = vld [vmem:[#allocation6 + $0x78] sm:$0xff] }
  0x38   :  { %555 = vmatpush.bf16.msra.mxu0 %v4192_v7  ;;  %4215 = vmatpush.bf16.msra.mxu2 %v4192_v7  ;;  %v4191_v7 = vld [vmem:[#allocation6 + $0xf8] sm:$0xff] }
  0x3b   :  { %556 = vmatmul.bf16.vlgmr.msra.gmra.mxu0 %v4160_v8  ;;  %636 = vmatmul.bf16.vlgmr.msra.gmra.mxu2 %v4176_v9 }
  0x4b   :  { %561 = vmatmul.bf16.gmra.mxu0 %v4161_v10  ;;  %641 = vmatmul.bf16.gmra.mxu2 %v4177_v11 }
  0x5b   :  { %566 = vmatmul.bf16.gmra.mxu0 %v4162_v12  ;;  %646 = vmatmul.bf16.gmra.mxu2 %v4178_v13 }
  0x6b   :  { %571 = vmatmul.bf16.gmra.mxu0 %v4163_v14  ;;  %651 = vmatmul.bf16.gmra.mxu2 %v4179_v15 }
  0x7b   :  { %576 = vmatmul.bf16.gmra.mxu0 %v4164_v16  ;;  %656 = vmatmul.bf16.gmra.mxu2 %v4180_v17 }
  0x8b   :  { %581 = vmatmul.bf16.gmra.mxu0 %v4165_v18  ;;  %661 = vmatmul.bf16.gmra.mxu2 %v4181_v19 }
  0x9b   :  { %586 = vmatmul.bf16.gmra.mxu0 %v4166_v20  ;;  %666 = vmatmul.bf16.gmra.mxu2 %v4182_v21  ;;  %v3745_v21 = vld [vmem:[#allocation2 + $0x200] sm:$0xf] }
  0xab   :  { %591 = vmatmul.bf16.gmra.mxu0 %v4167_v22  ;;  %671 = vmatmul.bf16.gmra.mxu2 %v4183_v23  ;;  %v4098_v22 = vld [vmem:[#allocation2 + $0x20c] sm:$0xf0] }
  0xb8   :  { %v557_v26 = vpop.f32.mrf.mxu0 }
  0xbb   :  { %596 = vmatmul.bf16.gmra.mxu0 %v4168_v24  ;;  %676 = vmatmul.bf16.gmra.mxu2 %v4184_v25  ;;  %v4483_v25 = vor.u32 %v4098_v22, %v3745_v21 }
  0xbd   :  { %5965 = vst [vmem:[#allocation18_spill] sm:$0xff] %v4483_v25 }
  0xbe   :  { %v4445_v27 = vpop.f32.mrf.mxu2 }
  0xc0   :  { %v559_v28 = vpop.f32.mrf.mxu0 }
  0xc1   :  { %v4447_v29 = vpack.c.bf16 %v559_v28, %v557_v26 }
  0xc6   :  { %v4449_v30 = vpop.f32.mrf.mxu2 }
  0xc8   :  { %v562_v33 = vpop.f32.mrf.mxu0 }
  0xcb   :  { %601 = vmatmul.bf16.gmra.mxu0 %v4169_v31  ;;  %681 = vmatmul.bf16.gmra.mxu2 %v4185_v32 }
  0xce   :  { %v4451_v34 = vpop.f32.mrf.mxu2 }
  0xd0   :  { %v564_v35 = vpop.f32.mrf.mxu0 }
  0xd1   :  { %v4453_v36 = vpack.c.bf16 %v564_v35, %v562_v33 }
  0xd6   :  { %v4455_v37 = vpop.f32.mrf.mxu2 }
  0xd8   :  { %v567_v40 = vpop.f32.mrf.mxu0 }
  0xdb   :  { %606 = vmatmul.bf16.gmra.mxu0 %v4170_v38  ;;  %686 = vmatmul.bf16.gmra.mxu2 %v4186_v39  ;;  %v4102_v38 = vld [vmem:[#allocation2 + $0x22c] sm:$0xf0] }
  0xde   :  { %v4457_v41 = vpop.f32.mrf.mxu2 }
  0xe0   :  { %v569_v42 = vpop.f32.mrf.mxu0 }
  0xe1   :  { %v719_v43 = vpack.c.bf16 %v569_v42, %v567_v40 }
  0xe6   :  { %v4459_v44 = vpop.f32.mrf.mxu2 }
  0xe8   :  { %v572_v47 = vpop.f32.mrf.mxu0 }
  0xeb   :  { %611 = vmatmul.bf16.gmra.mxu0 %v4171_v45  ;;  %691 = vmatmul.bf16.gmra.mxu2 %v4187_v46  ;;  %v734_v46 = vpack.c.bf16 %v4455_v37, %v4451_v34  ;;  %v4110_v34 = vld [vmem:[#allocation2 + $0x26c] sm:$0xf0] }
  0xee   :  { %v4461_v48 = vpop.f32.mrf.mxu2 }
  0xf0   :  { %v574_v49 = vpop.f32.mrf.mxu0 }
  0xf1   :  { %v720_v50 = vpack.c.bf16 %v574_v49, %v572_v47  ;;  %v3777_v49 = vld [vmem:[#allocation2 + $0x240] sm:$0xf] }
  0xf6   :  { %v4463_v51 = vpop.f32.mrf.mxu2 }
  0xf8   :  { %v577_v54 = vpop.f32.mrf.mxu0 }
  0xfb   :  { %616 = vmatmul.bf16.gmra.mxu0 %v4172_v52  ;;  %696 = vmatmul.bf16.gmra.mxu2 %v4188_v53 }
  0xfe   :  { %v4465_v55 = vpop.f32.mrf.mxu2 }
 0x100   :  { %v579_v56 = vpop.f32.mrf.mxu0 }
 0x101   :  { %v721_v16 = vpack.c.bf16 %v579_v56, %v577_v54  ;;  %v3793_v54 = vld [vmem:[#allocation2 + $0x260] sm:$0xf] }
 0x106   :  { %v4467_v57 = vpop.f32.mrf.mxu2 }
 0x107   :  { %v737_v35 = vpack.c.bf16 %v4467_v57, %v4465_v55  ;;  %v4520_v55 = vor.u32 %v4110_v34, %v3793_v54  ;;  %v3809_v57 = vld [vmem:[#allocation2 + $0x280] sm:$0xf]  ;;  %v4130_v54 = vld [vmem:[#allocation2 + $0x30c] sm:$0xf0]  ;;  %v4032_v34 = vld [vmem:[#allocation2 + $0x4] sm:$0xf] }
 0x108   :  { %v582_v60 = vpop.f32.mrf.mxu0 }
 0x109   :  { %5968 = vst [vmem:[#allocation21_spill] sm:$0xff] %v4520_v55 }
 0x10b   :  { %621 = vmatmul.bf16.gmra.mxu0 %v4173_v58  ;;  %701 = vmatmul.bf16.gmra.mxu2 %v4189_v59  ;;  %v4114_v58 = vld [vmem:[#allocation2 + $0x28c] sm:$0xf0] }
 0x10e   :  { %v662_v61 = vpop.f32.mrf.mxu2 }
 0x110   :  { %v584_v62 = vpop.f32.mrf.mxu0 }
 0x111   :  { %v722_v15 = vpack.c.bf16 %v584_v62, %v582_v60  ;;  %v4523_v60 = vor.u32 %v4114_v58, %v3809_v57 }
 0x113   :  { %5969 = vst [vmem:[#allocation22_spill] sm:$0xff] %v4523_v60 }
 0x116   :  { %v664_v63 = vpop.f32.mrf.mxu2 }
 0x117   :  { %v738_v31 = vpack.c.bf16 %v664_v63, %v662_v61 }
 0x118   :  { %v587_v2 = vpop.f32.mrf.mxu0 }
 0x11b   :  { %626 = vmatmul.bf16.gmra.mxu0 %v4174_v0  ;;  %706 = vmatmul.bf16.gmra.mxu2 %v4190_v1  ;;  %v3825_v0 = vld [vmem:[#allocation2 + $0x2a0] sm:$0xf]  ;;  %v4118_v1 = vld [vmem:[#allocation2 + $0x2ac] sm:$0xf0] }
 0x11e   :  { %v667_v3 = vpop.f32.mrf.mxu2 }
 0x120   :  { %v589_v4 = vpop.f32.mrf.mxu0 }
 0x121   :  { %v723_v12 = vpack.c.bf16 %v589_v4, %v587_v2 }
 0x126   :  { %v669_v5 = vpop.f32.mrf.mxu2 }
 0x127   :  { %v739_v28 = vpack.c.bf16 %v669_v5, %v667_v3  ;;  %v4526_v3 = vor.u32 %v4118_v1, %v3825_v0  ;;  %v3523_v0 = vld [vmem:[#allocation2 + $0x50] sm:$0xf0]  ;;  %v3537_v1 = vld [vmem:[#allocation2 + $0x60] sm:$0xf] }
 0x128   :  { %v592_v8 = vpop.f32.mrf.mxu0 }
 0x129   :  { %5970 = vst [vmem:[#allocation23_spill] sm:$0xff] %v4526_v3 }
 0x12b   :  { %631 = vmatmul.bf16.gmra.mxu0 %v4175_v6  ;;  %711 = vmatmul.bf16.gmra.mxu2 %v4191_v7  ;;  %v3841_v7 = vld [vmem:[#allocation2 + $0x2c0] sm:$0xf] }
 0x12e   :  { %v672_v9 = vpop.f32.mrf.mxu2 }
 0x130   :  { %v594_v10 = vpop.f32.mrf.mxu0 }
 0x131   :  { %v724_v11 = vpack.c.bf16 %v594_v10, %v592_v8  ;;  %v4122_v8 = vld [vmem:[#allocation2 + $0x2cc] sm:$0xf0] }
 0x132   :  { %v4529_v10 = vor.u32 %v4122_v8, %v3841_v7 }
 0x133   :  { %1393 = vmatpush.bf16.msra.mxu1 %v724_v11  ;;  %4216 = vmatpush.bf16.msra.mxu3 %v724_v11 }
 0x134   :  { %5971 = vst [vmem:[#allocation24_spill] sm:$0xff] %v4529_v10 }
 0x136   :  { %v674_v13 = vpop.f32.mrf.mxu2 }
 0x137   :  { %1394 = vmatpush.bf16.msra.mxu1 %v723_v12  ;;  %4217 = vmatpush.bf16.msra.mxu3 %v723_v12  ;;  %v740_v23 = vpack.c.bf16 %v674_v13, %v672_v9 }
 0x138   :  { %v4469_v14 = vpop.f32.mrf.mxu0 }
 0x13b   :  { %1395 = vmatpush.bf16.msra.mxu1 %v722_v15  ;;  %4218 = vmatpush.bf16.msra.mxu3 %v722_v15 }
 0x13e   :  { %v4471_v17 = vpop.f32.mrf.mxu2 }
 0x13f   :  { %1396 = vmatpush.bf16.msra.mxu1 %v721_v16  ;;  %4219 = vmatpush.bf16.msra.mxu3 %v721_v16 }
 0x140   :  { %v4473_v18 = vpop.f32.mrf.mxu0 }
 0x143   :  { %1397 = vmatpush.bf16.msra.mxu1 %v720_v50  ;;  %4220 = vmatpush.bf16.msra.mxu3 %v720_v50  ;;  %v4106_v50 = vld [vmem:[#allocation2 + $0x24c] sm:$0xf0] }
 0x146   :  { %v4475_v19 = vpop.f32.mrf.mxu2 }
 0x147   :  { %1398 = vmatpush.bf16.msra.mxu1 %v719_v43  ;;  %4221 = vmatpush.bf16.msra.mxu3 %v719_v43  ;;  %v735_v43 = vpack.c.bf16 %v4459_v44, %v4457_v41  ;;  %v4517_v41 = vor.u32 %v4106_v50, %v3777_v49 }
 0x148   :  { %v4477_v20 = vpop.f32.mrf.mxu0 }
 0x149   :  { %5967 = vst [vmem:[#allocation20_spill] sm:$0xff] %v4517_v41 }
 0x14b   :  { %1399 = vmatpush.bf16.msra.mxu1 %v4453_v36  ;;  %4222 = vmatpush.bf16.msra.mxu3 %v4453_v36  ;;  %v3761_v36 = vld [vmem:[#allocation2 + $0x220] sm:$0xf] }
 0x14c   :  { %v4500_v40 = vor.u32 %v4102_v38, %v3761_v36  ;;  %v4034_v36 = vld [vmem:[#allocation2 + $0xc] sm:$0xf0] }
 0x14e   :  { %v4481_v24 = vpop.f32.mrf.mxu2  ;;  %5966 = vst [vmem:[#allocation19_spill] sm:$0xff] %v4500_v40 }
 0x14f   :  { %1400 = vmatpush.bf16.msra.mxu1 %v4447_v29  ;;  %4223 = vmatpush.bf16.msra.mxu3 %v4447_v29  ;;  %v736_v29 = vpack.c.bf16 %v4463_v51, %v4461_v48  ;;  %v733_v48 = vpack.c.bf16 %v4449_v30, %v4445_v27 }
 0x150   :  { %v4487_v26 = vpop.f32.mrf.mxu0 }
 0x152   :  { %1481 = vmatmul.bf16.vlgmr.msra.gmra.mxu3 %v4483_v25  ;;  %v4078_v25 = vld [vmem:[#allocation2 + $0x16c] sm:$0xf0] }
 0x153   :  { %1731 = vmatpush.bf16.msrb.mxu3 %v740_v23 }
 0x156   :  { %v4490_v32 = vpop.f32.mrf.mxu2 }
 0x157   :  { %1732 = vmatpush.bf16.msrb.mxu3 %v739_v28  ;;  %v3857_v28 = vld [vmem:[#allocation2 + $0x2e0] sm:$0xf] }
 0x158   :  { %v4492_v33 = vpop.f32.mrf.mxu0 }
 0x15b   :  { %1733 = vmatpush.bf16.msrb.mxu3 %v738_v31  ;;  %v4126_v31 = vld [vmem:[#allocation2 + $0x2ec] sm:$0xf0] }
 0x15e   :  { %v4498_v39 = vpop.f32.mrf.mxu2 }
 0x15f   :  { %1734 = vmatpush.bf16.msrb.mxu3 %v737_v35  ;;  %v3489_v35 = vld [vmem:[#allocation2] sm:$0xf] }
 0x160   :  { %v4502_v42 = vpop.f32.mrf.mxu0 }
 0x161   :  { %v727_v49 = vpack.c.bf16 %v4502_v42, %v4492_v33  ;;  %v725_v33 = vpack.c.bf16 %v4473_v18, %v4469_v14  ;;  %v742_v42 = vpack.c.bf16 %v4490_v32, %v4481_v24  ;;  %v741_v14 = vpack.c.bf16 %v4475_v19, %v4471_v17  ;;  %v3889_v24 = vld [vmem:[#allocation2 + $0x320] sm:$0xf]  ;;  %v4134_v32 = vld [vmem:[#allocation2 + $0x32c] sm:$0xf0] }
 0x162   :  { %1486 = vmatmul.bf16.gmra.mxu3 %v4500_v40  ;;  %v3905_v19 = vld [vmem:[#allocation2 + $0x340] sm:$0xf] }
 0x163   :  { %1735 = vmatpush.bf16.msrb.mxu3 %v736_v29  ;;  %v4532_v29 = vor.u32 %v4034_v36, %v3489_v35  ;;  %v3937_v35 = vld [vmem:[#allocation2 + $0x380] sm:$0xf]  ;;  %v4146_v36 = vld [vmem:[#allocation2 + $0x38c] sm:$0xf0] }
 0x164   :  { %v3665_v40 = vld [vmem:[#allocation2 + $0x160] sm:$0xf] }
 0x165   :  { %1401 = vmatmul.bf16.vlgmr.msra.gmra.mxu1 %v4532_v29 }
 0x166   :  { %v4507_v45 = vpop.f32.mrf.mxu2 }
 0x167   :  { %1736 = vmatpush.bf16.msrb.mxu3 %v735_v43  ;;  %v4534_v43 = vor.u32 %v4126_v31, %v3857_v28 }
 0x168   :  { %v4511_v47 = vpop.f32.mrf.mxu0 }
 0x169   :  { %5972 = vst [vmem:[#allocation25_spill] sm:$0xff] %v4534_v43 }
 0x16b   :  { %1737 = vmatpush.bf16.msrb.mxu3 %v734_v46 }
 0x16e   :  { %v4515_v51 = vpop.f32.mrf.mxu2 }
 0x16f   :  { %1738 = vmatpush.bf16.msrb.mxu3 %v733_v48 }
 0x170   :  { %v614_v44 = vpop.f32.mrf.mxu0 }
 0x171   :  { %v728_v46 = vpack.c.bf16 %v614_v44, %v4511_v47  ;;  %v743_v47 = vpack.c.bf16 %v4507_v45, %v4498_v39  ;;  %v3873_v44 = vld [vmem:[#allocation2 + $0x300] sm:$0xf]  ;;  %v4036_v39 = vld [vmem:[#allocation2 + $0x24] sm:$0xf]  ;;  %v3507_v45 = vld [vmem:[#allocation2 + $0x30] sm:$0xf0] }
 0x172   :  { %1491 = vmatmul.bf16.gmra.mxu3 %v4517_v41 }
 0x176   :  { %v694_v52 = vpop.f32.mrf.mxu2 }
 0x177   :  { %v744_v50 = vpack.c.bf16 %v694_v52, %v4515_v51  ;;  %v3521_v52 = vld [vmem:[#allocation2 + $0x40] sm:$0xf] }
 0x178   :  { %v617_v53 = vpop.f32.mrf.mxu0 }
 0x17e   :  { %v697_v37 = vpop.f32.mrf.mxu2 }
 0x180   :  { %v619_v56 = vpop.f32.mrf.mxu0 }
 0x181   :  { %v729_v23 = vpack.c.bf16 %v619_v56, %v617_v53  ;;  %v726_v53 = vpack.c.bf16 %v4487_v26, %v4477_v20  ;;  %v3505_v56 = vld [vmem:[#allocation2 + $0x20] sm:$0xf]  ;;  %v4552_v20 = vor.u32 %v4130_v54, %v3873_v44 }
 0x182   :  { %1496 = vmatmul.bf16.gmra.mxu3 %v4520_v55 }
 0x183   :  { %5973 = vst [vmem:[#allocation26_spill] sm:$0xff] %v4552_v20 }
 0x186   :  { %v699_v27 = vpop.f32.mrf.mxu2 }
 0x187   :  { %v745_v48 = vpack.c.bf16 %v699_v27, %v697_v37  ;;  %v3491_v37 = vld [vmem:[#allocation2 + $0x10] sm:$0xf0]  ;;  %v4038_v27 = vld [vmem:[#allocation2 + $0x2c] sm:$0xf0] }
 0x188   :  { %v622_v30 = vpop.f32.mrf.mxu0  ;;  %v4550_v51 = vor.u32 %v4038_v27, %v3505_v56  ;;  %v4554_v26 = vor.u32 %v4032_v34, %v3491_v37  ;;  %v3953_v34 = vld [vmem:[#allocation2 + $0x3a0] sm:$0xf]  ;;  %v4150_v37 = vld [vmem:[#allocation2 + $0x3ac] sm:$0xf0]  ;;  %v4052_v56 = vld [vmem:[#allocation2 + $0xa4] sm:$0xf] }
 0x189   :  { %v3571_v27 = vld [vmem:[#allocation2 + $0xb0] sm:$0xf0] }
 0x18a   :  { %5974 = vst [vmem:[#allocation27_spill] sm:$0xff] %v4554_v26  ;;  %1406 = vmatmul.bf16.gmra.mxu1 %v4550_v51 }
 0x18e   :  { %v702_v59 = vpop.f32.mrf.mxu2 }
 0x190   :  { %v624_v61 = vpop.f32.mrf.mxu0 }
 0x191   :  { %v730_v21 = vpack.c.bf16 %v624_v61, %v622_v30  ;;  %v4042_v30 = vld [vmem:[#allocation2 + $0x4c] sm:$0xf0]  ;;  %v4569_v61 = vor.u32 %v4036_v39, %v3507_v45  ;;  %v4621_v39 = vor.u32 %v4052_v56, %v3571_v27 }
 0x192   :  { %1501 = vmatmul.bf16.gmra.mxu3 %v4523_v60  ;;  %v4565_v58 = vor.u32 %v4042_v30, %v3521_v52  ;;  %v3969_v52 = vld [vmem:[#allocation2 + $0x3c0] sm:$0xf]  ;;  %v4154_v30 = vld [vmem:[#allocation2 + $0x3cc] sm:$0xf0] }
 0x193   :  { %5976 = vst [vmem:[#allocation29_spill] sm:$0xff] %v4569_v61 }
 0x194   :  { %5988 = vst [vmem:[#allocation41_spill] sm:$0xff] %v4621_v39 }
 0x196   :  { %v704_v62 = vpop.f32.mrf.mxu2 }
 0x197   :  { %v746_v38 = vpack.c.bf16 %v704_v62, %v702_v59  ;;  %v4567_v59 = vor.u32 %v4134_v32, %v3889_v24  ;;  %v4138_v62 = vld [vmem:[#allocation2 + $0x34c] sm:$0xf0]  ;;  %v4619_v32 = vor.u32 %v4150_v37, %v3953_v34 }
 0x198   :  { %v627_v63 = vpop.f32.mrf.mxu0  ;;  %v4066_v34 = vld [vmem:[#allocation2 + $0x10c] sm:$0xf0] }
 0x199   :  { %5975 = vst [vmem:[#allocation28_spill] sm:$0xff] %v4567_v59 }
 0x19a   :  { %1411 = vmatmul.bf16.gmra.mxu1 %v4565_v58  ;;  %5987 = vst [vmem:[#allocation40_spill] sm:$0xff] %v4619_v32 }
 0x19e   :  { %v707_v2 = vpop.f32.mrf.mxu2 }
 0x1a0   :  { %v629_v4 = vpop.f32.mrf.mxu0 }
 0x1a1   :  { %v731_v13 = vpack.c.bf16 %v629_v4, %v627_v63  ;;  %v4040_v63 = vld [vmem:[#allocation2 + $0x44] sm:$0xf] }
 0x1a2   :  { %1506 = vmatmul.bf16.gmra.mxu3 %v4526_v3  ;;  %v4582_v7 = vor.u32 %v4040_v63, %v3523_v0  ;;  %v3601_v63 = vld [vmem:[#allocation2 + $0xe0] sm:$0xf]  ;;  %v4062_v0 = vld [vmem:[#allocation2 + $0xec] sm:$0xf0] }
 0x1a4   :  { %5979 = vst [vmem:[#allocation32_spill] sm:$0xff] %v4582_v7 }
 0x1a6   :  { %v709_v5 = vpop.f32.mrf.mxu2 }
 0x1a7   :  { %v747_v22 = vpack.c.bf16 %v709_v5, %v707_v2  ;;  %v4046_v2 = vld [vmem:[#allocation2 + $0x6c] sm:$0xf0] }
 0x1a8   :  { %v632_v6 = vpop.f32.mrf.mxu0  ;;  %v4578_v5 = vor.u32 %v4046_v2, %v3537_v1  ;;  %v4630_v2 = vor.u32 %v4062_v0, %v3601_v63  ;;  %v4064_v63 = vld [vmem:[#allocation2 + $0x104] sm:$0xf]  ;;  %v3619_v0 = vld [vmem:[#allocation2 + $0x110] sm:$0xf0] }
 0x1aa   :  { %5977 = vst [vmem:[#allocation30_spill] sm:$0xff] %v4578_v5  ;;  %1416 = vmatmul.bf16.gmra.mxu1 %v4578_v5  ;;  %v3657_v5 = vld [vmem:[#allocation2 + $0x148] sm:$0xf] }
 0x1ab   :  { %5991 = vst [vmem:[#allocation44_spill] sm:$0xff] %v4630_v2 }
 0x1ae   :  { %v712_v9 = vpop.f32.mrf.mxu2 }
 0x1b0   :  { %v634_v11 = vpop.f32.mrf.mxu0 }
 0x1b1   :  { %v732_v12 = vpack.c.bf16 %v634_v11, %v632_v6  ;;  %v4580_v6 = vor.u32 %v4138_v62, %v3905_v19  ;;  %v4142_v11 = vld [vmem:[#allocation2 + $0x36c] sm:$0xf0]  ;;  %v4056_v19 = vld [vmem:[#allocation2 + $0xc4] sm:$0xf]  ;;  %v3587_v62 = vld [vmem:[#allocation2 + $0xd0] sm:$0xf0] }
 0x1b2   :  { %1511 = vmatmul.bf16.gmra.mxu3 %v4529_v10 }
 0x1b3   :  { %1562 = vmatpush.bf16.msrb.mxu2 %v732_v12  ;;  %5978 = vst [vmem:[#allocation31_spill] sm:$0xff] %v4580_v6  ;;  %v4044_v12 = vld [vmem:[#allocation2 + $0x64] sm:$0xf] }
 0x1b6   :  { %v714_v15 = vpop.f32.mrf.mxu2 }
 0x1b7   :  { %1563 = vmatpush.bf16.msrb.mxu2 %v731_v13  ;;  %v748_v16 = vpack.c.bf16 %v714_v15, %v712_v9  ;;  %v3921_v9 = vld [vmem:[#allocation2 + $0x360] sm:$0xf]  ;;  %v3539_v13 = vld [vmem:[#allocation2 + $0x70] sm:$0xf0] }
 0x1b8   :  { %v3553_v15 = vld [vmem:[#allocation2 + $0x80] sm:$0xf]  ;;  %v4595_v28 = vor.u32 %v4044_v12, %v3539_v13  ;;  %v4033_v12 = vld [vmem:[#allocation2 + $0xc] sm:$0xf]  ;;  %v3499_v13 = vld [vmem:[#allocation2 + $0x18] sm:$0xf0] }
 0x1b9   :  { %1900 = vmatpush.bf16.msrb.mxu0 %v748_v16  ;;  %v4050_v16 = vld [vmem:[#allocation2 + $0x8c] sm:$0xf0] }
 0x1ba   :  { %5982 = vst [vmem:[#allocation35_spill] sm:$0xff] %v4595_v28 }
 0x1bb   :  { %1564 = vmatpush.bf16.msrb.mxu2 %v730_v21 }
 0x1bd   :  { %1901 = vmatpush.bf16.msrb.mxu0 %v747_v22  ;;  %v4591_v22 = vor.u32 %v4050_v16, %v3553_v15  ;;  %v4637_v15 = vor.u32 %v4033_v12, %v3499_v13  ;;  %v3497_v12 = vld [vmem:[#allocation2 + $0x8] sm:$0xf]  ;;  %v4035_v13 = vld [vmem:[#allocation2 + $0x14] sm:$0xf0] }
 0x1bf   :  { %1565 = vmatpush.bf16.msrb.mxu2 %v729_v23  ;;  %5980 = vst [vmem:[#allocation33_spill] sm:$0xff] %v4591_v22  ;;  %v4593_v23 = vor.u32 %v4142_v11, %v3921_v9  ;;  %1421 = vmatmul.bf16.gmra.mxu1 %v4591_v22  ;;  %v4632_v9 = vor.u32 %v4154_v30, %v3969_v52  ;;  %v3515_v52 = vld [vmem:[#allocation2 + $0x38] sm:$0xf0] }
 0x1c0   :  { %v4634_v11 = vor.u32 %v4056_v19, %v3587_v62  ;;  %5994 = vst [vmem:[#allocation47_spill] sm:$0xff] %v4637_v15 }
 0x1c1   :  { %1902 = vmatpush.bf16.msrb.mxu0 %v746_v38  ;;  %5981 = vst [vmem:[#allocation34_spill] sm:$0xff] %v4593_v23  ;;  %v4048_v38 = vld [vmem:[#allocation2 + $0x84] sm:$0xf] }
 0x1c2   :  { %1516 = vmatmul.bf16.gmra.mxu3 %v4534_v43  ;;  %5992 = vst [vmem:[#allocation45_spill] sm:$0xff] %v4632_v9 }
 0x1c3   :  { %1566 = vmatpush.bf16.msrb.mxu2 %v728_v46  ;;  %v3555_v46 = vld [vmem:[#allocation2 + $0x90] sm:$0xf0]  ;;  %5993 = vst [vmem:[#allocation46_spill] sm:$0xff] %v4634_v11 }
 0x1c4   :  { %v4608_v44 = vor.u32 %v4048_v38, %v3555_v46  ;;  %v4060_v38 = vld [vmem:[#allocation2 + $0xe4] sm:$0xf]  ;;  %v3603_v46 = vld [vmem:[#allocation2 + $0xf0] sm:$0xf0] }
 0x1c5   :  { %1903 = vmatpush.bf16.msrb.mxu0 %v745_v48  ;;  %v3569_v48 = vld [vmem:[#allocation2 + $0xa0] sm:$0xf] }
 0x1c6   :  { %5985 = vst [vmem:[#allocation38_spill] sm:$0xff] %v4608_v44 }
 0x1c7   :  { %1567 = vmatpush.bf16.msrb.mxu2 %v727_v49  ;;  %v4054_v49 = vld [vmem:[#allocation2 + $0xac] sm:$0xf0] }
 0x1c9   :  { %1904 = vmatpush.bf16.msrb.mxu0 %v744_v50 }
 0x1cb   :  { %1568 = vmatpush.bf16.msrb.mxu2 %v726_v53  ;;  %v4604_v53 = vor.u32 %v4054_v49, %v3569_v48  ;;  %v3617_v49 = vld [vmem:[#allocation2 + $0x100] sm:$0xf] }
 0x1cc   :  { %v4646_v56 = vor.u32 %v4066_v34, %v3617_v49  ;;  %v4664_v34 = vor.u32 %v4064_v63, %v3619_v0 }
 0x1cd   :  { %1905 = vmatpush.bf16.msrb.mxu0 %v743_v47  ;;  %5983 = vst [vmem:[#allocation36_spill] sm:$0xff] %v4604_v53  ;;  %v4606_v47 = vor.u32 %v4146_v36, %v3937_v35  ;;  %v3985_v35 = vld [vmem:[#allocation2 + $0x3e0] sm:$0xf]  ;;  %v4158_v36 = vld [vmem:[#allocation2 + $0x3ec] sm:$0xf0] }
 0x1ce   :  { %5997 = vst [vmem:[#allocation50_spill] sm:$0xff] %v4646_v56  ;;  %v4648_v27 = vor.u32 %v4158_v36, %v3985_v35  ;;  %v3633_v36 = vld [vmem:[#allocation2 + $0x120] sm:$0xf] }
 0x1cf   :  { %1569 = vmatpush.bf16.msrb.mxu2 %v725_v33  ;;  %5984 = vst [vmem:[#allocation37_spill] sm:$0xff] %v4606_v47  ;;  %1426 = vmatmul.bf16.gmra.mxu1 %v4604_v53  ;;  %v3585_v33 = vld [vmem:[#allocation2 + $0xc0] sm:$0xf]  ;;  %v4874_v53 = vstv %s2069_s22 }
 0x1d0   :  { %5998 = vst [vmem:[#allocation51_spill] sm:$0xff] %v4648_v27 }
 0x1d1   :  { %1906 = vmatpush.bf16.msrb.mxu0 %v742_v42  ;;  %v4058_v42 = vld [vmem:[#allocation2 + $0xcc] sm:$0xf0]  ;;  %6004 = vst [vmem:[#allocation57_spill] sm:$0xff] %v4664_v34 }
 0x1d2   :  { %1521 = vmatmul.bf16.gmra.mxu3 %v4552_v20  ;;  %1570 = vmatmul.bf16.vlgmr.msrb.gmra.mxu2 %v4554_v26  ;;  %v4617_v24 = vor.u32 %v4058_v42, %v3585_v33  ;;  %v4650_v33 = vor.u32 %v4060_v38, %v3603_v46  ;;  %v4037_v42 = vld [vmem:[#allocation2 + $0x2c] sm:$0xf]  ;;  %v4070_v38 = vld [vmem:[#allocation2 + $0x12c] sm:$0xf0] }
 0x1d3   :  { %v4653_v30 = vor.u32 %v4037_v42, %v3515_v52  ;;  %v4662_v49 = vor.u32 %v4070_v38, %v3633_v36  ;;  %v4666_v42 = vor.u32 %v4035_v13, %v3497_v12  ;;  %v4041_v52 = vld [vmem:[#allocation2 + $0x4c] sm:$0xf]  ;;  %v4068_v38 = vld [vmem:[#allocation2 + $0x124] sm:$0xf]  ;;  %v4074_v20 = vld [vmem:[#allocation2 + $0x14c] sm:$0xf0] }
 0x1d4   :  { %5986 = vst [vmem:[#allocation39_spill] sm:$0xff] %v4617_v24 }
 0x1d5   :  { %v4561_v18 = vpop.f32.mrf.mxu3  ;;  %1907 = vmatpush.bf16.msrb.mxu0 %v741_v14  ;;  %5999 = vst [vmem:[#allocation52_spill] sm:$0xff] %v4650_v33 }
 0x1d6   :  { %6000 = vst [vmem:[#allocation53_spill] sm:$0xff] %v4653_v30 }
 0x1d7   :  { %6003 = vst [vmem:[#allocation56_spill] sm:$0xff] %v4662_v49 }
 0x1d8   :  { %1908 = vmatmul.bf16.vlgmr.msrb.gmra.mxu0 %v4637_v15  ;;  %6005 = vst [vmem:[#allocation58_spill] sm:$0xff] %v4666_v42 }
 0x1dd   :  { %v4563_v57 = vpop.f32.mrf.mxu3 }
 0x1df   :  { %1431 = vmatmul.bf16.gmra.mxu1 %v4617_v24 }
 0x1e2   :  { %1526 = vmatmul.bf16.gmra.mxu3 %v4567_v59  ;;  %1575 = vmatmul.bf16.gmra.mxu2 %v4569_v61  ;;  %v1402_v48 = vpop.f32.mrf.mxu1  ;;  %v3649_v59 = vld [vmem:[#allocation2 + $0x140] sm:$0xf] }
 0x1e3   :  { %v4687_v10 = vor.u32 %v4074_v20, %v3649_v59 }
 0x1e5   :  { %v4574_v17 = vpop.f32.mrf.mxu3  ;;  %6009 = vst [vmem:[#allocation62_spill] sm:$0xff] %v4687_v10 }
 0x1e8   :  { %1913 = vmatmul.bf16.gmra.mxu0 %v4653_v30  ;;  %v4709_v30 = vor.u32 %v4078_v25, %v3665_v40 }
 0x1ea   :  { %v1404_v19 = vpop.f32.mrf.mxu1  ;;  %6015 = vst [vmem:[#allocation68_spill] sm:$0xff] %v4709_v30 }
 0x1ed   :  { %v4576_v4 = vpop.f32.mrf.mxu3 }
 0x1ef   :  { %1436 = vmatmul.bf16.gmra.mxu1 %v4630_v2  ;;  %v4067_v2 = vld [vmem:[#allocation2 + $0x114] sm:$0xf0] }
 0x1f2   :  { %1531 = vmatmul.bf16.gmra.mxu3 %v4580_v6  ;;  %1580 = vmatmul.bf16.gmra.mxu2 %v4582_v7 }
 0x1f5   :  { %v4587_v8 = vpop.f32.mrf.mxu3 }
 0x1fd   :  { %v4589_v21 = vpop.f32.mrf.mxu3 }
 0x1ff   :  { %1441 = vmatmul.bf16.gmra.mxu1 %v4646_v56 }
 0x202   :  { %1536 = vmatmul.bf16.gmra.mxu3 %v4593_v23  ;;  %1585 = vmatmul.bf16.gmra.mxu2 %v4595_v28  ;;  %v3635_v23 = vld [vmem:[#allocation2 + $0x130] sm:$0xf0] }
 0x203   :  { %v4689_v3 = vor.u32 %v4068_v38, %v3635_v23  ;;  %v4072_v38 = vld [vmem:[#allocation2 + $0x144] sm:$0xf] }
 0x205   :  { %v4600_v31 = vpop.f32.mrf.mxu3  ;;  %6010 = vst [vmem:[#allocation63_spill] sm:$0xff] %v4689_v3 }
 0x207   :  { %v1407_v35 = vpop.f32.mrf.mxu1 }
 0x20d   :  { %v4602_v50 = vpop.f32.mrf.mxu3 }
 0x20f   :  { %1446 = vmatmul.bf16.gmra.mxu1 %v4662_v49  ;;  %v1409_v0 = vpop.f32.mrf.mxu1 }
 0x212   :  { %1541 = vmatmul.bf16.gmra.mxu3 %v4606_v47  ;;  %1590 = vmatmul.bf16.gmra.mxu2 %v4608_v44 }
 0x215   :  { %v4613_v54 = vpop.f32.mrf.mxu3 }
 0x217   :  { %v1412_v6 = vpop.f32.mrf.mxu1 }
 0x21d   :  { %v4615_v14 = vpop.f32.mrf.mxu3 }
 0x21f   :  { %1451 = vmatmul.bf16.gmra.mxu1 %v4687_v10  ;;  %v1414_v20 = vpop.f32.mrf.mxu1 }
 0x222   :  { %1546 = vmatmul.bf16.gmra.mxu3 %v4619_v32  ;;  %1595 = vmatmul.bf16.gmra.mxu2 %v4621_v39 }
 0x225   :  { %v4626_v45 = vpop.f32.mrf.mxu3 }
 0x226   :  { %5989 = vst [vmem:[#allocation42_spill] sm:$0xff] %v4626_v45  ;;  %v4083_v45 = vld [vmem:[#allocation2 + $0x194] sm:$0xf0] }
 0x22d   :  { %v4628_v1 = vpop.f32.mrf.mxu3 }
 0x22e   :  { %5990 = vst [vmem:[#allocation43_spill] sm:$0xff] %v4628_v1  ;;  %v3673_v1 = vld [vmem:[#allocation2 + $0x168] sm:$0xf] }
 0x22f   :  { %1456 = vmatmul.bf16.gmra.mxu1 %v4709_v30 }
 0x232   :  { %1551 = vmatmul.bf16.gmra.mxu3 %v4632_v9  ;;  %1600 = vmatmul.bf16.gmra.mxu2 %v4634_v11  ;;  %v3531_v9 = vld [vmem:[#allocation2 + $0x58] sm:$0xf0] }
 0x233   :  { %v4674_v32 = vor.u32 %v4041_v52, %v3531_v9  ;;  %v3513_v9 = vld [vmem:[#allocation2 + $0x28] sm:$0xf]  ;;  %v4039_v52 = vld [vmem:[#allocation2 + $0x34] sm:$0xf0] }
 0x234   :  { %v4691_v60 = vor.u32 %v4039_v52, %v3513_v9  ;;  %v3651_v52 = vld [vmem:[#allocation2 + $0x150] sm:$0xf0] }
 0x235   :  { %v4642_v16 = vpop.f32.mrf.mxu3  ;;  %6006 = vst [vmem:[#allocation59_spill] sm:$0xff] %v4674_v32  ;;  %1918 = vmatmul.bf16.gmra.mxu0 %v4674_v32 }
 0x236   :  { %5995 = vst [vmem:[#allocation48_spill] sm:$0xff] %v4642_v16 }
 0x237   :  { %6011 = vst [vmem:[#allocation64_spill] sm:$0xff] %v4691_v60 }
 0x23d   :  { %v4644_v37 = vpop.f32.mrf.mxu3 }
 0x23e   :  { %5996 = vst [vmem:[#allocation49_spill] sm:$0xff] %v4644_v37  ;;  %v4077_v37 = vld [vmem:[#allocation2 + $0x16c] sm:$0xf] }
 0x242   :  { %1556 = vmatmul.bf16.gmra.mxu3 %v4648_v27  ;;  %1605 = vmatmul.bf16.gmra.mxu2 %v4650_v33  ;;  %v4672_v27 = vld [vmem:[%s5854_s4] ss:$0 sm:$0xff] }
 0x243   :  { %v1403_v63 = vadd.f32 %v4672_v27, %v1402_v48  ;;  %v1405_v47 = vadd.f32 %v4672_v27, %v1404_v19  ;;  %v4045_v19 = vld [vmem:[#allocation2 + $0x6c] sm:$0xf]  ;;  %v1408_v41 = vadd.f32 %v4672_v27, %v1407_v35  ;;  %v1410_v9 = vadd.f32 %v4672_v27, %v1409_v0 }
 0x244   :  { %v4049_v0 = vld [vmem:[#allocation2 + $0x8c] sm:$0xf] }
 0x245   :  { %v4658_v62 = vpop.f32.mrf.mxu3 }
 0x246   :  { %6001 = vst [vmem:[#allocation54_spill] sm:$0xff] %v4658_v62 }
 0x24d   :  { %v4660_v46 = vpop.f32.mrf.mxu3 }
 0x24e   :  { %6002 = vst [vmem:[#allocation55_spill] sm:$0xff] %v4660_v46 }
 0x252   :  { %1610 = vmatmul.bf16.gmra.mxu2 %v4664_v34  ;;  %1739 = vmatmul.bf16.vlgmr.msrb.gmra.mxu3 %v4666_v42  ;;  %v4082_v34 = vld [vmem:[#allocation2 + $0x18c] sm:$0xf0] }
 0x255   :  { %v4680_v12 = vpop.f32.mrf.mxu3  ;;  %v1571_v13 = vpop.f32.mrf.mxu2 }
 0x256   :  { %6007 = vst [vmem:[#allocation60_spill] sm:$0xff] %v4680_v12  ;;  %v4682_v36 = vadd.f32 %v1571_v13, %v1403_v63  ;;  %v3547_v13 = vld [vmem:[#allocation2 + $0x78] sm:$0xf0]  ;;  %v4071_v12 = vld [vmem:[#allocation2 + $0x134] sm:$0xf0] }
 0x257   :  { %v4696_v55 = vor.u32 %v4045_v19, %v3547_v13  ;;  %v4043_v19 = vld [vmem:[#allocation2 + $0x54] sm:$0xf0]  ;;  %v1417_v13 = vpop.f32.mrf.mxu1 }
 0x258   :  { %v1418_v39 = vadd.f32 %v4672_v27, %v1417_v13 }
 0x259   :  { %6012 = vst [vmem:[#allocation65_spill] sm:$0xff] %v4696_v55  ;;  %1923 = vmatmul.bf16.gmra.mxu0 %v4696_v55  ;;  %v4711_v55 = vor.u32 %v4072_v38, %v3651_v52  ;;  %v4076_v52 = vld [vmem:[#allocation2 + $0x164] sm:$0xf] }
 0x25b   :  { %6016 = vst [vmem:[#allocation69_spill] sm:$0xff] %v4711_v55 }
 0x25d   :  { %v4685_v43 = vpop.f32.mrf.mxu3  ;;  %v1573_v48 = vpop.f32.mrf.mxu2 }
 0x25e   :  { %6008 = vst [vmem:[#allocation61_spill] sm:$0xff] %v4685_v43  ;;  %v4693_v63 = vadd.f32 %v1573_v48, %v1405_v47  ;;  %v3529_v48 = vld [vmem:[#allocation2 + $0x48] sm:$0xf] }
 0x25f   :  { %v4713_v15 = vor.u32 %v4043_v19, %v3529_v48  ;;  %v1419_v25 = vpop.f32.mrf.mxu1  ;;  %v1415_v48 = vadd.f32 %v4672_v27, %v1414_v20  ;;  %v3667_v19 = vld [vmem:[#allocation2 + $0x170] sm:$0xf0]  ;;  %v4053_v20 = vld [vmem:[#allocation2 + $0xac] sm:$0xf] }
 0x261   :  { %6017 = vst [vmem:[#allocation70_spill] sm:$0xff] %v4713_v15 }
 0x262   :  { %1615 = vmatmul.bf16.gmra.mxu2 %v4689_v3  ;;  %1744 = vmatmul.bf16.gmra.mxu3 %v4691_v60  ;;  %v1413_v60 = vadd.f32 %v4672_v27, %v1412_v6 }
 0x265   :  { %v4702_v59 = vpop.f32.mrf.mxu3  ;;  %v1576_v23 = vpop.f32.mrf.mxu2 }
 0x266   :  { %6013 = vst [vmem:[#allocation66_spill] sm:$0xff] %v4702_v59  ;;  %v4704_v47 = vadd.f32 %v1576_v23, %v1408_v41  ;;  %v3563_v23 = vld [vmem:[#allocation2 + $0x98] sm:$0xf0] }
 0x267   :  { %v4718_v3 = vor.u32 %v4049_v0, %v3563_v23  ;;  %v4047_v0 = vld [vmem:[#allocation2 + $0x74] sm:$0xf0]  ;;  %v1422_v23 = vpop.f32.mrf.mxu1 }
 0x268   :  { %v1423_v10 = vadd.f32 %v4672_v27, %v1422_v23 }
 0x269   :  { %6018 = vst [vmem:[#allocation71_spill] sm:$0xff] %v4718_v3  ;;  %1928 = vmatmul.bf16.gmra.mxu0 %v4718_v3  ;;  %v4733_v3 = vor.u32 %v4076_v52, %v3667_v19  ;;  %v4080_v19 = vld [vmem:[#allocation2 + $0x184] sm:$0xf] }
 0x26b   :  { %6022 = vst [vmem:[#allocation75_spill] sm:$0xff] %v4733_v3 }
 0x26d   :  { %v4707_v32 = vpop.f32.mrf.mxu3  ;;  %v1578_v35 = vpop.f32.mrf.mxu2 }
 0x26e   :  { %6014 = vst [vmem:[#allocation67_spill] sm:$0xff] %v4707_v32  ;;  %v4715_v41 = vadd.f32 %v1578_v35, %v1410_v9  ;;  %v3545_v35 = vld [vmem:[#allocation2 + $0x68] sm:$0xf] }
 0x26f   :  { %v4735_v33 = vor.u32 %v4047_v0, %v3545_v35  ;;  %v1420_v35 = vadd.f32 %v4672_v27, %v1419_v25  ;;  %v3683_v0 = vld [vmem:[#allocation2 + $0x190] sm:$0xf0]  ;;  %v4057_v25 = vld [vmem:[#allocation2 + $0xcc] sm:$0xf] }
 0x270   :  { %v4757_v44 = vor.u32 %v4080_v19, %v3683_v0  ;;  %v4084_v0 = vld [vmem:[#allocation2 + $0x1a4] sm:$0xf] }
 0x271   :  { %6023 = vst [vmem:[#allocation76_spill] sm:$0xff] %v4735_v33 }
 0x272   :  { %1620 = vmatmul.bf16.gmra.mxu2 %v4711_v55  ;;  %1749 = vmatmul.bf16.gmra.mxu3 %v4713_v15  ;;  %v3681_v55 = vld [vmem:[#allocation2 + $0x180] sm:$0xf]  ;;  %6028 = vst [vmem:[#allocation81_spill] sm:$0xff] %v4757_v44 }
 0x273   :  { %v4731_v42 = vor.u32 %v4082_v34, %v3681_v55  ;;  %v4746_v55 = vpop.f32.mrf.mxu1 }
 0x275   :  { %v4724_v40 = vpop.f32.mrf.mxu3  ;;  %v1581_v38 = vpop.f32.mrf.mxu2  ;;  %6021 = vst [vmem:[#allocation74_spill] sm:$0xff] %v4731_v42  ;;  %1461 = vmatmul.bf16.gmra.mxu1 %v4731_v42  ;;  %v3697_v42 = vld [vmem:[#allocation2 + $0x1a0] sm:$0xf] }
 0x276   :  { %6019 = vst [vmem:[#allocation72_spill] sm:$0xff] %v4724_v40  ;;  %v4726_v9 = vadd.f32 %v1581_v38, %v1413_v60  ;;  %v3579_v38 = vld [vmem:[#allocation2 + $0xb8] sm:$0xf0] }
 0x277   :  { %v4740_v11 = vor.u32 %v4053_v20, %v3579_v38  ;;  %v4051_v20 = vld [vmem:[#allocation2 + $0x94] sm:$0xf0] }
 0x279   :  { %6024 = vst [vmem:[#allocation77_spill] sm:$0xff] %v4740_v11  ;;  %1933 = vmatmul.bf16.gmra.mxu0 %v4740_v11 }
 0x27b   :  { %v1427_v38 = vpop.f32.mrf.mxu1 }
 0x27d   :  { %v4729_v15 = vpop.f32.mrf.mxu3  ;;  %v1583_v6 = vpop.f32.mrf.mxu2 }
 0x27e   :  { %6020 = vst [vmem:[#allocation73_spill] sm:$0xff] %v4729_v15  ;;  %v4737_v60 = vadd.f32 %v1583_v6, %v1415_v48  ;;  %v3561_v6 = vld [vmem:[#allocation2 + $0x88] sm:$0xf]  ;;  %v3643_v15 = vld [vmem:[#allocation2 + $0x138] sm:$0xf0] }
 0x27f   :  { %v4759_v30 = vor.u32 %v4051_v20, %v3561_v6  ;;  %v3699_v6 = vld [vmem:[#allocation2 + $0x1b0] sm:$0xf0]  ;;  %v3577_v20 = vld [vmem:[#allocation2 + $0xa8] sm:$0xf] }
 0x281   :  { %6029 = vst [vmem:[#allocation82_spill] sm:$0xff] %v4759_v30 }
 0x282   :  { %1625 = vmatmul.bf16.gmra.mxu2 %v4733_v3  ;;  %1754 = vmatmul.bf16.gmra.mxu3 %v4735_v33  ;;  %v4086_v3 = vld [vmem:[#allocation2 + $0x1ac] sm:$0xf0] }
 0x283   :  { %v4755_v11 = vor.u32 %v4086_v3, %v3697_v42  ;;  %v4770_v3 = vpop.f32.mrf.mxu1 }
 0x285   :  { %v4748_v34 = vpop.f32.mrf.mxu3  ;;  %v1586_v52 = vpop.f32.mrf.mxu2  ;;  %6027 = vst [vmem:[#allocation80_spill] sm:$0xff] %v4755_v11  ;;  %1466 = vmatmul.bf16.gmra.mxu1 %v4755_v11  ;;  %v4090_v11 = vld [vmem:[#allocation2 + $0x1cc] sm:$0xf0] }
 0x286   :  { %6025 = vst [vmem:[#allocation78_spill] sm:$0xff] %v4748_v34  ;;  %v4750_v48 = vadd.f32 %v1586_v52, %v1418_v39  ;;  %v3595_v52 = vld [vmem:[#allocation2 + $0xd8] sm:$0xf0]  ;;  %v4810_v34 = vpop.f32.mrf.mxu0 }
 0x287   :  { %v4764_v28 = vor.u32 %v4057_v25, %v3595_v52  ;;  %v3713_v52 = vld [vmem:[#allocation2 + $0x1c0] sm:$0xf] }
 0x288   :  { %v4780_v23 = vor.u32 %v4090_v11, %v3713_v52  ;;  %v4206_v52 = vld [vmem:[#allocation9 + $0x30] sm:$0xff] }
 0x289   :  { %6030 = vst [vmem:[#allocation83_spill] sm:$0xff] %v4764_v28  ;;  %1938 = vmatmul.bf16.gmra.mxu0 %v4764_v28  ;;  %v4782_v28 = vor.u32 %v4084_v0, %v3699_v6 }
 0x28a   :  { %6033 = vst [vmem:[#allocation86_spill] sm:$0xff] %v4780_v23 }
 0x28b   :  { %v1432_v25 = vpop.f32.mrf.mxu1  ;;  %6034 = vst [vmem:[#allocation87_spill] sm:$0xff] %v4782_v28 }
 0x28d   :  { %v4753_v33 = vpop.f32.mrf.mxu3  ;;  %v1588_v13 = vpop.f32.mrf.mxu2 }
 0x28e   :  { %6026 = vst [vmem:[#allocation79_spill] sm:$0xff] %v4753_v33  ;;  %v4761_v39 = vadd.f32 %v1588_v13, %v1420_v35  ;;  %v4055_v13 = vld [vmem:[#allocation2 + $0xb4] sm:$0xf0] }
 0x28f   :  { %v4784_v7 = vor.u32 %v4055_v13, %v3577_v20  ;;  %v4207_v20 = vld [vmem:[#allocation9 + $0x38] sm:$0xff] }
 0x290   :  { %2359 = vmatpush.bf16.msrb.mxu1 %v4207_v20  ;;  %v4065_v20 = vld [vmem:[#allocation2 + $0x10c] sm:$0xf] }
 0x291   :  { %6035 = vst [vmem:[#allocation88_spill] sm:$0xff] %v4784_v7 }
 0x292   :  { %1630 = vmatmul.bf16.gmra.mxu2 %v4757_v44  ;;  %1759 = vmatmul.bf16.gmra.mxu3 %v4759_v30 }
 0x293   :  { %v4793_v11 = vpop.f32.mrf.mxu1 }
 0x294   :  { %2360 = vmatpush.bf16.msrb.mxu1 %v4206_v52  ;;  %v3627_v52 = vld [vmem:[#allocation2 + $0x118] sm:$0xf0] }
 0x295   :  { %v4772_v42 = vpop.f32.mrf.mxu3  ;;  %v1591_v19 = vpop.f32.mrf.mxu2  ;;  %1471 = vmatmul.bf16.gmra.mxu1 %v4780_v23  ;;  %v3593_v23 = vld [vmem:[#allocation2 + $0xc8] sm:$0xf]  ;;  %v4812_v56 = vor.u32 %v4065_v20, %v3627_v52  ;;  %v4092_v52 = vld [vmem:[#allocation2 + $0x1e4] sm:$0xf] }
 0x296   :  { %6031 = vst [vmem:[#allocation84_spill] sm:$0xff] %v4772_v42  ;;  %v4774_v35 = vadd.f32 %v1591_v19, %v1423_v10  ;;  %v4061_v10 = vld [vmem:[#allocation2 + $0xec] sm:$0xf]  ;;  %v3611_v19 = vld [vmem:[#allocation2 + $0xf8] sm:$0xf0]  ;;  %v4824_v20 = vpop.f32.mrf.mxu0 }
 0x297   :  { %v4787_v42 = vor.u32 %v4061_v10, %v3611_v19  ;;  %v4088_v10 = vld [vmem:[#allocation2 + $0x1c4] sm:$0xf]  ;;  %v3715_v19 = vld [vmem:[#allocation2 + $0x1d0] sm:$0xf0]  ;;  %6042 = vst [vmem:[#allocation95_spill] sm:$0xff] %v4812_v56 }
 0x299   :  { %6036 = vst [vmem:[#allocation89_spill] sm:$0xff] %v4787_v42  ;;  %1943 = vmatmul.bf16.gmra.mxu0 %v4787_v42 }
 0x29b   :  { %v1437_v49 = vpop.f32.mrf.mxu1 }
 0x29d   :  { %v4776_v44 = vpop.f32.mrf.mxu3  ;;  %v4778_v30 = vpop.f32.mrf.mxu2 }
 0x29e   :  { %6032 = vst [vmem:[#allocation85_spill] sm:$0xff] %v4776_v44  ;;  %v1428_v44 = vadd.f32 %v4672_v27, %v1427_v38  ;;  %v4094_v38 = vld [vmem:[#allocation2 + $0x1ec] sm:$0xf0] }
 0x2a2   :  { %1635 = vmatmul.bf16.gmra.mxu2 %v4782_v28  ;;  %1764 = vmatmul.bf16.gmra.mxu3 %v4784_v7  ;;  %v4059_v28 = vld [vmem:[#allocation2 + $0xd4] sm:$0xf0]  ;;  %v3729_v7 = vld [vmem:[#allocation2 + $0x1e0] sm:$0xf] }
 0x2a3   :  { %v4803_v33 = vor.u32 %v4094_v38, %v3729_v7  ;;  %v1433_v7 = vadd.f32 %v4672_v27, %v1432_v25  ;;  %v4203_v38 = vld [vmem:[#allocation9 + $0x18] sm:$0xff] }
 0x2a4   :  { %v4063_v25 = vld [vmem:[#allocation2 + $0xf4] sm:$0xf0] }
 0x2a5   :  { %v4795_v0 = vpop.f32.mrf.mxu3  ;;  %v1596_v6 = vpop.f32.mrf.mxu2  ;;  %6039 = vst [vmem:[#allocation92_spill] sm:$0xff] %v4803_v33  ;;  %1476 = vmatmul.bf16.gmra.mxu1 %v4803_v33  ;;  %v4202_v33 = vld [vmem:[#allocation9 + $0x10] sm:$0xff] }
 0x2a6   :  { %6037 = vst [vmem:[#allocation90_spill] sm:$0xff] %v4795_v0  ;;  %v4797_v13 = vadd.f32 %v1596_v6, %v1428_v44  ;;  %v4805_v0 = vor.u32 %v4088_v10, %v3715_v19  ;;  %v4807_v44 = vor.u32 %v4059_v28, %v3593_v23  ;;  %v4205_v6 = vld [vmem:[#allocation9 + $0x28] sm:$0xff]  ;;  %v4204_v10 = vld [vmem:[#allocation9 + $0x20] sm:$0xff]  ;;  %v4818_v28 = vpop.f32.mrf.mxu1 }
 0x2a7   :  { %2361 = vmatpush.bf16.msrb.mxu1 %v4205_v6 }
 0x2a8   :  { %6040 = vst [vmem:[#allocation93_spill] sm:$0xff] %v4805_v0 }
 0x2a9   :  { %6041 = vst [vmem:[#allocation94_spill] sm:$0xff] %v4807_v44  ;;  %1948 = vmatmul.bf16.gmra.mxu0 %v4812_v56 }
 0x2ab   :  { %2362 = vmatpush.bf16.msrb.mxu1 %v4204_v10 }
 0x2ad   :  { %v4799_v61 = vpop.f32.mrf.mxu3  ;;  %v4801_v42 = vpop.f32.mrf.mxu2 }
 0x2ae   :  { %6038 = vst [vmem:[#allocation91_spill] sm:$0xff] %v4799_v61  ;;  %v1442_v61 = vpop.f32.mrf.mxu1 }
 0x2af   :  { %2363 = vmatpush.bf16.msrb.mxu1 %v4203_v38  ;;  %v4069_v38 = vld [vmem:[#allocation2 + $0x12c] sm:$0xf]  ;;  %v1443_v24 = vadd.f32 %v4672_v27, %v1442_v61 }
 0x2b0   :  { %v4836_v40 = vor.u32 %v4069_v38, %v3643_v15  ;;  %v4096_v15 = vld [vmem:[#allocation2 + $0x204] sm:$0xf]  ;;  %v3747_v38 = vld [vmem:[#allocation2 + $0x210] sm:$0xf0] }
 0x2b2   :  { %1640 = vmatmul.bf16.gmra.mxu2 %v4805_v0  ;;  %1769 = vmatmul.bf16.gmra.mxu3 %v4807_v44  ;;  %v3731_v0 = vld [vmem:[#allocation2 + $0x1f0] sm:$0xf0]  ;;  %v3609_v44 = vld [vmem:[#allocation2 + $0xe8] sm:$0xf]  ;;  %6047 = vst [vmem:[#allocation100_spill] sm:$0xff] %v4836_v40 }
 0x2b3   :  { %2364 = vmatpush.bf16.msrb.mxu1 %v4202_v33  ;;  %v4830_v10 = vor.u32 %v4092_v52, %v3731_v0  ;;  %v1438_v33 = vadd.f32 %v4672_v27, %v1437_v49 }
 0x2b5   :  { %v4820_v23 = vpop.f32.mrf.mxu3  ;;  %v1601_v19 = vpop.f32.mrf.mxu2  ;;  %6045 = vst [vmem:[#allocation98_spill] sm:$0xff] %v4830_v10 }
 0x2b6   :  { %6043 = vst [vmem:[#allocation96_spill] sm:$0xff] %v4820_v23  ;;  %v4822_v6 = vadd.f32 %v1601_v19, %v1433_v7  ;;  %v4832_v23 = vor.u32 %v4063_v25, %v3609_v44  ;;  %v4201_v7 = vld [vmem:[#allocation9 + $0x8] sm:$0xff]  ;;  %v4834_v19 = vpop.f32.mrf.mxu0  ;;  %v4842_v0 = vpop.f32.mrf.mxu1 }
 0x2b7   :  { %2365 = vmatpush.bf16.msrb.mxu1 %v4201_v7 }
 0x2b8   :  { %6046 = vst [vmem:[#allocation99_spill] sm:$0xff] %v4832_v23 }
 0x2b9   :  { %1953 = vmatmul.bf16.gmra.mxu0 %v4836_v40  ;;  %v4854_v40 = vor.u32 %v4096_v15, %v3747_v38 }
 0x2bb   :  { %6050 = vst [vmem:[#allocation103_spill] sm:$0xff] %v4854_v40 }
 0x2bd   :  { %v4826_v56 = vpop.f32.mrf.mxu3  ;;  %v4828_v26 = vpop.f32.mrf.mxu2 }
 0x2be   :  { %6044 = vst [vmem:[#allocation97_spill] sm:$0xff] %v4826_v56  ;;  %v4200_v56 = vld [vmem:[#allocation9] sm:$0xff]  ;;  %v4848_v7 = vpop.f32.mrf.mxu0 }
 0x2bf   :  { %2366 = vmatpush.bf16.msrb.mxu1 %v4200_v56 }
 0x2c2   :  { %1645 = vmatmul.bf16.gmra.mxu2 %v4830_v10  ;;  %1774 = vmatmul.bf16.gmra.mxu3 %v4832_v23  ;;  %v3625_v10 = vld [vmem:[#allocation2 + $0x108] sm:$0xf]  ;;  %v1447_v23 = vpop.f32.mrf.mxu1 }
 0x2c3   :  { %v4856_v59 = vor.u32 %v4067_v2, %v3625_v10 }
 0x2c5   :  { %v4844_v44 = vpop.f32.mrf.mxu3  ;;  %v1606_v52 = vpop.f32.mrf.mxu2  ;;  %6051 = vst [vmem:[#allocation104_spill] sm:$0xff] %v4856_v59 }
 0x2c6   :  { %6048 = vst [vmem:[#allocation101_spill] sm:$0xff] %v4844_v44  ;;  %v4846_v25 = vadd.f32 %v1606_v52, %v1438_v33  ;;  %v4858_v56 = vpop.f32.mrf.mxu0  ;;  %v4073_v44 = vld [vmem:[#allocation2 + $0x14c] sm:$0xf]  ;;  %v3659_v33 = vld [vmem:[#allocation2 + $0x158] sm:$0xf0] }
 0x2c7   :  { %v4860_v52 = vor.u32 %v4073_v44, %v3659_v33  ;;  %v4100_v44 = vld [vmem:[#allocation2 + $0x224] sm:$0xf]  ;;  %v3763_v33 = vld [vmem:[#allocation2 + $0x230] sm:$0xf0] }
 0x2c9   :  { %6052 = vst [vmem:[#allocation105_spill] sm:$0xff] %v4860_v52  ;;  %1958 = vmatmul.bf16.gmra.mxu0 %v4860_v52 }
 0x2cd   :  { %v4850_v32 = vpop.f32.mrf.mxu3  ;;  %v4852_v49 = vpop.f32.mrf.mxu2 }
 0x2ce   :  { %6049 = vst [vmem:[#allocation102_spill] sm:$0xff] %v4850_v32  ;;  %v4866_v32 = vpop.f32.mrf.mxu1  ;;  %v4871_v43 = vpop.f32.mrf.mxu0 }
 0x2d2   :  { %1650 = vmatmul.bf16.gmra.mxu2 %v4854_v40  ;;  %1779 = vmatmul.bf16.gmra.mxu3 %v4856_v59  ;;  %v3641_v40 = vld [vmem:[#allocation2 + $0x128] sm:$0xf] }
 0x2d5   :  { %v1611_v15 = vpop.f32.mrf.mxu2  ;;  %v1740_v38 = vpop.f32.mrf.mxu3 }
 0x2d6   :  { %v4868_v2 = vadd.f32 %v1611_v15, %v1443_v24  ;;  %v1741_v10 = vadd.f32 %v1740_v38, %v4682_v36  ;;  %v1452_v61 = vpop.f32.mrf.mxu1  ;;  %v4879_v24 = vor.u32 %v4100_v44, %v3763_v33  ;;  %v4881_v15 = vor.u32 %v4071_v12, %v3641_v40  ;;  %v4885_v22 = vpop.f32.mrf.mxu0 }
 0x2d8   :  { %v1910_v59 = vadd.f32 %v4810_v34, %v1741_v10  ;;  %6053 = vst [vmem:[#allocation106_spill] sm:$0xff] %v4879_v24  ;;  %v3675_v34 = vld [vmem:[#allocation2 + $0x178] sm:$0xf0] }
 0x2d9   :  { %6054 = vst [vmem:[#allocation107_spill] sm:$0xff] %v4881_v15  ;;  %v4887_v10 = vor.u32 %v4077_v37, %v3675_v34 }
 0x2da   :  { %v2135_v36 = vmul.f32 %v4874_v53, %v1910_v59  ;;  %vm2070_vm0 = vcmp.gt.f32.partialorder %v1910_v59, 0.0 }
 0x2db   :  { %6055 = vst [vmem:[#allocation108_spill] sm:$0xff] %v4887_v10  ;;  %1963 = vmatmul.bf16.gmra.mxu0 %v4887_v10 }
 0x2dc   :  { %v2199_v12 = vsel %vm2070_vm0, %v1910_v59, %v2135_v36 }
 0x2dd   :  { %v4876_v52 = vpop.f32.mrf.mxu2  ;;  %v1742_v46 = vpop.f32.mrf.mxu3 }
 0x2de   :  { %v1743_v62 = vadd.f32 %v1742_v46, %v4693_v63  ;;  %v1448_v46 = vadd.f32 %v4672_v27, %v1447_v23  ;;  %v4894_v44 = vpop.f32.mrf.mxu1  ;;  %v4899_v34 = vpop.f32.mrf.mxu0  ;;  %v4075_v23 = vld [vmem:[#allocation2 + $0x154] sm:$0xf0] }
 0x2e0   :  { %v1912_v38 = vadd.f32 %v4824_v20, %v1743_v62 }
 0x2e2   :  { %vm2071_vm1 = vcmp.gt.f32.partialorder %v1912_v38, 0.0  ;;  %v2136_v16 = vmul.f32 %v4874_v53, %v1912_v38  ;;  %1655 = vmatmul.bf16.gmra.mxu2 %v4879_v24  ;;  %1784 = vmatmul.bf16.gmra.mxu3 %v4881_v15  ;;  %v4104_v24 = vld [vmem:[#allocation2 + $0x244] sm:$0xf]  ;;  %v3779_v15 = vld [vmem:[#allocation2 + $0x250] sm:$0xf0] }
 0x2e4   :  { %v2200_v62 = vsel %vm2071_vm1, %v1912_v38, %v2136_v16  ;;  %v4905_v38 = vor.u32 %v4104_v24, %v3779_v15 }
 0x2e5   :  { %v1616_v63 = vpop.f32.mrf.mxu2  ;;  %v1745_v40 = vpop.f32.mrf.mxu3  ;;  %v2263_v20 = vpack.c.bf16 %v2200_v62, %v2199_v12 }
 0x2e6   :  { %v4896_v37 = vadd.f32 %v1616_v63, %v1448_v46  ;;  %v1746_v33 = vadd.f32 %v1745_v40, %v4704_v47  ;;  %6056 = vst [vmem:[#allocation109_spill] sm:$0xff] %v4905_v38  ;;  %v4907_v46 = vor.u32 %v4075_v23, %v3657_v5  ;;  %v1457_v62 = vpop.f32.mrf.mxu1  ;;  %v4911_v63 = vpop.f32.mrf.mxu0  ;;  %v4081_v40 = vld [vmem:[#allocation2 + $0x18c] sm:$0xf]  ;;  %v1453_v5 = vadd.f32 %v4672_v27, %v1452_v61  ;;  %v4079_v61 = vld [vmem:[#allocation2 + $0x174] sm:$0xf0] }
 0x2e7   :  { %2367 = vmatmul.bf16.vlgmr.msrb.gmra.mxu1 %v2263_v20  ;;  %v3691_v20 = vld [vmem:[#allocation2 + $0x198] sm:$0xf0] }
 0x2e8   :  { %v1915_v10 = vadd.f32 %v4834_v19, %v1746_v33  ;;  %6057 = vst [vmem:[#allocation110_spill] sm:$0xff] %v4907_v46  ;;  %v4913_v19 = vor.u32 %v4081_v40, %v3691_v20  ;;  %v4108_v20 = vld [vmem:[#allocation2 + $0x264] sm:$0xf] }
 0x2ea   :  { %v2137_v12 = vmul.f32 %v4874_v53, %v1915_v10  ;;  %vm2072_vm2 = vcmp.gt.f32.partialorder %v1915_v10, 0.0  ;;  %6058 = vst [vmem:[#allocation111_spill] sm:$0xff] %v4913_v19 }
 0x2eb   :  { %1968 = vmatmul.bf16.gmra.mxu0 %v4913_v19 }
 0x2ed   :  { %v4902_v59 = vpop.f32.mrf.mxu2  ;;  %v1747_v16 = vpop.f32.mrf.mxu3 }
 0x2ee   :  { %v1748_v36 = vadd.f32 %v1747_v16, %v4715_v41  ;;  %v2201_v41 = vsel %vm2072_vm2, %v1915_v10, %v2137_v12  ;;  %v4923_v40 = vpop.f32.mrf.mxu0 }
 0x2f0   :  { %v1917_v47 = vadd.f32 %v4848_v7, %v1748_v36 }
 0x2f2   :  { %v2138_v33 = vmul.f32 %v4874_v53, %v1917_v47  ;;  %1660 = vmatmul.bf16.gmra.mxu2 %v4905_v38  ;;  %1789 = vmatmul.bf16.gmra.mxu3 %v4907_v46  ;;  %vm2073_vm3 = vcmp.gt.f32.partialorder %v1917_v47, 0.0  ;;  %v4925_v38 = vpop.f32.mrf.mxu1  ;;  %v3795_v46 = vld [vmem:[#allocation2 + $0x270] sm:$0xf0] }
 0x2f4   :  { %v2202_v7 = vsel %vm2073_vm3, %v1917_v47, %v2138_v33  ;;  %v4931_v33 = vor.u32 %v4108_v20, %v3795_v46 }
 0x2f5   :  { %v1621_v24 = vpop.f32.mrf.mxu2  ;;  %v1750_v15 = vpop.f32.mrf.mxu3  ;;  %v2264_v23 = vpack.c.bf16 %v2202_v7, %v2201_v41 }
 0x2f6   :  { %v4920_v16 = vadd.f32 %v1621_v24, %v1453_v5  ;;  %v1751_v36 = vadd.f32 %v1750_v15, %v4726_v9  ;;  %6059 = vst [vmem:[#allocation112_spill] sm:$0xff] %v4931_v33  ;;  %v4933_v5 = vor.u32 %v4079_v61, %v3673_v1  ;;  %v4937_v7 = vpop.f32.mrf.mxu0  ;;  %v4085_v24 = vld [vmem:[#allocation2 + $0x1ac] sm:$0xf]  ;;  %v3707_v15 = vld [vmem:[#allocation2 + $0x1b8] sm:$0xf0]  ;;  %v1458_v1 = vadd.f32 %v4672_v27, %v1457_v62 }
 0x2f7   :  { %2372 = vmatmul.bf16.gmra.mxu1 %v2264_v23  ;;  %v4939_v23 = vor.u32 %v4085_v24, %v3707_v15  ;;  %v4112_v15 = vld [vmem:[#allocation2 + $0x284] sm:$0xf] }
 0x2f8   :  { %v1920_v19 = vadd.f32 %v4858_v56, %v1751_v36  ;;  %6060 = vst [vmem:[#allocation113_spill] sm:$0xff] %v4933_v5 }
 0x2f9   :  { %6061 = vst [vmem:[#allocation114_spill] sm:$0xff] %v4939_v23 }
 0x2fa   :  { %v2139_v9 = vmul.f32 %v4874_v53, %v1920_v19  ;;  %vm2074_vm4 = vcmp.gt.f32.partialorder %v1920_v19, 0.0  ;;  %v1462_v46 = vpop.f32.mrf.mxu1 }
 0x2fb   :  { %1973 = vmatmul.bf16.gmra.mxu0 %v4939_v23 }
 0x2fd   :  { %v4928_v10 = vpop.f32.mrf.mxu2  ;;  %v1752_v12 = vpop.f32.mrf.mxu3 }
 0x2fe   :  { %v1753_v47 = vadd.f32 %v1752_v12, %v4737_v60  ;;  %v2203_v60 = vsel %vm2074_vm4, %v1920_v19, %v2139_v9  ;;  %v4949_v24 = vpop.f32.mrf.mxu0 }
 0x300   :  { %v1922_v41 = vadd.f32 %v4871_v43, %v1753_v47 }
 0x302   :  { %v2140_v56 = vmul.f32 %v4874_v53, %v1922_v41  ;;  %1665 = vmatmul.bf16.gmra.mxu2 %v4931_v33  ;;  %1794 = vmatmul.bf16.gmra.mxu3 %v4933_v5  ;;  %vm2075_vm5 = vcmp.gt.f32.partialorder %v1922_v41, 0.0  ;;  %v3811_v33 = vld [vmem:[#allocation2 + $0x290] sm:$0xf0]  ;;  %v3689_v5 = vld [vmem:[#allocation2 + $0x188] sm:$0xf] }
 0x304   :  { %v2204_v43 = vsel %vm2075_vm5, %v1922_v41, %v2140_v56  ;;  %v4955_v41 = vor.u32 %v4112_v15, %v3811_v33  ;;  %v4957_v56 = vor.u32 %v4083_v45, %v3689_v5  ;;  %v1463_v45 = vadd.f32 %v4672_v27, %v1462_v46  ;;  %v3827_v46 = vld [vmem:[#allocation2 + $0x2b0] sm:$0xf0] }
 0x305   :  { %v1626_v36 = vpop.f32.mrf.mxu2  ;;  %v1755_v20 = vpop.f32.mrf.mxu3  ;;  %v2265_v61 = vpack.c.bf16 %v2204_v43, %v2203_v60 }
 0x306   :  { %v4946_v12 = vadd.f32 %v1626_v36, %v1458_v1  ;;  %v1756_v47 = vadd.f32 %v1755_v20, %v4750_v48  ;;  %6062 = vst [vmem:[#allocation115_spill] sm:$0xff] %v4955_v41  ;;  %v4959_v1 = vpop.f32.mrf.mxu1  ;;  %v4963_v43 = vpop.f32.mrf.mxu0  ;;  %v4089_v36 = vld [vmem:[#allocation2 + $0x1cc] sm:$0xf]  ;;  %v3723_v20 = vld [vmem:[#allocation2 + $0x1d8] sm:$0xf0] }
 0x307   :  { %2377 = vmatmul.bf16.gmra.mxu1 %v2265_v61  ;;  %6063 = vst [vmem:[#allocation116_spill] sm:$0xff] %v4957_v56 }
 0x308   :  { %v1925_v62 = vadd.f32 %v4885_v22, %v1756_v47  ;;  %v4965_v22 = vor.u32 %v4089_v36, %v3723_v20 }
 0x30a   :  { %v2141_v48 = vmul.f32 %v4874_v53, %v1925_v62  ;;  %vm2076_vm6 = vcmp.gt.f32.partialorder %v1925_v62, 0.0  ;;  %6064 = vst [vmem:[#allocation117_spill] sm:$0xff] %v4965_v22 }
 0x30b   :  { %1978 = vmatmul.bf16.gmra.mxu0 %v4965_v22  ;;  %v4087_v22 = vld [vmem:[#allocation2 + $0x1b4] sm:$0xf0] }
 0x30d   :  { %v4952_v23 = vpop.f32.mrf.mxu2  ;;  %v1757_v19 = vpop.f32.mrf.mxu3 }
 0x30e   :  { %v1758_v9 = vadd.f32 %v1757_v19, %v4761_v39  ;;  %v2205_v39 = vsel %vm2076_vm6, %v1925_v62, %v2141_v48  ;;  %v1425_v19 = vadd.f32 %v4672_v27, %v4746_v55  ;;  %v1467_v36 = vpop.f32.mrf.mxu1  ;;  %v4977_v20 = vpop.f32.mrf.mxu0 }
 0x310   :  { %v1927_v60 = vadd.f32 %v4899_v34, %v1758_v9  ;;  %v1594_v48 = vadd.f32 %v4778_v30, %v1425_v19 }
 0x312   :  { %v2142_v61 = vmul.f32 %v4874_v53, %v1927_v60  ;;  %1670 = vmatmul.bf16.gmra.mxu2 %v4955_v41  ;;  %1799 = vmatmul.bf16.gmra.mxu3 %v4957_v56  ;;  %vm2077_vm7 = vcmp.gt.f32.partialorder %v1927_v60, 0.0  ;;  %v4116_v41 = vld [vmem:[#allocation2 + $0x2a4] sm:$0xf]  ;;  %v3705_v56 = vld [vmem:[#allocation2 + $0x1a8] sm:$0xf] }
 0x313   :  { %v4985_v55 = vor.u32 %v4087_v22, %v3705_v56 }
 0x314   :  { %v2206_v34 = vsel %vm2077_vm7, %v1927_v60, %v2142_v61 }
 0x315   :  { %v1631_v33 = vpop.f32.mrf.mxu2  ;;  %v1760_v5 = vpop.f32.mrf.mxu3  ;;  %v2266_v47 = vpack.c.bf16 %v2206_v34, %v2205_v39  ;;  %v4983_v39 = vor.u32 %v4116_v41, %v3827_v46  ;;  %6066 = vst [vmem:[#allocation119_spill] sm:$0xff] %v4985_v55  ;;  %v1468_v41 = vadd.f32 %v4672_v27, %v1467_v36  ;;  %v4120_v36 = vld [vmem:[#allocation2 + $0x2c4] sm:$0xf] }
 0x316   :  { %v4972_v15 = vadd.f32 %v1631_v33, %v1463_v45  ;;  %v1761_v9 = vadd.f32 %v1760_v5, %v4774_v35  ;;  %v4989_v33 = vpop.f32.mrf.mxu0  ;;  %v4093_v5 = vld [vmem:[#allocation2 + $0x1ec] sm:$0xf]  ;;  %v4997_v56 = vpop.f32.mrf.mxu1 }
 0x317   :  { %2382 = vmatmul.bf16.gmra.mxu1 %v2266_v47  ;;  %6065 = vst [vmem:[#allocation118_spill] sm:$0xff] %v4983_v39  ;;  %v3739_v47 = vld [vmem:[#allocation2 + $0x1f8] sm:$0xf0] }
 0x318   :  { %v1930_v62 = vadd.f32 %v4911_v63, %v1761_v9  ;;  %v4991_v63 = vor.u32 %v4093_v5, %v3739_v47  ;;  %v3843_v47 = vld [vmem:[#allocation2 + $0x2d0] sm:$0xf0] }
 0x31a   :  { %v2143_v35 = vmul.f32 %v4874_v53, %v1930_v62  ;;  %vm2078_vm8 = vcmp.gt.f32.partialorder %v1930_v62, 0.0  ;;  %6067 = vst [vmem:[#allocation120_spill] sm:$0xff] %v4991_v63 }
 0x31b   :  { %1983 = vmatmul.bf16.gmra.mxu0 %v4991_v63  ;;  %v3755_v63 = vld [vmem:[#allocation2 + $0x218] sm:$0xf0] }
 0x31d   :  { %v4981_v60 = vpop.f32.mrf.mxu2  ;;  %v1762_v61 = vpop.f32.mrf.mxu3 }
 0x31e   :  { %v1763_v45 = vadd.f32 %v1762_v61, %v1594_v48  ;;  %v1430_v61 = vadd.f32 %v4672_v27, %v4770_v3  ;;  %v5005_v5 = vpop.f32.mrf.mxu0 }
 0x320   :  { %v1932_v34 = vadd.f32 %v4923_v40, %v1763_v45  ;;  %v2207_v40 = vsel %vm2078_vm8, %v1930_v62, %v2143_v35  ;;  %v1599_v35 = vadd.f32 %v4801_v42, %v1430_v61 }
 0x322   :  { %v2144_v30 = vmul.f32 %v4874_v53, %v1932_v34  ;;  %1675 = vmatmul.bf16.gmra.mxu2 %v4983_v39  ;;  %1804 = vmatmul.bf16.gmra.mxu3 %v4985_v55  ;;  %vm2079_vm9 = vcmp.gt.f32.partialorder %v1932_v34, 0.0  ;;  %v3721_v39 = vld [vmem:[#allocation2 + $0x1c8] sm:$0xf]  ;;  %v4091_v55 = vld [vmem:[#allocation2 + $0x1d4] sm:$0xf0] }
 0x323   :  { %v5013_v3 = vor.u32 %v4091_v55, %v3721_v39 }
 0x324   :  { %v2208_v22 = vsel %vm2079_vm9, %v1932_v34, %v2144_v30  ;;  %v1472_v34 = vpop.f32.mrf.mxu1 }
 0x325   :  { %v1636_v19 = vpop.f32.mrf.mxu2  ;;  %v1765_v9 = vpop.f32.mrf.mxu3  ;;  %v2267_v46 = vpack.c.bf16 %v2208_v22, %v2207_v40  ;;  %v5011_v22 = vor.u32 %v4120_v36, %v3843_v47  ;;  %v1473_v39 = vadd.f32 %v4672_v27, %v1472_v34  ;;  %v4124_v34 = vld [vmem:[#allocation2 + $0x2e4] sm:$0xf] }
 0x326   :  { %v5000_v48 = vadd.f32 %v1636_v19, %v1468_v41  ;;  %v1766_v45 = vadd.f32 %v1765_v9, %v4797_v13  ;;  %v5017_v9 = vpop.f32.mrf.mxu0 }
 0x327   :  { %2387 = vmatmul.bf16.gmra.mxu1 %v2267_v46  ;;  %6068 = vst [vmem:[#allocation121_spill] sm:$0xff] %v5011_v22  ;;  %v4097_v46 = vld [vmem:[#allocation2 + $0x20c] sm:$0xf] }
 0x328   :  { %v1935_v62 = vadd.f32 %v4937_v7, %v1766_v45  ;;  %v5019_v7 = vor.u32 %v4097_v46, %v3755_v63  ;;  %v3859_v46 = vld [vmem:[#allocation2 + $0x2f0] sm:$0xf0] }
 0x32a   :  { %v2145_v13 = vmul.f32 %v4874_v53, %v1935_v62  ;;  %vm2080_vm10 = vcmp.gt.f32.partialorder %v1935_v62, 0.0  ;;  %6069 = vst [vmem:[#allocation122_spill] sm:$0xff] %v5019_v7 }
 0x32b   :  { %1988 = vmatmul.bf16.gmra.mxu0 %v5019_v7  ;;  %v3737_v7 = vld [vmem:[#allocation2 + $0x1e8] sm:$0xf] }
 0x32c   :  { %v2209_v55 = vsel %vm2080_vm10, %v1935_v62, %v2145_v13  ;;  %v5028_v63 = vpop.f32.mrf.mxu1  ;;  %v4095_v62 = vld [vmem:[#allocation2 + $0x1f4] sm:$0xf0] }
 0x32d   :  { %v5009_v30 = vpop.f32.mrf.mxu2  ;;  %v1767_v41 = vpop.f32.mrf.mxu3 }
 0x32e   :  { %v1768_v40 = vadd.f32 %v1767_v41, %v1599_v35  ;;  %v1435_v35 = vadd.f32 %v4672_v27, %v4793_v11 }
 0x330   :  { %v1937_v19 = vadd.f32 %v4949_v24, %v1768_v40  ;;  %v5033_v40 = vpop.f32.mrf.mxu0 }
 0x332   :  { %v2146_v42 = vmul.f32 %v4874_v53, %v1937_v19  ;;  %1680 = vmatmul.bf16.gmra.mxu2 %v5011_v22  ;;  %1809 = vmatmul.bf16.gmra.mxu3 %v5013_v3  ;;  %vm2081_vm11 = vcmp.gt.f32.partialorder %v1937_v19, 0.0  ;;  %v3771_v22 = vld [vmem:[#allocation2 + $0x238] sm:$0xf0] }
 0x334   :  { %v2210_v24 = vsel %vm2081_vm11, %v1937_v19, %v2146_v42  ;;  %v1604_v19 = vadd.f32 %v4828_v26, %v1435_v35 }
 0x335   :  { %v1641_v61 = vpop.f32.mrf.mxu2  ;;  %v1770_v45 = vpop.f32.mrf.mxu3  ;;  %v2268_v36 = vpack.c.bf16 %v2210_v24, %v2209_v55  ;;  %v5039_v24 = vor.u32 %v4124_v34, %v3859_v46 }
 0x336   :  { %v5026_v47 = vadd.f32 %v1641_v61, %v1473_v39  ;;  %v1771_v41 = vadd.f32 %v1770_v45, %v4822_v6  ;;  %v5041_v61 = vor.u32 %v4095_v62, %v3737_v7 }
 0x337   :  { %2392 = vmatmul.bf16.gmra.mxu1 %v2268_v36  ;;  %6070 = vst [vmem:[#allocation123_spill] sm:$0xff] %v5039_v24  ;;  %v4101_v36 = vld [vmem:[#allocation2 + $0x22c] sm:$0xf] }
 0x338   :  { %v1940_v13 = vadd.f32 %v4963_v43, %v1771_v41  ;;  %6071 = vst [vmem:[#allocation124_spill] sm:$0xff] %v5041_v61  ;;  %v5045_v45 = vpop.f32.mrf.mxu0  ;;  %v1477_v43 = vpop.f32.mrf.mxu1  ;;  %v5047_v41 = vor.u32 %v4101_v36, %v3771_v22  ;;  %v1440_v22 = vadd.f32 %v4672_v27, %v4818_v28  ;;  %v4128_v36 = vld [vmem:[#allocation2 + $0x304] sm:$0xf] }
 0x339   :  { %v1478_v7 = vadd.f32 %v4672_v27, %v1477_v43  ;;  %v3753_v43 = vld [vmem:[#allocation2 + $0x208] sm:$0xf] }
 0x33a   :  { %v2147_v11 = vmul.f32 %v4874_v53, %v1940_v13  ;;  %vm2082_vm12 = vcmp.gt.f32.partialorder %v1940_v13, 0.0  ;;  %6072 = vst [vmem:[#allocation125_spill] sm:$0xff] %v5047_v41 }
 0x33b   :  { %1993 = vmatmul.bf16.gmra.mxu0 %v5047_v41 }
 0x33d   :  { %v5037_v42 = vpop.f32.mrf.mxu2  ;;  %v1772_v39 = vpop.f32.mrf.mxu3 }
 0x33e   :  { %v1773_v55 = vadd.f32 %v1772_v39, %v1604_v19 }
 0x340   :  { %v1942_v6 = vadd.f32 %v4977_v20, %v1773_v55  ;;  %v2211_v20 = vsel %vm2082_vm12, %v1940_v13, %v2147_v11  ;;  %v5059_v55 = vpop.f32.mrf.mxu0  ;;  %v1609_v11 = vadd.f32 %v4852_v49, %v1440_v22 }
 0x342   :  { %v2148_v26 = vmul.f32 %v4874_v53, %v1942_v6  ;;  %1685 = vmatmul.bf16.gmra.mxu2 %v5039_v24  ;;  %1814 = vmatmul.bf16.gmra.mxu3 %v5041_v61  ;;  %vm2083_vm13 = vcmp.gt.f32.partialorder %v1942_v6, 0.0  ;;  %v3875_v24 = vld [vmem:[#allocation2 + $0x310] sm:$0xf0]  ;;  %v4099_v61 = vld [vmem:[#allocation2 + $0x214] sm:$0xf0] }
 0x344   :  { %v2212_v35 = vsel %vm2083_vm13, %v1942_v6, %v2148_v26 }
 0x345   :  { %v1646_v34 = vpop.f32.mrf.mxu2  ;;  %v1775_v46 = vpop.f32.mrf.mxu3  ;;  %v2269_v62 = vpack.c.bf16 %v2212_v35, %v2211_v20  ;;  %v5065_v20 = vor.u32 %v4128_v36, %v3875_v24  ;;  %v5067_v35 = vor.u32 %v4099_v61, %v3753_v43  ;;  %v1483_v24 = vadd.f32 %v4672_v27, %v4561_v18 }
 0x346   :  { %v5054_v19 = vadd.f32 %v1646_v34, %v1478_v7  ;;  %v1776_v39 = vadd.f32 %v1775_v46, %v4846_v25  ;;  %v4105_v46 = vld [vmem:[#allocation2 + $0x24c] sm:$0xf]  ;;  %v1485_v18 = vadd.f32 %v4672_v27, %v4563_v57 }
 0x347   :  { %2397 = vmatmul.bf16.gmra.mxu1 %v2269_v62  ;;  %6073 = vst [vmem:[#allocation126_spill] sm:$0xff] %v5065_v20  ;;  %v3787_v62 = vld [vmem:[#allocation2 + $0x258] sm:$0xf0] }
 0x348   :  { %v1945_v13 = vadd.f32 %v4989_v33, %v1776_v39  ;;  %v5071_v34 = vpop.f32.mrf.mxu0  ;;  %v5073_v33 = vor.u32 %v4105_v46, %v3787_v62  ;;  %v4132_v46 = vld [vmem:[#allocation2 + $0x324] sm:$0xf]  ;;  %v3891_v62 = vld [vmem:[#allocation2 + $0x330] sm:$0xf0] }
 0x34a   :  { %v2149_v28 = vmul.f32 %v4874_v53, %v1945_v13  ;;  %vm2084_vm14 = vcmp.gt.f32.partialorder %v1945_v13, 0.0  ;;  %6074 = vst [vmem:[#allocation127_spill] sm:$0xff] %v5073_v33 }
 0x34b   :  { %1998 = vmatmul.bf16.gmra.mxu0 %v5073_v33  ;;  %v3769_v33 = vld [vmem:[#allocation2 + $0x228] sm:$0xf] }
 0x34d   :  { %v5063_v6 = vpop.f32.mrf.mxu2  ;;  %v1777_v26 = vpop.f32.mrf.mxu3 }
 0x34e   :  { %v1778_v7 = vadd.f32 %v1777_v26, %v1609_v11  ;;  %v1445_v11 = vadd.f32 %v4672_v27, %v4842_v0  ;;  %v4109_v27 = vld [vmem:[#allocation2 + $0x26c] sm:$0xf] }
 0x350   :  { %v1947_v25 = vadd.f32 %v5005_v5, %v1778_v7  ;;  %v2213_v5 = vsel %vm2084_vm14, %v1945_v13, %v2149_v28  ;;  %v5086_v7 = vpop.f32.mrf.mxu0  ;;  %v5090_v13 = vpop.f32.mrf.mxu1 }
 0x352   :  { %v2150_v49 = vmul.f32 %v4874_v53, %v1947_v25  ;;  %1690 = vmatmul.bf16.gmra.mxu2 %v5065_v20  ;;  %1819 = vmatmul.bf16.gmra.mxu3 %v5067_v35  ;;  %vm2085_vm15 = vcmp.gt.f32.partialorder %v1947_v25, 0.0  ;;  %v4103_v20 = vld [vmem:[#allocation2 + $0x234] sm:$0xf0] }
 0x354   :  { %v2214_v61 = vsel %vm2085_vm15, %v1947_v25, %v2150_v49  ;;  %v1614_v25 = vadd.f32 %v4876_v52, %v1445_v11 }
 0x355   :  { %v1651_v22 = vpop.f32.mrf.mxu2  ;;  %v1780_v39 = vpop.f32.mrf.mxu3  ;;  %v2270_v36 = vpack.c.bf16 %v2214_v61, %v2213_v5  ;;  %v5096_v5 = vor.u32 %v4132_v46, %v3891_v62  ;;  %v5098_v61 = vor.u32 %v4103_v20, %v3769_v33 }
 0x356   :  { %v5081_v43 = vadd.f32 %v1651_v22, %v1483_v24  ;;  %v1781_v26 = vadd.f32 %v1780_v39, %v4868_v2 }
 0x357   :  { %2402 = vmatmul.bf16.gmra.mxu1 %v2270_v36  ;;  %6075 = vst [vmem:[#allocation128_spill] sm:$0xff] %v5096_v5  ;;  %v3803_v36 = vld [vmem:[#allocation2 + $0x278] sm:$0xf0] }
 0x358   :  { %v1950_v28 = vadd.f32 %v5017_v9, %v1781_v26  ;;  %v5102_v57 = vpop.f32.mrf.mxu0  ;;  %v5104_v9 = vor.u32 %v4109_v27, %v3803_v36  ;;  %v4136_v27 = vld [vmem:[#allocation2 + $0x344] sm:$0xf]  ;;  %v3907_v36 = vld [vmem:[#allocation2 + $0x350] sm:$0xf0] }
 0x35a   :  { %v2151_v22 = vmul.f32 %v4874_v53, %v1950_v28  ;;  %vm2086_vm0 = vcmp.gt.f32.partialorder %v1950_v28, 0.0  ;;  %6076 = vst [vmem:[#allocation129_spill] sm:$0xff] %v5104_v9 }
 0x35b   :  { %2003 = vmatmul.bf16.gmra.mxu0 %v5104_v9  ;;  %v4107_v9 = vld [vmem:[#allocation2 + $0x254] sm:$0xf0] }
 0x35c   :  { %v2215_v11 = vsel %vm2086_vm0, %v1950_v28, %v2151_v22 }
 0x35d   :  { %v1653_v49 = vpop.f32.mrf.mxu2  ;;  %v1782_v24 = vpop.f32.mrf.mxu3 }
 0x35e   :  { %v5094_v0 = vadd.f32 %v1653_v49, %v1485_v18  ;;  %v1783_v2 = vadd.f32 %v1782_v24, %v1614_v25 }
 0x360   :  { %v1952_v39 = vadd.f32 %v5033_v40, %v1783_v2  ;;  %v5113_v40 = vld [vmem:[%s5854_s4] ss:$0 sm:$0xff]  ;;  %v5124_v2 = vpop.f32.mrf.mxu0 }
 0x361   :  { %v1488_v20 = vadd.f32 %v5113_v40, %v4574_v17  ;;  %v1450_v49 = vadd.f32 %v5113_v40, %v4866_v32  ;;  %v3785_v17 = vld [vmem:[#allocation2 + $0x248] sm:$0xf]  ;;  %v1490_v28 = vadd.f32 %v5113_v40, %v4576_v4 }
 0x362   :  { %v2152_v52 = vmul.f32 %v4874_v53, %v1952_v39  ;;  %1695 = vmatmul.bf16.gmra.mxu2 %v5096_v5  ;;  %1824 = vmatmul.bf16.gmra.mxu3 %v5098_v61  ;;  %vm2087_vm1 = vcmp.gt.f32.partialorder %v1952_v39, 0.0 }
 0x364   :  { %v5117_v33 = vpop.f32.mrf.mxu1  ;;  %v2216_v26 = vsel %vm2087_vm1, %v1952_v39, %v2152_v52  ;;  %v1619_v52 = vadd.f32 %v4902_v59, %v1450_v49  ;;  %v3819_v59 = vld [vmem:[#allocation2 + $0x298] sm:$0xf0] }
 0x365   :  { %v1656_v46 = vpop.f32.mrf.mxu2  ;;  %v1785_v62 = vpop.f32.mrf.mxu3  ;;  %v2271_v18 = vpack.c.bf16 %v2216_v26, %v2215_v11 }
 0x366   :  { %v5119_v25 = vadd.f32 %v1656_v46, %v1488_v20  ;;  %v1786_v24 = vadd.f32 %v1785_v62, %v4896_v37  ;;  %v5136_v46 = vor.u32 %v4136_v27, %v3907_v36  ;;  %v5138_v62 = vor.u32 %v4107_v9, %v3785_v17 }
 0x367   :  { %2407 = vmatmul.bf16.gmra.mxu1 %v2271_v18  ;;  %v1493_v9 = vadd.f32 %v5113_v40, %v4587_v8  ;;  %v3801_v8 = vld [vmem:[#allocation2 + $0x268] sm:$0xf] }
 0x368   :  { %v1955_v22 = vadd.f32 %v5045_v45, %v1786_v24  ;;  %6077 = vst [vmem:[#allocation130_spill] sm:$0xff] %v5136_v46  ;;  %v5142_v18 = vpop.f32.mrf.mxu0  ;;  %v4113_v24 = vld [vmem:[#allocation2 + $0x28c] sm:$0xf] }
 0x369   :  { %v5144_v49 = vor.u32 %v4113_v24, %v3819_v59  ;;  %v4140_v59 = vld [vmem:[#allocation2 + $0x364] sm:$0xf] }
 0x36a   :  { %v2153_v4 = vmul.f32 %v4874_v53, %v1955_v22  ;;  %vm2088_vm2 = vcmp.gt.f32.partialorder %v1955_v22, 0.0 }
 0x36b   :  { %6078 = vst [vmem:[#allocation131_spill] sm:$0xff] %v5144_v49  ;;  %2008 = vmatmul.bf16.gmra.mxu0 %v5144_v49  ;;  %v3923_v49 = vld [vmem:[#allocation2 + $0x370] sm:$0xf0] }
 0x36c   :  { %v5129_v39 = vpop.f32.mrf.mxu1  ;;  %v2217_v27 = vsel %vm2088_vm2, %v1955_v22, %v2153_v4  ;;  %v1495_v22 = vadd.f32 %v5113_v40, %v4589_v21 }
 0x36d   :  { %v1658_v20 = vpop.f32.mrf.mxu2  ;;  %v1787_v37 = vpop.f32.mrf.mxu3 }
 0x36e   :  { %v5134_v11 = vadd.f32 %v1658_v20, %v1490_v28  ;;  %v1788_v26 = vadd.f32 %v1787_v37, %v1619_v52  ;;  %v1455_v37 = vadd.f32 %v5113_v40, %v4894_v44 }
 0x370   :  { %v1957_v45 = vadd.f32 %v5059_v55, %v1788_v26  ;;  %v5159_v24 = vpop.f32.mrf.mxu0 }
 0x372   :  { %v2154_v32 = vmul.f32 %v4874_v53, %v1957_v45  ;;  %1700 = vmatmul.bf16.gmra.mxu2 %v5136_v46  ;;  %1829 = vmatmul.bf16.gmra.mxu3 %v5138_v62  ;;  %vm2089_vm3 = vcmp.gt.f32.partialorder %v1957_v45, 0.0  ;;  %v4111_v46 = vld [vmem:[#allocation2 + $0x274] sm:$0xf0] }
 0x374   :  { %v5152_v55 = vpop.f32.mrf.mxu1  ;;  %v2218_v36 = vsel %vm2089_vm3, %v1957_v45, %v2154_v32  ;;  %v1624_v45 = vadd.f32 %v4928_v10, %v1455_v37  ;;  %v3835_v10 = vld [vmem:[#allocation2 + $0x2b8] sm:$0xf0] }
 0x375   :  { %v1661_v17 = vpop.f32.mrf.mxu2  ;;  %v1790_v28 = vpop.f32.mrf.mxu3  ;;  %v2272_v52 = vpack.c.bf16 %v2218_v36, %v2217_v27 }
 0x376   :  { %v5154_v20 = vadd.f32 %v1661_v17, %v1493_v9  ;;  %v1791_v26 = vadd.f32 %v1790_v28, %v4920_v16  ;;  %v5171_v17 = vor.u32 %v4140_v59, %v3923_v49  ;;  %v5173_v28 = vor.u32 %v4111_v46, %v3801_v8 }
 0x377   :  { %2412 = vmatmul.bf16.gmra.mxu1 %v2272_v52  ;;  %v1498_v46 = vadd.f32 %v5113_v40, %v4600_v31  ;;  %v3817_v31 = vld [vmem:[#allocation2 + $0x288] sm:$0xf] }
 0x378   :  { %v1960_v32 = vadd.f32 %v5071_v34, %v1791_v26  ;;  %6079 = vst [vmem:[#allocation132_spill] sm:$0xff] %v5171_v17  ;;  %v5177_v52 = vpop.f32.mrf.mxu0  ;;  %v4117_v26 = vld [vmem:[#allocation2 + $0x2ac] sm:$0xf] }
 0x379   :  { %v5179_v37 = vor.u32 %v4117_v26, %v3835_v10  ;;  %v4144_v10 = vld [vmem:[#allocation2 + $0x384] sm:$0xf] }
 0x37a   :  { %v2155_v21 = vmul.f32 %v4874_v53, %v1960_v32  ;;  %vm2090_vm4 = vcmp.gt.f32.partialorder %v1960_v32, 0.0 }
 0x37b   :  { %6080 = vst [vmem:[#allocation133_spill] sm:$0xff] %v5179_v37  ;;  %2013 = vmatmul.bf16.gmra.mxu0 %v5179_v37  ;;  %v3939_v37 = vld [vmem:[#allocation2 + $0x390] sm:$0xf0] }
 0x37c   :  { %v5164_v4 = vpop.f32.mrf.mxu1  ;;  %v2219_v49 = vsel %vm2090_vm4, %v1960_v32, %v2155_v21  ;;  %v1500_v32 = vadd.f32 %v5113_v40, %v4602_v50 }
 0x37d   :  { %v1663_v9 = vpop.f32.mrf.mxu2  ;;  %v1792_v16 = vpop.f32.mrf.mxu3 }
 0x37e   :  { %v5169_v27 = vadd.f32 %v1663_v9, %v1495_v22  ;;  %v1793_v36 = vadd.f32 %v1792_v16, %v1624_v45  ;;  %v1460_v16 = vadd.f32 %v5113_v40, %v4925_v38 }
 0x380   :  { %v1962_v34 = vadd.f32 %v5086_v7, %v1793_v36  ;;  %v5194_v26 = vpop.f32.mrf.mxu0 }
 0x382   :  { %v2156_v44 = vmul.f32 %v4874_v53, %v1962_v34  ;;  %1705 = vmatmul.bf16.gmra.mxu2 %v5171_v17  ;;  %1834 = vmatmul.bf16.gmra.mxu3 %v5173_v28  ;;  %vm2091_vm5 = vcmp.gt.f32.partialorder %v1962_v34, 0.0  ;;  %v4115_v17 = vld [vmem:[#allocation2 + $0x294] sm:$0xf0] }
 0x384   :  { %v5187_v7 = vpop.f32.mrf.mxu1  ;;  %v2220_v59 = vsel %vm2091_vm5, %v1962_v34, %v2156_v44  ;;  %v1629_v34 = vadd.f32 %v4952_v23, %v1460_v16  ;;  %v3851_v23 = vld [vmem:[#allocation2 + $0x2d8] sm:$0xf0] }
 0x385   :  { %v1666_v8 = vpop.f32.mrf.mxu2  ;;  %v1795_v22 = vpop.f32.mrf.mxu3  ;;  %v2273_v45 = vpack.c.bf16 %v2220_v59, %v2219_v49 }
 0x386   :  { %v5189_v9 = vadd.f32 %v1666_v8, %v1498_v46  ;;  %v1796_v36 = vadd.f32 %v1795_v22, %v4946_v12  ;;  %v5206_v8 = vor.u32 %v4144_v10, %v3939_v37  ;;  %v5208_v22 = vor.u32 %v4115_v17, %v3817_v31 }
 0x387   :  { %2417 = vmatmul.bf16.gmra.mxu1 %v2273_v45 }
 0x388   :  { %v1965_v44 = vadd.f32 %v5102_v57, %v1796_v36  ;;  %6081 = vst [vmem:[#allocation134_spill] sm:$0xff] %v5206_v8  ;;  %v5212_v45 = vpop.f32.mrf.mxu0  ;;  %v4121_v36 = vld [vmem:[#allocation2 + $0x2cc] sm:$0xf] }
 0x389   :  { %v5214_v16 = vor.u32 %v4121_v36, %v3851_v23  ;;  %v3833_v36 = vld [vmem:[#allocation2 + $0x2a8] sm:$0xf]  ;;  %v4119_v23 = vld [vmem:[#allocation2 + $0x2b4] sm:$0xf0] }
 0x38a   :  { %v2157_v50 = vmul.f32 %v4874_v53, %v1965_v44  ;;  %vm2092_vm6 = vcmp.gt.f32.partialorder %v1965_v44, 0.0 }
 0x38b   :  { %6082 = vst [vmem:[#allocation135_spill] sm:$0xff] %v5214_v16  ;;  %2018 = vmatmul.bf16.gmra.mxu0 %v5214_v16 }
 0x38c   :  { %v5199_v21 = vpop.f32.mrf.mxu1  ;;  %v2221_v37 = vsel %vm2092_vm6, %v1965_v44, %v2157_v50 }
 0x38d   :  { %v1668_v46 = vpop.f32.mrf.mxu2  ;;  %v1797_v12 = vpop.f32.mrf.mxu3 }
 0x38e   :  { %v5204_v49 = vadd.f32 %v1668_v46, %v1500_v32  ;;  %v1798_v59 = vadd.f32 %v1797_v12, %v1629_v34  ;;  %v1465_v32 = vadd.f32 %v5113_v40, %v4959_v1  ;;  %v4148_v12 = vld [vmem:[#allocation2 + $0x3a4] sm:$0xf] }
 0x390   :  { %v1967_v57 = vadd.f32 %v5124_v2, %v1798_v59  ;;  %v5225_v46 = vpop.f32.mrf.mxu0  ;;  %v3955_v59 = vld [vmem:[#allocation2 + $0x3b0] sm:$0xf0]  ;;  %v1634_v44 = vadd.f32 %v4981_v60, %v1465_v32 }
 0x391   :  { %v5233_v1 = vor.u32 %v4148_v12, %v3955_v59 }
 0x392   :  { %v2158_v38 = vmul.f32 %v4874_v53, %v1967_v57  ;;  %1710 = vmatmul.bf16.gmra.mxu2 %v5206_v8  ;;  %1839 = vmatmul.bf16.gmra.mxu3 %v5208_v22  ;;  %vm2093_vm7 = vcmp.gt.f32.partialorder %v1967_v57, 0.0 }
 0x393   :  { %6083 = vst [vmem:[#allocation136_spill] sm:$0xff] %v5233_v1 }
 0x394   :  { %v5220_v17 = vpop.f32.mrf.mxu1  ;;  %v2222_v2 = vsel %vm2093_vm7, %v1967_v57, %v2158_v38  ;;  %v4123_v38 = vld [vmem:[#allocation2 + $0x2d4] sm:$0xf0] }
 0x395   :  { %v1800_v10 = vpop.f32.mrf.mxu3  ;;  %v2274_v31 = vpack.c.bf16 %v2222_v2, %v2221_v37 }
 0x396   :  { %v1801_v34 = vadd.f32 %v1800_v10, %v4972_v15  ;;  %v5235_v15 = vor.u32 %v4119_v23, %v3833_v36  ;;  %v1470_v23 = vadd.f32 %v5113_v40, %v4997_v56  ;;  %v4129_v56 = vld [vmem:[#allocation2 + $0x30c] sm:$0xf] }
 0x397   :  { %2422 = vmatmul.bf16.gmra.mxu1 %v2274_v31  ;;  %v3867_v31 = vld [vmem:[#allocation2 + $0x2f8] sm:$0xf0] }
 0x398   :  { %v1970_v16 = vadd.f32 %v5142_v18, %v1801_v34  ;;  %v5239_v10 = vpop.f32.mrf.mxu0  ;;  %v4125_v18 = vld [vmem:[#allocation2 + $0x2ec] sm:$0xf] }
 0x399   :  { %v5241_v34 = vor.u32 %v4125_v18, %v3867_v31  ;;  %v3971_v18 = vld [vmem:[#allocation2 + $0x3d0] sm:$0xf0]  ;;  %v3849_v31 = vld [vmem:[#allocation2 + $0x2c8] sm:$0xf] }
 0x39a   :  { %v2159_v37 = vmul.f32 %v4874_v53, %v1970_v16  ;;  %vm2094_vm8 = vcmp.gt.f32.partialorder %v1970_v16, 0.0 }
 0x39b   :  { %6084 = vst [vmem:[#allocation137_spill] sm:$0xff] %v5241_v34  ;;  %2023 = vmatmul.bf16.gmra.mxu0 %v5241_v34 }
 0x39c   :  { %v5228_v8 = vpop.f32.mrf.mxu1  ;;  %v2223_v12 = vsel %vm2094_vm8, %v1970_v16, %v2159_v37  ;;  %v1639_v16 = vadd.f32 %v5009_v30, %v1470_v23 }
 0x39d   :  { %v1802_v50 = vpop.f32.mrf.mxu3 }
 0x39e   :  { %v1803_v57 = vadd.f32 %v1802_v50, %v1634_v44 }
 0x3a0   :  { %v1972_v2 = vadd.f32 %v5159_v24, %v1803_v57  ;;  %v5252_v50 = vpop.f32.mrf.mxu0  ;;  %v4152_v57 = vld [vmem:[#allocation2 + $0x3c4] sm:$0xf] }
 0x3a2   :  { %v2160_v60 = vmul.f32 %v4874_v53, %v1972_v2  ;;  %1715 = vmatmul.bf16.gmra.mxu2 %v5233_v1  ;;  %1844 = vmatmul.bf16.gmra.mxu3 %v5235_v15  ;;  %vm2095_vm9 = vcmp.gt.f32.partialorder %v1972_v2, 0.0 }
 0x3a4   :  { %v5247_v32 = vpop.f32.mrf.mxu1  ;;  %v2224_v24 = vsel %vm2095_vm9, %v1972_v2, %v2160_v60  ;;  %v5258_v60 = vor.u32 %v4152_v57, %v3971_v18  ;;  %v1475_v18 = vadd.f32 %v5113_v40, %v5028_v63  ;;  %v4133_v63 = vld [vmem:[#allocation2 + $0x32c] sm:$0xf] }
 0x3a5   :  { %v1805_v59 = vpop.f32.mrf.mxu3  ;;  %v2275_v36 = vpack.c.bf16 %v2224_v24, %v2223_v12  ;;  %v5260_v12 = vor.u32 %v4123_v38, %v3849_v31 }
 0x3a6   :  { %v1806_v44 = vadd.f32 %v1805_v59, %v5000_v48  ;;  %6085 = vst [vmem:[#allocation138_spill] sm:$0xff] %v5258_v60 }
 0x3a7   :  { %2427 = vmatmul.bf16.gmra.mxu1 %v2275_v36  ;;  %v3883_v36 = vld [vmem:[#allocation2 + $0x318] sm:$0xf0] }
 0x3a8   :  { %v1975_v34 = vadd.f32 %v5177_v52, %v1806_v44  ;;  %v5264_v59 = vpop.f32.mrf.mxu0  ;;  %v5266_v52 = vor.u32 %v4129_v56, %v3883_v36  ;;  %v3865_v56 = vld [vmem:[#allocation2 + $0x2e8] sm:$0xf]  ;;  %v4127_v36 = vld [vmem:[#allocation2 + $0x2f4] sm:$0xf0] }
 0x3aa   :  { %v2161_v48 = vmul.f32 %v4874_v53, %v1975_v34  ;;  %vm2096_vm10 = vcmp.gt.f32.partialorder %v1975_v34, 0.0  ;;  %6086 = vst [vmem:[#allocation139_spill] sm:$0xff] %v5266_v52 }
 0x3ab   :  { %2028 = vmatmul.bf16.gmra.mxu0 %v5266_v52 }
 0x3ac   :  { %v5255_v1 = vpop.f32.mrf.mxu1  ;;  %v2225_v38 = vsel %vm2096_vm10, %v1975_v34, %v2161_v48  ;;  %v1644_v34 = vadd.f32 %v5037_v42, %v1475_v18 }
 0x3ad   :  { %v1807_v37 = vpop.f32.mrf.mxu3 }
 0x3ae   :  { %v1808_v2 = vadd.f32 %v1807_v37, %v1639_v16  ;;  %v4156_v37 = vld [vmem:[#allocation2 + $0x3e4] sm:$0xf] }
 0x3b0   :  { %v1977_v24 = vadd.f32 %v5194_v26, %v1808_v2  ;;  %v5277_v16 = vpop.f32.mrf.mxu0  ;;  %v3987_v2 = vld [vmem:[#allocation2 + $0x3f0] sm:$0xf0] }
 0x3b2   :  { %v2162_v44 = vmul.f32 %v4874_v53, %v1977_v24  ;;  %1720 = vmatmul.bf16.gmra.mxu2 %v5258_v60  ;;  %1849 = vmatmul.bf16.gmra.mxu3 %v5260_v12  ;;  %vm2097_vm11 = vcmp.gt.f32.partialorder %v1977_v24, 0.0 }
 0x3b4   :  { %v5272_v30 = vpop.f32.mrf.mxu1  ;;  %v2226_v23 = vsel %vm2097_vm11, %v1977_v24, %v2162_v44  ;;  %v5283_v44 = vor.u32 %v4156_v37, %v3987_v2 }
 0x3b5   :  { %v1810_v26 = vpop.f32.mrf.mxu3  ;;  %v2276_v57 = vpack.c.bf16 %v2226_v23, %v2225_v38  ;;  %v5285_v38 = vor.u32 %v4127_v36, %v3865_v56  ;;  %v1480_v56 = vadd.f32 %v5113_v40, %v5090_v13  ;;  %v5299_v36 = vpop.f32.mrf.mxu2 }
 0x3b6   :  { %v1811_v31 = vadd.f32 %v1810_v26, %v5026_v47  ;;  %6087 = vst [vmem:[#allocation140_spill] sm:$0xff] %v5283_v44 }
 0x3b7   :  { %2432 = vmatmul.bf16.gmra.mxu1 %v2276_v57  ;;  %v3899_v57 = vld [vmem:[#allocation2 + $0x338] sm:$0xf0] }
 0x3b8   :  { %v1980_v52 = vadd.f32 %v5212_v45, %v1811_v31  ;;  %v5289_v26 = vpop.f32.mrf.mxu0  ;;  %v5291_v45 = vor.u32 %v4133_v63, %v3899_v57  ;;  %v4131_v63 = vld [vmem:[#allocation2 + $0x314] sm:$0xf0] }
 0x3ba   :  { %v2163_v47 = vmul.f32 %v4874_v53, %v1980_v52  ;;  %vm2098_vm12 = vcmp.gt.f32.partialorder %v1980_v52, 0.0  ;;  %6088 = vst [vmem:[#allocation141_spill] sm:$0xff] %v5291_v45 }
 0x3bb   :  { %2033 = vmatmul.bf16.gmra.mxu0 %v5291_v45 }
 0x3bc   :  { %v5280_v60 = vpop.f32.mrf.mxu1  ;;  %v2227_v18 = vsel %vm2098_vm12, %v1980_v52, %v2163_v47  ;;  %v1649_v52 = vadd.f32 %v5063_v6, %v1480_v56 }
 0x3bd   :  { %v1812_v48 = vpop.f32.mrf.mxu3 }
 0x3be   :  { %v1813_v24 = vadd.f32 %v1812_v48, %v1644_v34 }
 0x3c0   :  { %v1982_v23 = vadd.f32 %v5225_v46, %v1813_v24  ;;  %v5302_v48 = vpop.f32.mrf.mxu0  ;;  %v3881_v24 = vld [vmem:[#allocation2 + $0x308] sm:$0xf] }
 0x3c2   :  { %v2164_v31 = vmul.f32 %v4874_v53, %v1982_v23  ;;  %1725 = vmatmul.bf16.gmra.mxu2 %v5283_v44  ;;  %1854 = vmatmul.bf16.gmra.mxu3 %v5285_v38  ;;  %vm2099_vm13 = vcmp.gt.f32.partialorder %v1982_v23, 0.0  ;;  %v5314_v44 = vpop.f32.mrf.mxu2 }
 0x3c4   :  { %v2398_v42 = vpop.f32.mrf.mxu1  ;;  %v2228_v37 = vsel %vm2099_vm13, %v1982_v23, %v2164_v31  ;;  %v5306_v31 = vor.u32 %v4131_v63, %v3881_v24 }
 0x3c5   :  { %v1815_v2 = vpop.f32.mrf.mxu3  ;;  %v2277_v46 = vpack.c.bf16 %v2228_v37, %v2227_v18  ;;  %v4137_v18 = vld [vmem:[#allocation2 + $0x34c] sm:$0xf] }
 0x3c6   :  { %v1816_v34 = vadd.f32 %v1815_v2, %v5054_v19  ;;  %6089 = vst [vmem:[#allocation142_spill] sm:$0xff] %v5306_v31  ;;  %v3915_v19 = vld [vmem:[#allocation2 + $0x358] sm:$0xf0] }
 0x3c7   :  { %2437 = vmatmul.bf16.gmra.mxu1 %v2277_v46  ;;  %v5312_v2 = vor.u32 %v4137_v18, %v3915_v19 }
 0x3c8   :  { %v1985_v57 = vadd.f32 %v5239_v10, %v1816_v34  ;;  %v5310_v46 = vpop.f32.mrf.mxu0 }
 0x3c9   :  { %6090 = vst [vmem:[#allocation143_spill] sm:$0xff] %v5312_v2 }
 0x3ca   :  { %v2165_v13 = vmul.f32 %v4874_v53, %v1985_v57  ;;  %vm2100_vm14 = vcmp.gt.f32.partialorder %v1985_v57, 0.0  ;;  %v5322_v18 = vpop.f32.mrf.mxu2 }
 0x3cb   :  { %2038 = vmatmul.bf16.gmra.mxu0 %v5312_v2 }
 0x3cc   :  { %v2400_v45 = vpop.f32.mrf.mxu1  ;;  %v2229_v56 = vsel %vm2100_vm14, %v1985_v57, %v2165_v13  ;;  %v4141_v13 = vld [vmem:[#allocation2 + $0x36c] sm:$0xf] }
 0x3cd   :  { %v1817_v47 = vpop.f32.mrf.mxu3 }
 0x3ce   :  { %v1818_v23 = vadd.f32 %v1817_v47, %v1649_v52  ;;  %v3897_v47 = vld [vmem:[#allocation2 + $0x328] sm:$0xf] }
 0x3d0   :  { %v1987_v37 = vadd.f32 %v5252_v50, %v1818_v23  ;;  %v5320_v52 = vpop.f32.mrf.mxu0  ;;  %v4135_v23 = vld [vmem:[#allocation2 + $0x334] sm:$0xf0] }
 0x3d1   :  { %v5326_v57 = vor.u32 %v4135_v23, %v3897_v47  ;;  %v4139_v47 = vld [vmem:[#allocation2 + $0x354] sm:$0xf0] }
 0x3d2   :  { %v2166_v10 = vmul.f32 %v4874_v53, %v1987_v37  ;;  %1859 = vmatmul.bf16.gmra.mxu3 %v5306_v31  ;;  %vm2101_vm15 = vcmp.gt.f32.partialorder %v1987_v37, 0.0 }
 0x3d4   :  { %v2403_v6 = vpop.f32.mrf.mxu1  ;;  %v2230_v34 = vsel %vm2101_vm15, %v1987_v37, %v2166_v10 }
 0x3d5   :  { %v1820_v24 = vpop.f32.mrf.mxu3  ;;  %v2278_v50 = vpack.c.bf16 %v2230_v34, %v2229_v56  ;;  %v3931_v56 = vld [vmem:[#allocation2 + $0x378] sm:$0xf0]  ;;  %v2534_v34 = vpack.c.bf16 %v2400_v45, %v2398_v42  ;;  %v5341_v42 = vpop.f32.mrf.mxu2 }
 0x3d6   :  { %v1821_v63 = vadd.f32 %v1820_v24, %v5081_v43  ;;  %v5332_v24 = vor.u32 %v4141_v13, %v3931_v56 }
 0x3d7   :  { %2442 = vmatmul.bf16.gmra.mxu1 %v2278_v50  ;;  %v2532_v50 = vpack.c.bf16 %v5255_v1, %v5247_v32  ;;  %v4145_v1 = vld [vmem:[#allocation2 + $0x38c] sm:$0xf] }
 0x3d8   :  { %v1990_v19 = vadd.f32 %v5264_v59, %v1821_v63  ;;  %v5330_v10 = vpop.f32.mrf.mxu0  ;;  %v3913_v63 = vld [vmem:[#allocation2 + $0x348] sm:$0xf] }
 0x3da   :  { %v2167_v37 = vmul.f32 %v4874_v53, %v1990_v19  ;;  %vm2102_vm0 = vcmp.gt.f32.partialorder %v1990_v19, 0.0 }
 0x3db   :  { %2043 = vmatmul.bf16.gmra.mxu0 %v5332_v24 }
 0x3dc   :  { %v2405_v5 = vpop.f32.mrf.mxu1 }
 0x3dd   :  { %v2535_v31 = vpack.c.bf16 %v2405_v5, %v2403_v6  ;;  %v1822_v41 = vpop.f32.mrf.mxu3  ;;  %v5359_v32 = vpop.f32.mrf.mxu2 }
 0x3de   :  { %v1823_v2 = vadd.f32 %v1822_v41, %v5094_v0  ;;  %v2231_v0 = vsel %vm2102_vm0, %v1990_v19, %v2167_v37  ;;  %v5354_v37 = vor.u32 %v4139_v47, %v3913_v63  ;;  %v4143_v63 = vld [vmem:[#allocation2 + $0x374] sm:$0xf0] }
 0x3df   :  { %2565 = vmatpush.bf16.msra.mxu2 %v2535_v31 }
 0x3e0   :  { %v1992_v43 = vadd.f32 %v5277_v16, %v1823_v2  ;;  %v2533_v16 = vpack.c.bf16 %v5280_v60, %v5272_v30  ;;  %v5344_v6 = vpop.f32.mrf.mxu0  ;;  %v3993_v60 = vld [vmem:[#allocation2 + $0x3e8] sm:$0xf] }
 0x3e2   :  { %v2168_v5 = vmul.f32 %v4874_v53, %v1992_v43  ;;  %1864 = vmatmul.bf16.gmra.mxu3 %v5326_v57  ;;  %vm2103_vm1 = vcmp.gt.f32.partialorder %v1992_v43, 0.0 }
 0x3e3   :  { %2566 = vmatpush.bf16.msra.mxu2 %v2534_v34  ;;  %v3947_v34 = vld [vmem:[#allocation2 + $0x398] sm:$0xf0] }
 0x3e4   :  { %v5337_v41 = vpop.f32.mrf.mxu1  ;;  %v2232_v59 = vsel %vm2103_vm1, %v1992_v43, %v2168_v5  ;;  %v5365_v5 = vor.u32 %v4145_v1, %v3947_v34 }
 0x3e5   :  { %v1825_v31 = vpop.f32.mrf.mxu3  ;;  %v2279_v45 = vpack.c.bf16 %v2232_v59, %v2231_v0 }
 0x3e6   :  { %v1826_v2 = vadd.f32 %v1825_v31, %v5119_v25  ;;  %v6091_v25 = vpack.c.bf16 %v5228_v8, %v5220_v17  ;;  %6092 = vst [vmem:[#allocation144_spill] sm:$0xff] %v5365_v5  ;;  %v6093_v8 = vpack.c.bf16 %v5199_v21, %v5187_v7  ;;  %v6094_v31 = vpack.c.bf16 %v5164_v4, %v5152_v55  ;;  %v3929_v21 = vld [vmem:[#allocation2 + $0x368] sm:$0xf]  ;;  %v4159_v55 = vld [vmem:[#allocation2 + $0x3f4] sm:$0xf0] }
 0x3e7   :  { %2447 = vmatmul.bf16.gmra.mxu1 %v2279_v45  ;;  %2567 = vmatpush.bf16.msra.mxu2 %v2533_v16  ;;  %v6095_v7 = vpack.c.bf16 %v5129_v39, %v5117_v33 }
 0x3e8   :  { %v1995_v23 = vadd.f32 %v5289_v26, %v1826_v2  ;;  %v5363_v56 = vpop.f32.mrf.mxu0 }
 0x3ea   :  { %v2169_v43 = vmul.f32 %v4874_v53, %v1995_v23  ;;  %vm2104_vm2 = vcmp.gt.f32.partialorder %v1995_v23, 0.0 }
 0x3eb   :  { %2568 = vmatpush.bf16.msra.mxu2 %v2532_v50  ;;  %2048 = vmatmul.bf16.gmra.mxu0 %v5365_v5  ;;  %v5381_v50 = vpop.f32.mrf.mxu2 }
 0x3ec   :  { %v5349_v19 = vpop.f32.mrf.mxu1 }
 0x3ed   :  { %v1827_v30 = vpop.f32.mrf.mxu3 }
 0x3ee   :  { %v1828_v13 = vadd.f32 %v1827_v30, %v5134_v11  ;;  %v5392_v30 = vor.u32 %v4143_v63, %v3929_v21 }
 0x3ef   :  { %2569 = vmatpush.bf16.msra.mxu2 %v6091_v25 }
 0x3f0   :  { %v1997_v26 = vadd.f32 %v5302_v48, %v1828_v13  ;;  %v2233_v48 = vsel %vm2104_vm2, %v1995_v23, %v2169_v43  ;;  %v5379_v2 = vpop.f32.mrf.mxu0  ;;  %v4149_v13 = vld [vmem:[#allocation2 + $0x3ac] sm:$0xf] }
 0x3f2   :  { %v2170_v11 = vmul.f32 %v4874_v53, %v1997_v26  ;;  %1869 = vmatmul.bf16.gmra.mxu3 %v5354_v37  ;;  %vm2105_vm3 = vcmp.gt.f32.partialorder %v1997_v26, 0.0 }
 0x3f3   :  { %2570 = vmatpush.bf16.msra.mxu2 %v6093_v8 }
 0x3f4   :  { %v5373_v17 = vpop.f32.mrf.mxu1  ;;  %v2234_v0 = vsel %vm2105_vm3, %v1997_v26, %v2170_v11 }
 0x3f5   :  { %v1830_v59 = vpop.f32.mrf.mxu3  ;;  %v2280_v16 = vpack.c.bf16 %v2234_v0, %v2233_v48  ;;  %v3945_v0 = vld [vmem:[#allocation2 + $0x388] sm:$0xf] }
 0x3f6   :  { %v1831_v45 = vadd.f32 %v1830_v59, %v5154_v20  ;;  %v4147_v59 = vld [vmem:[#allocation2 + $0x394] sm:$0xf0] }
 0x3f7   :  { %2452 = vmatmul.bf16.gmra.mxu1 %v2280_v16  ;;  %2571 = vmatpush.bf16.msra.mxu2 %v6094_v31 }
 0x3f8   :  { %v2000_v47 = vadd.f32 %v5310_v46, %v1831_v45  ;;  %v5397_v25 = vpop.f32.mrf.mxu0  ;;  %v3963_v46 = vld [vmem:[#allocation2 + $0x3b8] sm:$0xf0] }
 0x3f9   :  { %v5399_v1 = vor.u32 %v4149_v13, %v3963_v46 }
 0x3fa   :  { %v2171_v33 = vmul.f32 %v4874_v53, %v2000_v47  ;;  %vm2106_vm4 = vcmp.gt.f32.partialorder %v2000_v47, 0.0 }
 0x3fb   :  { %2572 = vmatpush.bf16.msra.mxu2 %v6095_v7  ;;  %6096 = vst [vmem:[#allocation145_spill] sm:$0xff] %v5399_v1  ;;  %2053 = vmatmul.bf16.gmra.mxu0 %v5399_v1 }
 0x3fc   :  { %v5387_v23 = vpop.f32.mrf.mxu1  ;;  %v2235_v26 = vsel %vm2106_vm4, %v2000_v47, %v2171_v33  ;;  %v5419_v47 = vor.u32 %v4147_v59, %v3945_v0  ;;  %v3961_v0 = vld [vmem:[#allocation2 + $0x3a8] sm:$0xf]  ;;  %v4151_v59 = vld [vmem:[#allocation2 + $0x3b4] sm:$0xf0] }
 0x3fd   :  { %v1832_v4 = vpop.f32.mrf.mxu3 }
 0x3fe   :  { %v1833_v20 = vadd.f32 %v1832_v4, %v5169_v27  ;;  %2573 = vmatmul.bf16.vlgmr.msra.gmra.mxu2 %v4532_v29  ;;  %v5404_v27 = vpop.f32.mrf.mxu2 }
 0x400   :  { %v2002_v39 = vadd.f32 %v5320_v52, %v1833_v20  ;;  %v5409_v48 = vpop.f32.mrf.mxu0 }
 0x402   :  { %v2172_v43 = vmul.f32 %v4874_v53, %v2002_v39  ;;  %1874 = vmatmul.bf16.gmra.mxu3 %v5392_v30  ;;  %vm2107_vm5 = vcmp.gt.f32.partialorder %v2002_v39, 0.0 }
 0x404   :  { %v5406_v29 = vpop.f32.mrf.mxu1  ;;  %v2236_v34 = vsel %vm2107_vm5, %v2002_v39, %v2172_v43 }
 0x405   :  { %v1835_v52 = vpop.f32.mrf.mxu3  ;;  %v2281_v11 = vpack.c.bf16 %v2236_v34, %v2235_v26 }
 0x406   :  { %v1836_v8 = vadd.f32 %v1835_v52, %v5189_v9  ;;  %v5416_v21 = vpop.f32.mrf.mxu2  ;;  %v4153_v9 = vld [vmem:[#allocation2 + $0x3cc] sm:$0xf] }
 0x407   :  { %2457 = vmatmul.bf16.gmra.mxu1 %v2281_v11 }
 0x408   :  { %v2005_v16 = vadd.f32 %v5330_v10, %v1836_v8  ;;  %v3979_v10 = vld [vmem:[#allocation2 + $0x3d8] sm:$0xf0]  ;;  %v5424_v13 = vpop.f32.mrf.mxu0  ;;  %v1505_v8 = vadd.f32 %v5113_v40, %v4615_v14  ;;  %v4157_v14 = vld [vmem:[#allocation2 + $0x3ec] sm:$0xf] }
 0x409   :  { %v5426_v33 = vor.u32 %v4153_v9, %v3979_v10 }
 0x40a   :  { %v2173_v4 = vmul.f32 %v4874_v53, %v2005_v16  ;;  %vm2108_vm6 = vcmp.gt.f32.partialorder %v2005_v16, 0.0 }
 0x40b   :  { %6097 = vst [vmem:[#allocation146_spill] sm:$0xff] %v5426_v33  ;;  %2058 = vmatmul.bf16.gmra.mxu0 %v5426_v33 }
 0x40c   :  { %v5412_v31 = vpop.f32.mrf.mxu1  ;;  %v2237_v46 = vsel %vm2108_vm6, %v2005_v16, %v2173_v4 }
 0x40d   :  { %v1837_v7 = vpop.f32.mrf.mxu3 }
 0x40e   :  { %v1838_v63 = vadd.f32 %v1837_v7, %v5204_v49  ;;  %2578 = vmatmul.bf16.gmra.mxu2 %v4550_v51  ;;  %v1503_v51 = vadd.f32 %v5113_v40, %v4613_v54  ;;  %v5436_v52 = vpop.f32.mrf.mxu2  ;;  %v1674_v54 = vadd.f32 %v5314_v44, %v1505_v8 }
 0x410   :  { %v2007_v20 = vadd.f32 %v5344_v6, %v1838_v63  ;;  %v1672_v34 = vadd.f32 %v5299_v36, %v1503_v51  ;;  %v5440_v7 = vpop.f32.mrf.mxu0  ;;  %v3995_v51 = vld [vmem:[#allocation2 + $0x3f8] sm:$0xf0] }
 0x411   :  { %v5453_v44 = vor.u32 %v4157_v14, %v3995_v51  ;;  %v4155_v14 = vld [vmem:[#allocation2 + $0x3d4] sm:$0xf0] }
 0x412   :  { %v2174_v39 = vmul.f32 %v4874_v53, %v2007_v20  ;;  %1879 = vmatmul.bf16.gmra.mxu3 %v5419_v47  ;;  %vm2109_vm7 = vcmp.gt.f32.partialorder %v2007_v20, 0.0 }
 0x413   :  { %6098 = vst [vmem:[#allocation147_spill] sm:$0xff] %v5453_v44 }
 0x414   :  { %v5433_v49 = vpop.f32.mrf.mxu1  ;;  %v2238_v6 = vsel %vm2109_vm7, %v2007_v20, %v2174_v39  ;;  %v5448_v20 = vor.u32 %v4151_v59, %v3961_v0 }
 0x415   :  { %v1840_v43 = vpop.f32.mrf.mxu3  ;;  %v2282_v26 = vpack.c.bf16 %v2238_v6, %v2237_v46  ;;  %v6099_v6 = vld [vmem:[#allocation42_spill] sm:$0xff] }
 0x416   :  { %v1841_v11 = vadd.f32 %v1840_v43, %v1672_v34 }
 0x417   :  { %2462 = vmatmul.bf16.gmra.mxu1 %v2282_v26 }
 0x418   :  { %v2010_v16 = vadd.f32 %v5363_v56, %v1841_v11  ;;  %v5455_v56 = vpop.f32.mrf.mxu2  ;;  %v5464_v8 = vpop.f32.mrf.mxu0 }
 0x41a   :  { %v2175_v10 = vmul.f32 %v4874_v53, %v2010_v16  ;;  %vm2110_vm8 = vcmp.gt.f32.partialorder %v2010_v16, 0.0 }
 0x41b   :  { %2063 = vmatmul.bf16.gmra.mxu0 %v5453_v44 }
 0x41c   :  { %v5444_v63 = vpop.f32.mrf.mxu1  ;;  %v2239_v26 = vsel %vm2110_vm8, %v2010_v16, %v2175_v10 }
 0x41d   :  { %v1842_v9 = vpop.f32.mrf.mxu3 }
 0x41e   :  { %v1843_v4 = vadd.f32 %v1842_v9, %v1674_v54  ;;  %2583 = vmatmul.bf16.gmra.mxu2 %v4565_v58  ;;  %v1508_v58 = vadd.f32 %v5113_v40, %v6099_v6  ;;  %v6100_v54 = vld [vmem:[#allocation43_spill] sm:$0xff] }
 0x41f   :  { %v1510_v9 = vadd.f32 %v5113_v40, %v6100_v54 }
 0x420   :  { %v2012_v39 = vadd.f32 %v5379_v2, %v1843_v4  ;;  %v1677_v0 = vadd.f32 %v5322_v18, %v1508_v58  ;;  %v3977_v4 = vld [vmem:[#allocation2 + $0x3c8] sm:$0xf]  ;;  %v5470_v6 = vpop.f32.mrf.mxu2  ;;  %v6101_v18 = vld [vmem:[#allocation30_spill] sm:$0xff]  ;;  %v2026_v58 = vpop.f32.mrf.mxu0 }
 0x421   :  { %v1679_v51 = vadd.f32 %v5341_v42, %v1510_v9 }
 0x422   :  { %v2176_v46 = vmul.f32 %v4874_v53, %v2012_v39  ;;  %1884 = vmatmul.bf16.gmra.mxu3 %v5448_v20  ;;  %vm2111_vm9 = vcmp.gt.f32.partialorder %v2012_v39, 0.0 }
 0x424   :  { %v5462_v43 = vpop.f32.mrf.mxu1  ;;  %v2240_v2 = vsel %vm2111_vm9, %v2012_v39, %v2176_v46 }
 0x425   :  { %v1845_v34 = vpop.f32.mrf.mxu3  ;;  %v2283_v11 = vpack.c.bf16 %v2240_v2, %v2239_v26  ;;  %v5475_v26 = vor.u32 %v4155_v14, %v3977_v4 }
 0x426   :  { %v1846_v59 = vadd.f32 %v1845_v34, %v1677_v0 }
 0x427   :  { %2467 = vmatmul.bf16.gmra.mxu1 %v2283_v11 }
 0x428   :  { %v2015_v16 = vadd.f32 %v5397_v25, %v1846_v59  ;;  %v6102_v25 = vld [vmem:[#allocation48_spill] sm:$0xff] }
 0x429   :  { %v1513_v11 = vadd.f32 %v5113_v40, %v6102_v25 }
 0x42a   :  { %v2177_v2 = vmul.f32 %v4874_v53, %v2015_v16  ;;  %vm2112_vm10 = vcmp.gt.f32.partialorder %v2015_v16, 0.0 }
 0x42b   :  { %v1682_v14 = vadd.f32 %v5359_v32, %v1513_v11  ;;  %v6104_v32 = vld [vmem:[#allocation33_spill] sm:$0xff] }
 0x42c   :  { %v5473_v10 = vpop.f32.mrf.mxu1  ;;  %v2241_v59 = vsel %vm2112_vm10, %v2015_v16, %v2177_v2 }
 0x42d   :  { %v1847_v39 = vpop.f32.mrf.mxu3 }
 0x42e   :  { %v1848_v46 = vadd.f32 %v1847_v39, %v1679_v51  ;;  %2588 = vmatmul.bf16.gmra.mxu2 %v6101_v18  ;;  %v5487_v51 = vpop.f32.mrf.mxu2  ;;  %v2029_v39 = vpop.f32.mrf.mxu0 }
 0x430   :  { %v2017_v34 = vadd.f32 %v5409_v48, %v1848_v46  ;;  %v6103_v46 = vld [vmem:[#allocation49_spill] sm:$0xff] }
 0x431   :  { %v1515_v18 = vadd.f32 %v5113_v40, %v6103_v46 }
 0x432   :  { %v2178_v42 = vmul.f32 %v4874_v53, %v2017_v34  ;;  %1889 = vmatmul.bf16.gmra.mxu3 %v5475_v26  ;;  %vm2113_vm11 = vcmp.gt.f32.partialorder %v2017_v34, 0.0 }
 0x433   :  { %v1684_v25 = vadd.f32 %v5381_v50, %v1515_v18 }
 0x434   :  { %v5484_v0 = vpop.f32.mrf.mxu1  ;;  %v2242_v54 = vsel %vm2113_vm11, %v2017_v34, %v2178_v42  ;;  %v5495_v42 = vor.u32 %v4159_v55, %v3993_v60 }
 0x435   :  { %v1850_v9 = vpop.f32.mrf.mxu3  ;;  %v2284_v4 = vpack.c.bf16 %v2242_v54, %v2241_v59 }
 0x436   :  { %v1851_v48 = vadd.f32 %v1850_v9, %v1682_v14  ;;  %v5498_v11 = vpop.f32.mrf.mxu2  ;;  %v2031_v50 = vpop.f32.mrf.mxu0 }
 0x437   :  { %2472 = vmatmul.bf16.gmra.mxu1 %v2284_v4 }
 0x438   :  { %v2020_v45 = vadd.f32 %v5424_v13, %v1851_v48  ;;  %v6105_v13 = vld [vmem:[#allocation54_spill] sm:$0xff] }
 0x439   :  { %v1518_v4 = vadd.f32 %v5113_v40, %v6105_v13 }
 0x43a   :  { %v2179_v59 = vmul.f32 %v4874_v53, %v2020_v45  ;;  %vm2114_vm12 = vcmp.gt.f32.partialorder %v2020_v45, 0.0 }
 0x43b   :  { %v1687_v18 = vadd.f32 %v5404_v27, %v1518_v4  ;;  %v6108_v4 = vld [vmem:[#allocation60_spill] sm:$0xff] }
 0x43c   :  { %v5493_v16 = vpop.f32.mrf.mxu1  ;;  %v2243_v55 = vsel %vm2114_vm12, %v2020_v45, %v2179_v59  ;;  %v6107_v59 = vld [vmem:[#allocation36_spill] sm:$0xff] }
 0x43d   :  { %v1852_v2 = vpop.f32.mrf.mxu3 }
 0x43e   :  { %v1853_v34 = vadd.f32 %v1852_v2, %v1684_v25  ;;  %2593 = vmatmul.bf16.gmra.mxu2 %v6104_v32  ;;  %v2034_v33 = vpop.f32.mrf.mxu0 }
 0x440   :  { %v2022_v54 = vadd.f32 %v5440_v7, %v1853_v34  ;;  %v6106_v7 = vld [vmem:[#allocation55_spill] sm:$0xff]  ;;  %v5509_v34 = vpop.f32.mrf.mxu2 }
 0x441   :  { %v1520_v2 = vadd.f32 %v5113_v40, %v6106_v7 }
 0x442   :  { %v2180_v9 = vmul.f32 %v4874_v53, %v2022_v54  ;;  %1894 = vmatmul.bf16.gmra.mxu3 %v5495_v42  ;;  %vm2115_vm13 = vcmp.gt.f32.partialorder %v2022_v54, 0.0 }
 0x443   :  { %v1689_v32 = vadd.f32 %v5416_v21, %v1520_v2 }
 0x444   :  { %v2438_v60 = vpop.f32.mrf.mxu1  ;;  %v2244_v14 = vsel %vm2115_vm13, %v2022_v54, %v2180_v9 }
 0x445   :  { %v1855_v48 = vpop.f32.mrf.mxu3  ;;  %v2285_v46 = vpack.c.bf16 %v2244_v14, %v2243_v55  ;;  %v1523_v55 = vadd.f32 %v5113_v40, %v6108_v4 }
 0x446   :  { %v1856_v25 = vadd.f32 %v1855_v48, %v1687_v18  ;;  %v2036_v7 = vpop.f32.mrf.mxu0 }
 0x447   :  { %2477 = vmatmul.bf16.gmra.mxu1 %v2285_v46 }
 0x448   :  { %v2025_v36 = vadd.f32 %v5464_v8, %v1856_v25  ;;  %v5518_v14 = vpop.f32.mrf.mxu2  ;;  %v1692_v25 = vadd.f32 %v5436_v52, %v1523_v55 }
 0x44a   :  { %v2181_v54 = vmul.f32 %v4874_v53, %v2025_v36  ;;  %vm2116_vm14 = vcmp.gt.f32.partialorder %v2025_v36, 0.0 }
 0x44c   :  { %v2440_v44 = vpop.f32.mrf.mxu1  ;;  %v2245_v8 = vsel %vm2116_vm14, %v2025_v36, %v2181_v54  ;;  %v6110_v54 = vld [vmem:[#allocation39_spill] sm:$0xff] }
 0x44d   :  { %v1857_v13 = vpop.f32.mrf.mxu3 }
 0x44e   :  { %v1858_v45 = vadd.f32 %v1857_v13, %v1689_v32  ;;  %2598 = vmatmul.bf16.gmra.mxu2 %v6107_v59  ;;  %v2039_v55 = vpop.f32.mrf.mxu0 }
 0x450   :  { %v2027_v27 = vadd.f32 %v2026_v58, %v1858_v45  ;;  %v6109_v58 = vld [vmem:[#allocation61_spill] sm:$0xff]  ;;  %v5524_v5 = vpop.f32.mrf.mxu2 }
 0x451   :  { %v1525_v32 = vadd.f32 %v5113_v40, %v6109_v58  ;;  %v6112_v58 = vld [vmem:[#allocation67_spill] sm:$0xff] }
 0x452   :  { %v2182_v9 = vmul.f32 %v4874_v53, %v2027_v27  ;;  %vm2117_vm15 = vcmp.gt.f32.partialorder %v2027_v27, 0.0 }
 0x453   :  { %v1694_v13 = vadd.f32 %v5455_v56, %v1525_v32  ;;  %v5532_v56 = vld [vmem:[%s5854_s4] ss:$0 sm:$0xff] }
 0x454   :  { %v2443_v21 = vpop.f32.mrf.mxu1  ;;  %v2246_v48 = vsel %vm2117_vm15, %v2027_v27, %v2182_v9  ;;  %v2542_v9 = vpack.c.bf16 %v2440_v44, %v2438_v60  ;;  %v2541_v44 = vpack.c.bf16 %v5493_v16, %v5484_v0  ;;  %v1530_v32 = vadd.f32 %v5532_v56, %v6112_v58  ;;  %v6120_v58 = vld [vmem:[#allocation27_spill] sm:$0xff] }
 0x455   :  { %v1860_v46 = vpop.f32.mrf.mxu3  ;;  %v2286_v18 = vpack.c.bf16 %v2246_v48, %v2245_v8 }
 0x456   :  { %v1861_v2 = vadd.f32 %v1860_v46, %v1692_v25 }
 0x457   :  { %2482 = vmatmul.bf16.gmra.mxu1 %v2286_v18 }
 0x458   :  { %v2030_v45 = vadd.f32 %v2029_v39, %v1861_v2  ;;  %v6111_v39 = vld [vmem:[#allocation66_spill] sm:$0xff]  ;;  %v5541_v18 = vpop.f32.mrf.mxu2  ;;  %v2540_v2 = vpack.c.bf16 %v5473_v10, %v5462_v43  ;;  %v6114_v43 = vpack.c.bf16 %v5444_v63, %v5433_v49 }
 0x45a   :  { %v2183_v52 = vmul.f32 %v4874_v53, %v2030_v45  ;;  %vm2118_vm0 = vcmp.gt.f32.partialorder %v2030_v45, 0.0 }
 0x45c   :  { %v2445_v59 = vpop.f32.mrf.mxu1  ;;  %v2247_v8 = vsel %vm2118_vm0, %v2030_v45, %v2183_v52  ;;  %v1699_v45 = vadd.f32 %v5487_v51, %v1530_v32  ;;  %v6115_v51 = vpack.c.bf16 %v5412_v31, %v5406_v29  ;;  %v6118_v29 = vld [vmem:[#allocation73_spill] sm:$0xff]  ;;  %v6121_v32 = vld [vmem:[#allocation50_spill] sm:$0xff] }
 0x45d   :  { %v2543_v4 = vpack.c.bf16 %v2445_v59, %v2443_v21  ;;  %v1862_v1 = vpop.f32.mrf.mxu3  ;;  %v1535_v31 = vadd.f32 %v5532_v56, %v6118_v29 }
 0x45e   :  { %v1863_v36 = vadd.f32 %v1862_v1, %v1694_v13  ;;  %2603 = vmatmul.bf16.gmra.mxu2 %v6110_v54  ;;  %v1528_v1 = vadd.f32 %v5532_v56, %v6111_v39  ;;  %v2041_v13 = vpop.f32.mrf.mxu0 }
 0x45f   :  { %2734 = vmatpush.bf16.msra.mxu3 %v2543_v4 }
 0x460   :  { %v2032_v27 = vadd.f32 %v2031_v50, %v1863_v36  ;;  %v1697_v46 = vadd.f32 %v5470_v6, %v1528_v1  ;;  %v6113_v36 = vld [vmem:[#allocation44_spill] sm:$0xff]  ;;  %v5557_v52 = vpop.f32.mrf.mxu2 }
 0x462   :  { %v2184_v40 = vmul.f32 %v4874_v53, %v2032_v27  ;;  %vm2119_vm1 = vcmp.gt.f32.partialorder %v2032_v27, 0.0 }
 0x463   :  { %2735 = vmatpush.bf16.msra.mxu3 %v2542_v9 }
 0x464   :  { %v5536_v21 = vpop.f32.mrf.mxu1  ;;  %v2248_v48 = vsel %vm2119_vm1, %v2032_v27, %v2184_v40  ;;  %v6116_v27 = vld [vmem:[#allocation72_spill] sm:$0xff] }
 0x465   :  { %v1865_v50 = vpop.f32.mrf.mxu3  ;;  %v2287_v60 = vpack.c.bf16 %v2248_v48, %v2247_v8  ;;  %v1533_v9 = vadd.f32 %v5532_v56, %v6116_v27  ;;  %v6117_v48 = vpack.c.bf16 %v5387_v23, %v5373_v17 }
 0x466   :  { %v1866_v25 = vadd.f32 %v1865_v50, %v1697_v46  ;;  %v6119_v50 = vpack.c.bf16 %v5349_v19, %v5337_v41 }
 0x467   :  { %2487 = vmatmul.bf16.gmra.mxu1 %v2287_v60  ;;  %2736 = vmatpush.bf16.msra.mxu3 %v2541_v44  ;;  %v1702_v8 = vadd.f32 %v5498_v11, %v1533_v9  ;;  %v1704_v60 = vadd.f32 %v5509_v34, %v1535_v31 }
 0x468   :  { %v2035_v0 = vadd.f32 %v2034_v33, %v1866_v25  ;;  %v5577_v46 = vpop.f32.mrf.mxu2 }
 0x46a   :  { %v2185_v10 = vmul.f32 %v4874_v53, %v2035_v0  ;;  %vm2120_vm2 = vcmp.gt.f32.partialorder %v2035_v0, 0.0 }
 0x46b   :  { %2737 = vmatpush.bf16.msra.mxu3 %v2540_v2 }
 0x46c   :  { %v5548_v16 = vpop.f32.mrf.mxu1  ;;  %v2249_v49 = vsel %vm2120_vm2, %v2035_v0, %v2185_v10 }
 0x46d   :  { %v2544_v6 = vpack.c.bf16 %v5548_v16, %v5536_v21  ;;  %v1867_v59 = vpop.f32.mrf.mxu3  ;;  %v6148_v16 = vld [vmem:[#allocation76_spill] sm:$0xff] }
 0x46e   :  { %v1868_v4 = vadd.f32 %v1867_v59, %v1699_v45  ;;  %2608 = vmatmul.bf16.gmra.mxu2 %v6113_v36 }
 0x46f   :  { %2738 = vmatpush.bf16.msra.mxu3 %v6114_v43 }
 0x470   :  { %v2037_v54 = vadd.f32 %v2036_v7, %v1868_v4  ;;  %v2044_v7 = vpop.f32.mrf.mxu0 }
 0x472   :  { %v2186_v33 = vmul.f32 %v4874_v53, %v2037_v54  ;;  %vm2121_vm3 = vcmp.gt.f32.partialorder %v2037_v54, 0.0 }
 0x473   :  { %2739 = vmatpush.bf16.msra.mxu3 %v6115_v51 }
 0x474   :  { %v5565_v40 = vpop.f32.mrf.mxu1  ;;  %v2250_v63 = vsel %vm2121_vm3, %v2037_v54, %v2186_v33  ;;  %v1718_v33 = vpop.f32.mrf.mxu2 }
 0x475   :  { %v1870_v39 = vpop.f32.mrf.mxu3  ;;  %v2288_v1 = vpack.c.bf16 %v2250_v63, %v2249_v49 }
 0x476   :  { %v1871_v44 = vadd.f32 %v1870_v39, %v1702_v8 }
 0x477   :  { %2492 = vmatmul.bf16.gmra.mxu1 %v2288_v1  ;;  %2740 = vmatpush.bf16.msra.mxu3 %v6117_v48 }
 0x478   :  { %v2040_v25 = vadd.f32 %v2039_v55, %v1871_v44  ;;  %v2046_v45 = vpop.f32.mrf.mxu0  ;;  %v6122_v55 = vld [vmem:[#allocation78_spill] sm:$0xff]  ;;  %v6124_v44 = vld [vmem:[#allocation29_spill] sm:$0xff] }
 0x479   :  { %v1538_v0 = vadd.f32 %v5532_v56, %v6122_v55  ;;  %v6127_v55 = vld [vmem:[#allocation85_spill] sm:$0xff] }
 0x47a   :  { %v2187_v41 = vmul.f32 %v4874_v53, %v2040_v25  ;;  %vm2122_vm4 = vcmp.gt.f32.partialorder %v2040_v25, 0.0 }
 0x47b   :  { %2741 = vmatpush.bf16.msra.mxu3 %v6119_v50  ;;  %v1707_v54 = vadd.f32 %v5518_v14, %v1538_v0  ;;  %v6125_v14 = vld [vmem:[#allocation56_spill] sm:$0xff] }
 0x47c   :  { %v5579_v2 = vpop.f32.mrf.mxu1  ;;  %v2251_v4 = vsel %vm2122_vm4, %v2040_v25, %v2187_v41  ;;  %v5601_v29 = vpop.f32.mrf.mxu2 }
 0x47d   :  { %v2545_v11 = vpack.c.bf16 %v5579_v2, %v5565_v40  ;;  %v1872_v17 = vpop.f32.mrf.mxu3  ;;  %v6147_v40 = vld [vmem:[#allocation69_spill] sm:$0xff] }
 0x47e   :  { %v1873_v23 = vadd.f32 %v1872_v17, %v1704_v60  ;;  %2742 = vmatmul.bf16.vlgmr.msra.gmra.mxu3 %v6120_v58  ;;  %2613 = vmatmul.bf16.gmra.mxu2 %v6121_v32  ;;  %v6126_v60 = vld [vmem:[#allocation84_spill] sm:$0xff] }
 0x47f   :  { %v1543_v25 = vadd.f32 %v5532_v56, %v6126_v60 }
 0x480   :  { %v2042_v19 = vadd.f32 %v2041_v13, %v1873_v23  ;;  %v2049_v27 = vpop.f32.mrf.mxu0  ;;  %v6123_v13 = vld [vmem:[#allocation79_spill] sm:$0xff] }
 0x481   :  { %v1540_v9 = vadd.f32 %v5532_v56, %v6123_v13 }
 0x482   :  { %v2188_v34 = vmul.f32 %v4874_v53, %v2042_v19  ;;  %vm2123_vm5 = vcmp.gt.f32.partialorder %v2042_v19, 0.0 }
 0x483   :  { %v1709_v49 = vadd.f32 %v5524_v5, %v1540_v9  ;;  %v6128_v9 = vld [vmem:[#allocation32_spill] sm:$0xff] }
 0x484   :  { %v5589_v59 = vpop.f32.mrf.mxu1  ;;  %v2252_v36 = vsel %vm2123_vm5, %v2042_v19, %v2188_v34  ;;  %v1712_v19 = vadd.f32 %v5541_v18, %v1543_v25  ;;  %v1723_v0 = vpop.f32.mrf.mxu2  ;;  %v6129_v18 = vld [vmem:[#allocation62_spill] sm:$0xff] }
 0x485   :  { %v1875_v43 = vpop.f32.mrf.mxu3  ;;  %v2289_v10 = vpack.c.bf16 %v2252_v36, %v2251_v4 }
 0x486   :  { %v1876_v51 = vadd.f32 %v1875_v43, %v1707_v54 }
 0x487   :  { %2497 = vmatmul.bf16.gmra.mxu1 %v2289_v10 }
 0x488   :  { %v2045_v63 = vadd.f32 %v2044_v7, %v1876_v51  ;;  %v2051_v7 = vpop.f32.mrf.mxu0 }
 0x48a   :  { %v2189_v31 = vmul.f32 %v4874_v53, %v2045_v63  ;;  %vm2124_vm6 = vcmp.gt.f32.partialorder %v2045_v63, 0.0 }
 0x48c   :  { %v5595_v39 = vpop.f32.mrf.mxu1  ;;  %v2253_v23 = vsel %vm2124_vm6, %v2045_v63, %v2189_v31 }
 0x48d   :  { %v2546_v1 = vpack.c.bf16 %v5595_v39, %v5589_v59  ;;  %v1877_v8 = vpop.f32.mrf.mxu3  ;;  %v6145_v59 = vld [vmem:[#allocation63_spill] sm:$0xff] }
 0x48e   :  { %v1878_v48 = vadd.f32 %v1877_v8, %v1709_v49  ;;  %2747 = vmatmul.bf16.gmra.mxu3 %v6124_v44  ;;  %2618 = vmatmul.bf16.gmra.mxu2 %v6125_v14 }
 0x490   :  { %v2047_v50 = vadd.f32 %v2046_v45, %v1878_v48  ;;  %v1545_v45 = vadd.f32 %v5532_v56, %v6127_v55  ;;  %v2054_v51 = vpop.f32.mrf.mxu0  ;;  %v1726_v48 = vpop.f32.mrf.mxu2 }
 0x492   :  { %v2190_v5 = vmul.f32 %v4874_v53, %v2047_v50  ;;  %vm2125_vm7 = vcmp.gt.f32.partialorder %v2047_v50, 0.0  ;;  %v1714_v4 = vadd.f32 %v5557_v52, %v1545_v45  ;;  %v6130_v52 = vld [vmem:[#allocation90_spill] sm:$0xff] }
 0x494   :  { %v5607_v17 = vpop.f32.mrf.mxu1  ;;  %v2254_v58 = vsel %vm2125_vm7, %v2047_v50, %v2190_v5 }
 0x495   :  { %v1880_v32 = vpop.f32.mrf.mxu3  ;;  %v2290_v41 = vpack.c.bf16 %v2254_v58, %v2253_v23 }
 0x496   :  { %v1881_v34 = vadd.f32 %v1880_v32, %v1712_v19 }
 0x497   :  { %2502 = vmatmul.bf16.gmra.mxu1 %v2290_v41 }
 0x498   :  { %v2050_v36 = vadd.f32 %v2049_v27, %v1881_v34  ;;  %v1548_v27 = vadd.f32 %v5532_v56, %v6130_v52  ;;  %v2056_v25 = vpop.f32.mrf.mxu0  ;;  %v1728_v55 = vpop.f32.mrf.mxu2 }
 0x49a   :  { %v2191_v49 = vmul.f32 %v4874_v53, %v2050_v36  ;;  %vm2126_vm8 = vcmp.gt.f32.partialorder %v2050_v36, 0.0  ;;  %v1717_v60 = vadd.f32 %v5577_v46, %v1548_v27 }
 0x49c   :  { %v5613_v43 = vpop.f32.mrf.mxu1  ;;  %v2255_v14 = vsel %vm2126_vm8, %v2050_v36, %v2191_v49  ;;  %v6133_v36 = vld [vmem:[#allocation68_spill] sm:$0xff] }
 0x49d   :  { %v2547_v10 = vpack.c.bf16 %v5613_v43, %v5607_v17  ;;  %v1882_v54 = vpop.f32.mrf.mxu3 }
 0x49e   :  { %v1883_v13 = vadd.f32 %v1882_v54, %v1714_v4  ;;  %2752 = vmatmul.bf16.gmra.mxu3 %v6128_v9  ;;  %2623 = vmatmul.bf16.gmra.mxu2 %v6129_v18  ;;  %v6132_v4 = vld [vmem:[#allocation35_spill] sm:$0xff]  ;;  %v6134_v18 = vld [vmem:[#allocation96_spill] sm:$0xff] }
 0x4a0   :  { %v2052_v63 = vadd.f32 %v2051_v7, %v1883_v13  ;;  %v6131_v7 = vld [vmem:[#allocation91_spill] sm:$0xff]  ;;  %v2059_v13 = vpop.f32.mrf.mxu0 }
 0x4a1   :  { %v1550_v58 = vadd.f32 %v5532_v56, %v6131_v7 }
 0x4a2   :  { %v2192_v8 = vmul.f32 %v4874_v53, %v2052_v63  ;;  %vm2127_vm9 = vcmp.gt.f32.partialorder %v2052_v63, 0.0 }
 0x4a3   :  { %v1719_v32 = vadd.f32 %v1718_v33, %v1550_v58  ;;  %v1553_v33 = vadd.f32 %v5532_v56, %v6134_v18 }
 0x4a4   :  { %v5623_v44 = vpop.f32.mrf.mxu1  ;;  %v2256_v31 = vsel %vm2127_vm9, %v2052_v63, %v2192_v8 }
 0x4a5   :  { %v1885_v50 = vpop.f32.mrf.mxu3  ;;  %v2291_v5 = vpack.c.bf16 %v2256_v31, %v2255_v14  ;;  %v1722_v27 = vadd.f32 %v5601_v29, %v1553_v33  ;;  %v6135_v31 = vld [vmem:[#allocation97_spill] sm:$0xff] }
 0x4a6   :  { %v1886_v23 = vadd.f32 %v1885_v50, %v1717_v60  ;;  %v1555_v50 = vadd.f32 %v5532_v56, %v6135_v31  ;;  %v6137_v29 = vld [vmem:[#allocation101_spill] sm:$0xff] }
 0x4a7   :  { %2507 = vmatmul.bf16.gmra.mxu1 %v2291_v5 }
 0x4a8   :  { %v2055_v41 = vadd.f32 %v2054_v51, %v1886_v23  ;;  %v2061_v5 = vpop.f32.mrf.mxu0  ;;  %v1724_v60 = vadd.f32 %v1723_v0, %v1555_v50  ;;  %v6139_v50 = vld [vmem:[#allocation41_spill] sm:$0xff] }
 0x4aa   :  { %v2193_v54 = vmul.f32 %v4874_v53, %v2055_v41  ;;  %vm2128_vm10 = vcmp.gt.f32.partialorder %v2055_v41, 0.0 }
 0x4ac   :  { %v5628_v19 = vpop.f32.mrf.mxu1  ;;  %v2257_v49 = vsel %vm2128_vm10, %v2055_v41, %v2193_v54 }
 0x4ad   :  { %v1887_v34 = vpop.f32.mrf.mxu3 }
 0x4ae   :  { %v1888_v45 = vadd.f32 %v1887_v34, %v1719_v32  ;;  %2757 = vmatmul.bf16.gmra.mxu3 %v6132_v4  ;;  %2628 = vmatmul.bf16.gmra.mxu2 %v6133_v36  ;;  %v6136_v32 = vld [vmem:[#allocation38_spill] sm:$0xff]  ;;  %v1558_v4 = vadd.f32 %v5532_v56, %v6137_v29 }
 0x4b0   :  { %v2057_v46 = vadd.f32 %v2056_v25, %v1888_v45  ;;  %v2064_v0 = vpop.f32.mrf.mxu0  ;;  %v1727_v18 = vadd.f32 %v1726_v48, %v1558_v4 }
 0x4b2   :  { %v2194_v9 = vmul.f32 %v4874_v53, %v2057_v46  ;;  %vm2129_vm11 = vcmp.gt.f32.partialorder %v2057_v46, 0.0 }
 0x4b4   :  { %v2473_v51 = vpop.f32.mrf.mxu1  ;;  %v2258_v63 = vsel %vm2129_vm11, %v2057_v46, %v2194_v9 }
 0x4b5   :  { %v1890_v8 = vpop.f32.mrf.mxu3  ;;  %v2292_v52 = vpack.c.bf16 %v2258_v63, %v2257_v49  ;;  %v6138_v49 = vld [vmem:[#allocation102_spill] sm:$0xff] }
 0x4b6   :  { %v1891_v14 = vadd.f32 %v1890_v8, %v1722_v27  ;;  %v1560_v63 = vadd.f32 %v5532_v56, %v6138_v49 }
 0x4b7   :  { %2512 = vmatmul.bf16.gmra.mxu1 %v2292_v52 }
 0x4b8   :  { %v2060_v25 = vadd.f32 %v2059_v13, %v1891_v14  ;;  %v1729_v8 = vadd.f32 %v1728_v55, %v1560_v63 }
 0x4ba   :  { %v2195_v41 = vmul.f32 %v4874_v53, %v2060_v25  ;;  %vm2130_vm12 = vcmp.gt.f32.partialorder %v2060_v25, 0.0 }
 0x4bc   :  { %v2475_v23 = vpop.f32.mrf.mxu1  ;;  %v2259_v54 = vsel %vm2130_vm12, %v2060_v25, %v2195_v41 }
 0x4bd   :  { %v1892_v7 = vpop.f32.mrf.mxu3  ;;  %v2549_v4 = vpack.c.bf16 %v2475_v23, %v2473_v51  ;;  %v6143_v51 = vld [vmem:[#allocation57_spill] sm:$0xff]  ;;  %v6146_v23 = vld [vmem:[#allocation70_spill] sm:$0xff] }
 0x4be   :  { %v1893_v58 = vadd.f32 %v1892_v7, %v1724_v60  ;;  %2762 = vmatmul.bf16.gmra.mxu3 %v6136_v32 }
 0x4c0   :  { %v2062_v34 = vadd.f32 %v2061_v5, %v1893_v58  ;;  %v2066_v5 = vpop.f32.mrf.mxu0 }
 0x4c2   :  { %v2196_v45 = vmul.f32 %v4874_v53, %v2062_v34  ;;  %vm2131_vm13 = vcmp.gt.f32.partialorder %v2062_v34, 0.0 }
 0x4c4   :  { %v2478_v36 = vpop.f32.mrf.mxu1  ;;  %v2260_v46 = vsel %vm2131_vm13, %v2062_v34, %v2196_v45  ;;  %v6140_v34 = vld [vmem:[#allocation46_spill] sm:$0xff] }
 0x4c5   :  { %v1895_v13 = vpop.f32.mrf.mxu3  ;;  %v2293_v9 = vpack.c.bf16 %v2260_v46, %v2259_v54  ;;  %v2548_v54 = vpack.c.bf16 %v5628_v19, %v5623_v44  ;;  %v6141_v46 = vld [vmem:[#allocation52_spill] sm:$0xff]  ;;  %v6142_v19 = vld [vmem:[#allocation58_spill] sm:$0xff] }
 0x4c6   :  { %v1896_v33 = vadd.f32 %v1895_v13, %v1727_v18  ;;  %v6150_v13 = vld [vmem:[#allocation82_spill] sm:$0xff] }
 0x4c7   :  { %2517 = vmatmul.bf16.gmra.mxu1 %v2293_v9 }
 0x4c8   :  { %v2065_v52 = vadd.f32 %v2064_v0, %v1896_v33  ;;  %v6151_v33 = vld [vmem:[#allocation88_spill] sm:$0xff] }
 0x4ca   :  { %v2197_v60 = vmul.f32 %v4874_v53, %v2065_v52  ;;  %vm2132_vm14 = vcmp.gt.f32.partialorder %v2065_v52, 0.0 }
 0x4cc   :  { %v2480_v27 = vpop.f32.mrf.mxu1  ;;  %v2261_v58 = vsel %vm2132_vm14, %v2065_v52, %v2197_v60  ;;  %v6152_v52 = vld [vmem:[#allocation94_spill] sm:$0xff] }
 0x4cd   :  { %v1897_v14 = vpop.f32.mrf.mxu3  ;;  %v2550_v45 = vpack.c.bf16 %v2480_v27, %v2478_v36 }
 0x4ce   :  { %v1898_v31 = vadd.f32 %v1897_v14, %v1729_v8  ;;  %2767 = vmatmul.bf16.gmra.mxu3 %v6139_v50 }
 0x4d0   :  { %v2067_v25 = vadd.f32 %v2066_v5, %v1898_v31  ;;  %v6153_v5 = vld [vmem:[#allocation99_spill] sm:$0xff] }
 0x4d2   :  { %v2198_v7 = vmul.f32 %v4874_v53, %v2067_v25  ;;  %vm2133_vm15 = vcmp.gt.f32.partialorder %v2067_v25, 0.0 }
 0x4d4   :  { %v2483_v48 = vpop.f32.mrf.mxu1  ;;  %v2262_v32 = vsel %vm2133_vm15, %v2067_v25, %v2198_v7 }
 0x4d5   :  { %v2294_v41 = vpack.c.bf16 %v2262_v32, %v2261_v58  ;;  %v6155_v58 = vld [vmem:[#allocation104_spill] sm:$0xff]  ;;  %v6156_v32 = vld [vmem:[#allocation53_spill] sm:$0xff] }
 0x4d7   :  { %2522 = vmatmul.bf16.gmra.mxu1 %v2294_v41  ;;  %v6157_v41 = vld [vmem:[#allocation107_spill] sm:$0xff] }
 0x4dc   :  { %v2485_v56 = vpop.f32.mrf.mxu1 }
 0x4dd   :  { %v2551_v55 = vpack.c.bf16 %v2485_v56, %v2483_v48  ;;  %v6154_v48 = vld [vmem:[#allocation47_spill] sm:$0xff] }
 0x4de   :  { %2772 = vmatmul.bf16.gmra.mxu3 %v6140_v34  ;;  %v6158_v56 = vld [vmem:[#allocation59_spill] sm:$0xff]  ;;  %v6160_v34 = vld [vmem:[#allocation65_spill] sm:$0xff] }
 0x4df   :  { %2903 = vmatpush.bf16.msra.mxu0 %v2551_v55  ;;  %v6159_v55 = vld [vmem:[#allocation110_spill] sm:$0xff] }
 0x4e3   :  { %2904 = vmatpush.bf16.msra.mxu0 %v2550_v45  ;;  %v6161_v45 = vld [vmem:[#allocation113_spill] sm:$0xff] }
 0x4e4   :  { %v2488_v29 = vpop.f32.mrf.mxu1 }
 0x4e7   :  { %2905 = vmatpush.bf16.msra.mxu0 %v2549_v4  ;;  %v6162_v4 = vld [vmem:[#allocation71_spill] sm:$0xff] }
 0x4eb   :  { %2906 = vmatpush.bf16.msra.mxu0 %v2548_v54  ;;  %v6163_v54 = vld [vmem:[#allocation77_spill] sm:$0xff] }
 0x4ec   :  { %v2490_v53 = vpop.f32.mrf.mxu1 }
 0x4ed   :  { %v2552_v7 = vpack.c.bf16 %v2490_v53, %v2488_v29  ;;  %v2574_v29 = vpop.f32.mrf.mxu2 }
 0x4ee   :  { %2777 = vmatmul.bf16.gmra.mxu3 %v6141_v46 }
 0x4ef   :  { %2907 = vmatpush.bf16.msra.mxu0 %v2547_v10  ;;  %v6144_v10 = vld [vmem:[#allocation64_spill] sm:$0xff] }
 0x4f3   :  { %2908 = vmatpush.bf16.msra.mxu0 %v2546_v1 }
 0x4f4   :  { %v2493_v36 = vpop.f32.mrf.mxu1 }
 0x4f7   :  { %2909 = vmatpush.bf16.msra.mxu0 %v2545_v11 }
 0x4fb   :  { %2910 = vmatpush.bf16.msra.mxu0 %v2544_v6  ;;  %v6149_v6 = vld [vmem:[#allocation75_spill] sm:$0xff] }
 0x4fc   :  { %v2495_v44 = vpop.f32.mrf.mxu1 }
 0x4fd   :  { %v2553_v25 = vpack.c.bf16 %v2495_v44, %v2493_v36  ;;  %v2576_v36 = vpop.f32.mrf.mxu2  ;;  %v6164_v44 = vld [vmem:[#allocation74_spill] sm:$0xff] }
 0x4fe   :  { %2911 = vmatmul.bf16.vlgmr.msra.gmra.mxu0 %v6142_v19  ;;  %2782 = vmatmul.bf16.gmra.mxu3 %v6143_v51  ;;  %v6165_v51 = vld [vmem:[#allocation81_spill] sm:$0xff] }
 0x4ff   :  { %2633 = vmatmul.bf16.gmra.mxu2 %v6164_v44 }
 0x501   :  { %v2743_v53 = vpop.f32.mrf.mxu3 }
 0x504   :  { %v2498_v17 = vpop.f32.mrf.mxu1 }
 0x509   :  { %v2745_v19 = vpop.f32.mrf.mxu3 }
 0x50c   :  { %v2500_v43 = vpop.f32.mrf.mxu1 }
 0x50d   :  { %v2554_v60 = vpack.c.bf16 %v2500_v43, %v2498_v17  ;;  %v6166_v43 = vld [vmem:[#allocation116_spill] sm:$0xff] }
 0x50e   :  { %2916 = vmatmul.bf16.gmra.mxu0 %v6144_v10  ;;  %2787 = vmatmul.bf16.gmra.mxu3 %v6145_v59  ;;  %v2579_v10 = vpop.f32.mrf.mxu2  ;;  %v6167_v59 = vld [vmem:[#allocation83_spill] sm:$0xff] }
 0x514   :  { %v2503_v39 = vpop.f32.mrf.mxu1 }
 0x51c   :  { %v2505_v1 = vpop.f32.mrf.mxu1 }
 0x51d   :  { %v2555_v50 = vpack.c.bf16 %v2505_v1, %v2503_v39  ;;  %v2748_v39 = vpop.f32.mrf.mxu3 }
 0x51e   :  { %2921 = vmatmul.bf16.gmra.mxu0 %v6146_v23  ;;  %2792 = vmatmul.bf16.gmra.mxu3 %v6147_v40  ;;  %v2581_v23 = vpop.f32.mrf.mxu2  ;;  %v6168_v40 = vld [vmem:[#allocation80_spill] sm:$0xff] }
 0x51f   :  { %2638 = vmatmul.bf16.gmra.mxu2 %v6168_v40 }
 0x524   :  { %v2508_v2 = vpop.f32.mrf.mxu1 }
 0x52c   :  { %v2510_v21 = vpop.f32.mrf.mxu1 }
 0x52d   :  { %v2556_v31 = vpack.c.bf16 %v2510_v21, %v2508_v2  ;;  %v2750_v2 = vpop.f32.mrf.mxu3  ;;  %v6169_v21 = vld [vmem:[#allocation87_spill] sm:$0xff] }
 0x52e   :  { %2926 = vmatmul.bf16.gmra.mxu0 %v6148_v16  ;;  %2797 = vmatmul.bf16.gmra.mxu3 %v6149_v6  ;;  %v6170_v6 = vld [vmem:[#allocation119_spill] sm:$0xff] }
 0x534   :  { %v2513_v11 = vpop.f32.mrf.mxu1 }
 0x53c   :  { %v2515_v0 = vpop.f32.mrf.mxu1 }
 0x53d   :  { %v2557_v14 = vpack.c.bf16 %v2515_v0, %v2513_v11  ;;  %v5697_v11 = vld [vmem:[%s5854_s4 + $0x1] ss:$0 sm:$0xff]  ;;  %v2584_v0 = vpop.f32.mrf.mxu2 }
 0x53e   :  { %2931 = vmatmul.bf16.gmra.mxu0 %v6150_v13  ;;  %2802 = vmatmul.bf16.gmra.mxu3 %v6165_v51  ;;  %v6171_v13 = vld [vmem:[#allocation89_spill] sm:$0xff]  ;;  %v2582_v44 = vadd.f32 %v5697_v11, %v2581_v23 }
 0x544   :  { %v2518_v9 = vpop.f32.mrf.mxu1 }
 0x54c   :  { %v2520_v18 = vpop.f32.mrf.mxu1 }
 0x54d   :  { %v2558_v27 = vpack.c.bf16 %v2520_v18, %v2518_v9  ;;  %v2753_v9 = vpop.f32.mrf.mxu3  ;;  %v2575_v18 = vadd.f32 %v5697_v11, %v2574_v29  ;;  %v6175_v29 = vld [vmem:[#allocation92_spill] sm:$0xff] }
 0x54e   :  { %2936 = vmatmul.bf16.gmra.mxu0 %v6151_v33  ;;  %2807 = vmatmul.bf16.gmra.mxu3 %v6169_v21 }
 0x554   :  { %v2523_v49 = vpop.f32.mrf.mxu1 }
 0x55c   :  { %v2525_v63 = vpop.f32.mrf.mxu1 }
 0x55d   :  { %v2559_v8 = vpack.c.bf16 %v2525_v63, %v2523_v49  ;;  %v2744_v49 = vadd.f32 %v2743_v53, %v2575_v18  ;;  %v2586_v63 = vpop.f32.mrf.mxu2 }
 0x55e   :  { %2941 = vmatmul.bf16.gmra.mxu0 %v6152_v52  ;;  %v2755_v52 = vpop.f32.mrf.mxu3 }
 0x55f   :  { %3072 = vmatpush.bf16.msra.mxu1 %v2559_v8  ;;  %v6172_v8 = vld [vmem:[#allocation86_spill] sm:$0xff] }
 0x560   :  { %2643 = vmatmul.bf16.gmra.mxu2 %v6172_v8  ;;  %v6180_v8 = vld [vmem:[#allocation103_spill] sm:$0xff] }
 0x563   :  { %3073 = vmatpush.bf16.msra.mxu1 %v2558_v27  ;;  %v6173_v27 = vld [vmem:[#allocation93_spill] sm:$0xff] }
 0x564   :  { %2812 = vmatmul.bf16.gmra.mxu3 %v6173_v27 }
 0x567   :  { %3074 = vmatpush.bf16.msra.mxu1 %v2557_v14 }
 0x56b   :  { %3075 = vmatpush.bf16.msra.mxu1 %v2556_v31 }
 0x56e   :  { %2946 = vmatmul.bf16.gmra.mxu0 %v6153_v5 }
 0x56f   :  { %3076 = vmatpush.bf16.msra.mxu1 %v2555_v50  ;;  %v2577_v50 = vadd.f32 %v5697_v11, %v2576_v36  ;;  %v6177_v36 = vld [vmem:[#allocation124_spill] sm:$0xff] }
 0x573   :  { %3077 = vmatpush.bf16.msra.mxu1 %v2554_v60 }
 0x577   :  { %3078 = vmatpush.bf16.msra.mxu1 %v2553_v25  ;;  %v2589_v25 = vpop.f32.mrf.mxu2 }
 0x57b   :  { %3079 = vmatpush.bf16.msra.mxu1 %v2552_v7  ;;  %v2912_v46 = vpop.f32.mrf.mxu0  ;;  %v6174_v7 = vld [vmem:[#allocation95_spill] sm:$0xff] }
 0x57c   :  { %v2913_v14 = vadd.f32 %v2912_v46, %v2744_v49  ;;  %v6179_v49 = vld [vmem:[#allocation18_spill] sm:$0xff] }
 0x57e   :  { %3080 = vmatmul.bf16.vlgmr.msra.gmra.mxu1 %v6154_v48  ;;  %2951 = vmatmul.bf16.gmra.mxu0 %v6155_v58  ;;  %v2746_v48 = vadd.f32 %v2745_v19, %v2577_v50  ;;  %v2758_v58 = vpop.f32.mrf.mxu3 }
 0x583   :  { %v2914_v17 = vpop.f32.mrf.mxu0 }
 0x58b   :  { %v2917_v1 = vpop.f32.mrf.mxu0 }
 0x58e   :  { %3085 = vmatmul.bf16.gmra.mxu1 %v6156_v32  ;;  %2956 = vmatmul.bf16.gmra.mxu0 %v6157_v41  ;;  %v2580_v32 = vadd.f32 %v5697_v11, %v2579_v10  ;;  %v2751_v10 = vadd.f32 %v2750_v2, %v2582_v44  ;;  %v2587_v2 = vadd.f32 %v5697_v11, %v2586_v63  ;;  %v6183_v63 = vld [vmem:[#allocation106_spill] sm:$0xff] }
 0x593   :  { %v2919_v16 = vpop.f32.mrf.mxu0 }
 0x594   :  { %v2920_v21 = vadd.f32 %v2919_v16, %v2751_v10  ;;  %v6181_v16 = vld [vmem:[#allocation105_spill] sm:$0xff] }
 0x59b   :  { %v2922_v33 = vpop.f32.mrf.mxu0 }
 0x59e   :  { %3090 = vmatmul.bf16.gmra.mxu1 %v6158_v56  ;;  %2961 = vmatmul.bf16.gmra.mxu0 %v6159_v55  ;;  %v2915_v56 = vadd.f32 %v2914_v17, %v2746_v48  ;;  %v6178_v17 = vld [vmem:[#allocation100_spill] sm:$0xff] }
 0x5a3   :  { %v2924_v31 = vpop.f32.mrf.mxu0 }
 0x5ab   :  { %v2927_v41 = vpop.f32.mrf.mxu0 }
 0x5ae   :  { %3095 = vmatmul.bf16.gmra.mxu1 %v6160_v34  ;;  %2966 = vmatmul.bf16.gmra.mxu0 %v6161_v45  ;;  %v2749_v45 = vadd.f32 %v2748_v39, %v2580_v32  ;;  %v2585_v39 = vadd.f32 %v5697_v11, %v2584_v0 }
 0x5b0   :  { %v2918_v53 = vadd.f32 %v2917_v1, %v2749_v45  ;;  %v2754_v1 = vadd.f32 %v2753_v9, %v2585_v39  ;;  %v2756_v9 = vadd.f32 %v2755_v52, %v2587_v2  ;;  %v6182_v45 = vld [vmem:[#allocation19_spill] sm:$0xff] }
 0x5b2   :  { %v2923_v27 = vadd.f32 %v2922_v33, %v2754_v1  ;;  %v2925_v32 = vadd.f32 %v2924_v31, %v2756_v9  ;;  %v6184_v31 = vld [vmem:[#allocation108_spill] sm:$0xff] }
 0x5b3   :  { %v2929_v46 = vpop.f32.mrf.mxu0 }
 0x5bb   :  { %v2932_v40 = vpop.f32.mrf.mxu0 }
 0x5be   :  { %3100 = vmatmul.bf16.gmra.mxu1 %v6162_v4  ;;  %2971 = vmatmul.bf16.gmra.mxu0 %v6166_v43  ;;  %v2591_v4 = vpop.f32.mrf.mxu2 }
 0x5bf   :  { %2648 = vmatmul.bf16.gmra.mxu2 %v6175_v29  ;;  %v2592_v52 = vadd.f32 %v5697_v11, %v2591_v4  ;;  %v6186_v4 = vld [vmem:[#allocation109_spill] sm:$0xff] }
 0x5c6   :  { %v2594_v43 = vpop.f32.mrf.mxu2 }
 0x5ce   :  { %3105 = vmatmul.bf16.gmra.mxu1 %v6163_v54  ;;  %2976 = vmatmul.bf16.gmra.mxu0 %v6170_v6  ;;  %v6176_v54 = vld [vmem:[#allocation98_spill] sm:$0xff]  ;;  %v2596_v18 = vpop.f32.mrf.mxu2 }
 0x5cf   :  { %2653 = vmatmul.bf16.gmra.mxu2 %v6179_v49 }
 0x5de   :  { %3110 = vmatmul.bf16.gmra.mxu1 %v6167_v59  ;;  %2981 = vmatmul.bf16.gmra.mxu0 %v5013_v3  ;;  %v2760_v3 = vpop.f32.mrf.mxu3 }
 0x5df   :  { %2817 = vmatmul.bf16.gmra.mxu3 %v6176_v54 }
 0x5e6   :  { %v2763_v59 = vpop.f32.mrf.mxu3 }
 0x5ee   :  { %3115 = vmatmul.bf16.gmra.mxu1 %v6171_v13  ;;  %2986 = vmatmul.bf16.gmra.mxu0 %v6177_v36  ;;  %v2765_v23 = vpop.f32.mrf.mxu3 }
 0x5ef   :  { %2822 = vmatmul.bf16.gmra.mxu3 %v6180_v8 }
 0x5fb   :  { %v3081_v5 = vpop.f32.mrf.mxu1 }
 0x5fc   :  { %v3082_v60 = vadd.f32 %v3081_v5, %v2913_v14  ;;  %v2934_v14 = vpop.f32.mrf.mxu0  ;;  %v2599_v5 = vpop.f32.mrf.mxu2 }
 0x5fd   :  { %v2600_v2 = vadd.f32 %v5697_v11, %v2599_v5 }
 0x5fe   :  { %3241 = vst [vmem:[#allocation12] sm:$0xff] %v3082_v60  ;;  %3120 = vmatmul.bf16.gmra.mxu1 %v6174_v7  ;;  %2991 = vmatmul.bf16.gmra.mxu0 %v5067_v35  ;;  %v2768_v60 = vpop.f32.mrf.mxu3  ;;  %v2590_v7 = vadd.f32 %v5697_v11, %v2589_v25 }
 0x600   :  { %v2759_v33 = vadd.f32 %v2758_v58, %v2590_v7  ;;  %v2761_v58 = vadd.f32 %v2760_v3, %v2592_v52  ;;  %v2597_v3 = vadd.f32 %v5697_v11, %v2596_v18  ;;  %v6189_v18 = vld [vmem:[#allocation112_spill] sm:$0xff] }
 0x602   :  { %v2928_v29 = vadd.f32 %v2927_v41, %v2759_v33 }
 0x603   :  { %v3083_v55 = vpop.f32.mrf.mxu1 }
 0x604   :  { %v3084_v34 = vadd.f32 %v3083_v55, %v2915_v56  ;;  %v2937_v48 = vpop.f32.mrf.mxu0 }
 0x606   :  { %3242 = vst [vmem:[#allocation12 + $0x8] sm:$0xff] %v3084_v34  ;;  %v2601_v34 = vpop.f32.mrf.mxu2  ;;  %2658 = vmatmul.bf16.gmra.mxu2 %v6182_v45  ;;  %v2770_v35 = vpop.f32.mrf.mxu3  ;;  %2827 = vmatmul.bf16.gmra.mxu3 %v6183_v63 }
 0x60b   :  { %v3086_v19 = vpop.f32.mrf.mxu1 }
 0x60c   :  { %v3087_v51 = vadd.f32 %v3086_v19, %v2918_v53  ;;  %v2939_v54 = vpop.f32.mrf.mxu0  ;;  %v2595_v19 = vadd.f32 %v5697_v11, %v2594_v43 }
 0x60e   :  { %3243 = vst [vmem:[#allocation12 + $0x10] sm:$0xff] %v3087_v51  ;;  %3125 = vmatmul.bf16.gmra.mxu1 %v6178_v17  ;;  %2996 = vmatmul.bf16.gmra.mxu0 %v5098_v61  ;;  %v2604_v36 = vpop.f32.mrf.mxu2  ;;  %v2773_v44 = vpop.f32.mrf.mxu3  ;;  %v2930_v17 = vadd.f32 %v2929_v46, %v2761_v58  ;;  %v2764_v41 = vadd.f32 %v2763_v59, %v2595_v19  ;;  %v6187_v46 = vld [vmem:[#allocation111_spill] sm:$0xff]  ;;  %v6191_v19 = vld [vmem:[#allocation22_spill] sm:$0xff] }
 0x60f   :  { %v2766_v59 = vadd.f32 %v2765_v23, %v2597_v3  ;;  %v2602_v23 = vadd.f32 %v5697_v11, %v2601_v34  ;;  %v6192_v34 = vld [vmem:[#allocation115_spill] sm:$0xff] }
 0x613   :  { %v3088_v6 = vpop.f32.mrf.mxu1 }
 0x614   :  { %v3089_v13 = vadd.f32 %v3088_v6, %v2920_v21  ;;  %v2942_v51 = vpop.f32.mrf.mxu0  ;;  %v6185_v6 = vld [vmem:[#allocation20_spill] sm:$0xff] }
 0x616   :  { %3244 = vst [vmem:[#allocation12 + $0x18] sm:$0xff] %v3089_v13  ;;  %v2606_v21 = vpop.f32.mrf.mxu2  ;;  %2663 = vmatmul.bf16.gmra.mxu2 %v6185_v6  ;;  %v2775_v61 = vpop.f32.mrf.mxu3  ;;  %2832 = vmatmul.bf16.gmra.mxu3 %v6186_v4  ;;  %v2933_v13 = vadd.f32 %v2932_v40, %v2764_v41  ;;  %v2769_v40 = vadd.f32 %v2768_v60, %v2600_v2 }
 0x617   :  { %v2771_v60 = vadd.f32 %v2770_v35, %v2602_v23  ;;  %v2607_v35 = vadd.f32 %v5697_v11, %v2606_v21  ;;  %v6195_v21 = vld [vmem:[#allocation118_spill] sm:$0xff] }
 0x61b   :  { %v3091_v50 = vpop.f32.mrf.mxu1 }
 0x61c   :  { %v3092_v0 = vadd.f32 %v3091_v50, %v2923_v27  ;;  %v2944_v1 = vpop.f32.mrf.mxu0 }
 0x61e   :  { %3245 = vst [vmem:[#allocation12 + $0x20] sm:$0xff] %v3092_v0  ;;  %3130 = vmatmul.bf16.gmra.mxu1 %v6181_v16  ;;  %3001 = vmatmul.bf16.gmra.mxu0 %v5138_v62  ;;  %v2609_v8 = vpop.f32.mrf.mxu2  ;;  %v2778_v27 = vpop.f32.mrf.mxu3  ;;  %v2935_v0 = vadd.f32 %v2934_v14, %v2766_v59  ;;  %v6190_v14 = vld [vmem:[#allocation114_spill] sm:$0xff]  ;;  %v6194_v59 = vld [vmem:[#allocation23_spill] sm:$0xff] }
 0x61f   :  { %v2610_v4 = vadd.f32 %v5697_v11, %v2609_v8 }
 0x623   :  { %v3093_v56 = vpop.f32.mrf.mxu1 }
 0x624   :  { %v3094_v55 = vadd.f32 %v3093_v56, %v2925_v32  ;;  %v2947_v50 = vpop.f32.mrf.mxu0  ;;  %v6188_v32 = vld [vmem:[#allocation21_spill] sm:$0xff]  ;;  %v2938_v56 = vadd.f32 %v2937_v48, %v2769_v40 }
 0x626   :  { %3246 = vst [vmem:[#allocation12 + $0x28] sm:$0xff] %v3094_v55  ;;  %v2611_v7 = vpop.f32.mrf.mxu2  ;;  %2668 = vmatmul.bf16.gmra.mxu2 %v6188_v32  ;;  %v2780_v62 = vpop.f32.mrf.mxu3  ;;  %2837 = vmatmul.bf16.gmra.mxu3 %v6189_v18 }
 0x62b   :  { %v3096_v53 = vpop.f32.mrf.mxu1 }
 0x62c   :  { %v3097_v25 = vadd.f32 %v3096_v53, %v2928_v29  ;;  %v2949_v55 = vpop.f32.mrf.mxu0  ;;  %v2605_v29 = vadd.f32 %v5697_v11, %v2604_v36  ;;  %v2940_v53 = vadd.f32 %v2939_v54, %v2771_v60  ;;  %v6193_v54 = vld [vmem:[#allocation117_spill] sm:$0xff] }
 0x62e   :  { %3247 = vst [vmem:[#allocation12 + $0x30] sm:$0xff] %v3097_v25  ;;  %3135 = vmatmul.bf16.gmra.mxu1 %v6184_v31  ;;  %3006 = vmatmul.bf16.gmra.mxu0 %v5173_v28  ;;  %v2614_v45 = vpop.f32.mrf.mxu2  ;;  %v2783_v63 = vpop.f32.mrf.mxu3  ;;  %v2774_v48 = vadd.f32 %v2773_v44, %v2605_v29  ;;  %v2776_v44 = vadd.f32 %v2775_v61, %v2607_v35 }
 0x62f   :  { %v2612_v61 = vadd.f32 %v5697_v11, %v2611_v7  ;;  %v2615_v32 = vadd.f32 %v5697_v11, %v2614_v45  ;;  %v6198_v7 = vld [vmem:[#allocation121_spill] sm:$0xff] }
 0x630   :  { %v2945_v3 = vadd.f32 %v2944_v1, %v2776_v44  ;;  %v6196_v1 = vld [vmem:[#allocation120_spill] sm:$0xff] }
 0x633   :  { %v3098_v10 = vpop.f32.mrf.mxu1 }
 0x634   :  { %v3099_v39 = vadd.f32 %v3098_v10, %v2930_v17  ;;  %v2952_v52 = vpop.f32.mrf.mxu0  ;;  %v2943_v17 = vadd.f32 %v2942_v51, %v2774_v48  ;;  %v2779_v51 = vadd.f32 %v2778_v27, %v2610_v4  ;;  %v2781_v27 = vadd.f32 %v2780_v62, %v2612_v61 }
 0x636   :  { %3248 = vst [vmem:[#allocation12 + $0x38] sm:$0xff] %v3099_v39  ;;  %v2616_v58 = vpop.f32.mrf.mxu2  ;;  %2673 = vmatmul.bf16.gmra.mxu2 %v6191_v19  ;;  %v2785_v28 = vpop.f32.mrf.mxu3  ;;  %2842 = vmatmul.bf16.gmra.mxu3 %v6192_v34  ;;  %v2948_v2 = vadd.f32 %v2947_v50, %v2779_v51  ;;  %v2784_v50 = vadd.f32 %v2783_v63, %v2615_v32 }
 0x637   :  { %v2617_v62 = vadd.f32 %v5697_v11, %v2616_v58  ;;  %v6201_v58 = vld [vmem:[#allocation123_spill] sm:$0xff] }
 0x638   :  { %v2953_v60 = vadd.f32 %v2952_v52, %v2784_v50 }
 0x639   :  { %v2786_v63 = vadd.f32 %v2785_v28, %v2617_v62 }
 0x63b   :  { %v3101_v49 = vpop.f32.mrf.mxu1 }
 0x63c   :  { %v3102_v43 = vadd.f32 %v3101_v49, %v2933_v13  ;;  %v2954_v10 = vpop.f32.mrf.mxu0 }
 0x63d   :  { %v2955_v34 = vadd.f32 %v2954_v10, %v2786_v63  ;;  %v6202_v10 = vld [vmem:[#allocation125_spill] sm:$0xff] }
 0x63e   :  { %3249 = vst [vmem:[#allocation12 + $0x40] sm:$0xff] %v3102_v43  ;;  %3140 = vmatmul.bf16.gmra.mxu1 %v6187_v46  ;;  %3011 = vmatmul.bf16.gmra.mxu0 %v5208_v22  ;;  %v2619_v41 = vpop.f32.mrf.mxu2  ;;  %v2788_v6 = vpop.f32.mrf.mxu3 }
 0x63f   :  { %v2620_v48 = vadd.f32 %v5697_v11, %v2619_v41 }
 0x641   :  { %v2789_v52 = vadd.f32 %v2788_v6, %v2620_v48 }
 0x643   :  { %v3103_v16 = vpop.f32.mrf.mxu1 }
 0x644   :  { %v3104_v9 = vadd.f32 %v3103_v16, %v2935_v0  ;;  %v2957_v13 = vpop.f32.mrf.mxu0 }
 0x646   :  { %3250 = vst [vmem:[#allocation12 + $0x48] sm:$0xff] %v3104_v9  ;;  %v2621_v46 = vpop.f32.mrf.mxu2  ;;  %2678 = vmatmul.bf16.gmra.mxu2 %v6194_v59  ;;  %v2790_v22 = vpop.f32.mrf.mxu3  ;;  %2847 = vmatmul.bf16.gmra.mxu3 %v6195_v21 }
 0x647   :  { %v2622_v28 = vadd.f32 %v5697_v11, %v2621_v46  ;;  %v6204_v46 = vld [vmem:[#allocation126_spill] sm:$0xff] }
 0x649   :  { %v2791_v6 = vadd.f32 %v2790_v22, %v2622_v28 }
 0x64b   :  { %v3106_v33 = vpop.f32.mrf.mxu1 }
 0x64c   :  { %v3107_v5 = vadd.f32 %v3106_v33, %v2938_v56  ;;  %v2959_v0 = vpop.f32.mrf.mxu0  ;;  %v2950_v56 = vadd.f32 %v2949_v55, %v2781_v27  ;;  %v6199_v55 = vld [vmem:[#allocation122_spill] sm:$0xff] }
 0x64d   :  { %v2960_v59 = vadd.f32 %v2959_v0, %v2791_v6  ;;  %v6205_v27 = vld [vmem:[#allocation142_spill] sm:$0xff]  ;;  %v6206_v0 = vld [vmem:[#allocation127_spill] sm:$0xff] }
 0x64e   :  { %3251 = vst [vmem:[#allocation12 + $0x50] sm:$0xff] %v3107_v5  ;;  %3145 = vmatmul.bf16.gmra.mxu1 %v6190_v14  ;;  %3016 = vmatmul.bf16.gmra.mxu0 %v5235_v15  ;;  %v2624_v9 = vpop.f32.mrf.mxu2  ;;  %v2793_v40 = vpop.f32.mrf.mxu3  ;;  %v6197_v14 = vld [vmem:[#allocation24_spill] sm:$0xff] }
 0x653   :  { %v3108_v25 = vpop.f32.mrf.mxu1 }
 0x654   :  { %v3109_v31 = vadd.f32 %v3108_v25, %v2940_v53  ;;  %v2962_v18 = vpop.f32.mrf.mxu0 }
 0x656   :  { %3252 = vst [vmem:[#allocation12 + $0x58] sm:$0xff] %v3109_v31  ;;  %v2626_v5 = vpop.f32.mrf.mxu2  ;;  %2683 = vmatmul.bf16.gmra.mxu2 %v6197_v14  ;;  %v2795_v15 = vpop.f32.mrf.mxu3  ;;  %2852 = vmatmul.bf16.gmra.mxu3 %v6198_v7 }
 0x657   :  { %v2627_v22 = vadd.f32 %v5697_v11, %v2626_v5 }
 0x65b   :  { %v3111_v39 = vpop.f32.mrf.mxu1 }
 0x65c   :  { %v3112_v36 = vadd.f32 %v3111_v39, %v2943_v17  ;;  %v2964_v29 = vpop.f32.mrf.mxu0 }
 0x65e   :  { %3253 = vst [vmem:[#allocation12 + $0x60] sm:$0xff] %v3112_v36  ;;  %3150 = vmatmul.bf16.gmra.mxu1 %v6193_v54  ;;  %3021 = vmatmul.bf16.gmra.mxu0 %v5260_v12  ;;  %v2629_v25 = vpop.f32.mrf.mxu2  ;;  %v2798_v31 = vpop.f32.mrf.mxu3  ;;  %v6200_v36 = vld [vmem:[#allocation25_spill] sm:$0xff]  ;;  %v2958_v54 = vadd.f32 %v2957_v13, %v2789_v52 }
 0x663   :  { %v3113_v49 = vpop.f32.mrf.mxu1 }
 0x664   :  { %v3114_v43 = vadd.f32 %v3113_v49, %v2945_v3  ;;  %v2967_v19 = vpop.f32.mrf.mxu0 }
 0x666   :  { %3254 = vst [vmem:[#allocation12 + $0x68] sm:$0xff] %v3114_v43  ;;  %v2631_v39 = vpop.f32.mrf.mxu2  ;;  %2688 = vmatmul.bf16.gmra.mxu2 %v6200_v36  ;;  %v2800_v12 = vpop.f32.mrf.mxu3  ;;  %2857 = vmatmul.bf16.gmra.mxu3 %v6201_v58  ;;  %v2625_v43 = vadd.f32 %v5697_v11, %v2624_v9 }
 0x668   :  { %v2794_v13 = vadd.f32 %v2793_v40, %v2625_v43  ;;  %v2796_v40 = vadd.f32 %v2795_v15, %v2627_v22  ;;  %v2632_v15 = vadd.f32 %v5697_v11, %v2631_v39  ;;  %v6211_v39 = vld [vmem:[#allocation130_spill] sm:$0xff] }
 0x66a   :  { %v2965_v14 = vadd.f32 %v2964_v29, %v2796_v40  ;;  %v6209_v29 = vld [vmem:[#allocation129_spill] sm:$0xff] }
 0x66b   :  { %v3116_v16 = vpop.f32.mrf.mxu1 }
 0x66c   :  { %v3117_v8 = vadd.f32 %v3116_v16, %v2948_v2  ;;  %v2969_v44 = vpop.f32.mrf.mxu0  ;;  %v6203_v16 = vld [vmem:[#allocation26_spill] sm:$0xff] }
 0x66e   :  { %3255 = vst [vmem:[#allocation12 + $0x70] sm:$0xff] %v3117_v8  ;;  %3155 = vmatmul.bf16.gmra.mxu1 %v6196_v1  ;;  %3026 = vmatmul.bf16.gmra.mxu0 %v5285_v38  ;;  %v2634_v3 = vpop.f32.mrf.mxu2  ;;  %v2803_v49 = vpop.f32.mrf.mxu3  ;;  %v2963_v8 = vadd.f32 %v2962_v18, %v2794_v13 }
 0x673   :  { %v3118_v23 = vpop.f32.mrf.mxu1 }
 0x674   :  { %v3119_v33 = vadd.f32 %v3118_v23, %v2950_v56  ;;  %v2972_v51 = vpop.f32.mrf.mxu0 }
 0x676   :  { %3256 = vst [vmem:[#allocation12 + $0x78] sm:$0xff] %v3119_v33  ;;  %v2636_v61 = vpop.f32.mrf.mxu2  ;;  %2693 = vmatmul.bf16.gmra.mxu2 %v6203_v16  ;;  %v2805_v38 = vpop.f32.mrf.mxu3  ;;  %2862 = vmatmul.bf16.gmra.mxu3 %v6204_v46  ;;  %v2630_v33 = vadd.f32 %v5697_v11, %v2629_v25 }
 0x678   :  { %v2799_v18 = vadd.f32 %v2798_v31, %v2630_v33  ;;  %v2801_v31 = vadd.f32 %v2800_v12, %v2632_v15  ;;  %v2637_v12 = vadd.f32 %v5697_v11, %v2636_v61  ;;  %v6214_v61 = vld [vmem:[#allocation132_spill] sm:$0xff] }
 0x67a   :  { %v2970_v36 = vadd.f32 %v2969_v44, %v2801_v31  ;;  %v6212_v44 = vld [vmem:[#allocation131_spill] sm:$0xff] }
 0x67b   :  { %v3121_v53 = vpop.f32.mrf.mxu1 }
 0x67c   :  { %v3122_v45 = vadd.f32 %v3121_v53, %v2953_v60  ;;  %v2974_v1 = vpop.f32.mrf.mxu0  ;;  %v6207_v53 = vld [vmem:[#allocation28_spill] sm:$0xff] }
 0x67e   :  { %3257 = vst [vmem:[#allocation12 + $0x80] sm:$0xff] %v3122_v45  ;;  %3160 = vmatmul.bf16.gmra.mxu1 %v6199_v55  ;;  %3031 = vmatmul.bf16.gmra.mxu0 %v6205_v27  ;;  %v2639_v56 = vpop.f32.mrf.mxu2  ;;  %v2808_v23 = vpop.f32.mrf.mxu3  ;;  %v6208_v45 = vld [vmem:[#allocation128_spill] sm:$0xff]  ;;  %v2968_v55 = vadd.f32 %v2967_v19, %v2799_v18  ;;  %v6213_v27 = vld [vmem:[#allocation34_spill] sm:$0xff] }
 0x683   :  { %v3123_v17 = vpop.f32.mrf.mxu1 }
 0x684   :  { %v3124_v35 = vadd.f32 %v3123_v17, %v2955_v34  ;;  %v2977_v50 = vpop.f32.mrf.mxu0 }
 0x686   :  { %3258 = vst [vmem:[#allocation12 + $0x88] sm:$0xff] %v3124_v35  ;;  %v2641_v62 = vpop.f32.mrf.mxu2  ;;  %2698 = vmatmul.bf16.gmra.mxu2 %v6207_v53  ;;  %v2810_v5 = vpop.f32.mrf.mxu3  ;;  %2867 = vmatmul.bf16.gmra.mxu3 %v6208_v45  ;;  %v2635_v35 = vadd.f32 %v5697_v11, %v2634_v3  ;;  %v6216_v45 = vld [vmem:[#allocation37_spill] sm:$0xff] }
 0x688   :  { %v2804_v19 = vadd.f32 %v2803_v49, %v2635_v35  ;;  %v2806_v49 = vadd.f32 %v2805_v38, %v2637_v12  ;;  %v2642_v38 = vadd.f32 %v5697_v11, %v2641_v62  ;;  %v6217_v62 = vld [vmem:[#allocation134_spill] sm:$0xff] }
 0x68a   :  { %v2975_v13 = vadd.f32 %v2974_v1, %v2806_v49  ;;  %v6215_v1 = vld [vmem:[#allocation133_spill] sm:$0xff]  ;;  %v2811_v40 = vadd.f32 %v2810_v5, %v2642_v38 }
 0x68b   :  { %v3126_v4 = vpop.f32.mrf.mxu1 }
 0x68c   :  { %v3127_v41 = vadd.f32 %v3126_v4, %v2958_v54  ;;  %v2979_v63 = vpop.f32.mrf.mxu0  ;;  %v6210_v4 = vld [vmem:[#allocation31_spill] sm:$0xff] }
 0x68e   :  { %3259 = vst [vmem:[#allocation12 + $0x90] sm:$0xff] %v3127_v41  ;;  %3165 = vmatmul.bf16.gmra.mxu1 %v6202_v10  ;;  %3036 = vmatmul.bf16.gmra.mxu0 %v5326_v57  ;;  %v2644_v34 = vpop.f32.mrf.mxu2  ;;  %v2813_v17 = vpop.f32.mrf.mxu3  ;;  %v2973_v41 = vadd.f32 %v2972_v51, %v2804_v19 }
 0x68f   :  { %v2645_v33 = vadd.f32 %v5697_v11, %v2644_v34 }
 0x693   :  { %v3128_v21 = vpop.f32.mrf.mxu1 }
 0x694   :  { %v3129_v2 = vadd.f32 %v3128_v21, %v2960_v59  ;;  %v2982_v52 = vpop.f32.mrf.mxu0  ;;  %v2640_v21 = vadd.f32 %v5697_v11, %v2639_v56 }
 0x696   :  { %3260 = vst [vmem:[#allocation12 + $0x98] sm:$0xff] %v3129_v2  ;;  %v2646_v28 = vpop.f32.mrf.mxu2  ;;  %2703 = vmatmul.bf16.gmra.mxu2 %v6210_v4  ;;  %v2815_v57 = vpop.f32.mrf.mxu3  ;;  %2872 = vmatmul.bf16.gmra.mxu3 %v6211_v39  ;;  %v2809_v51 = vadd.f32 %v2808_v23, %v2640_v21  ;;  %v6219_v4 = vld [vmem:[#allocation40_spill] sm:$0xff] }
 0x697   :  { %v2647_v5 = vadd.f32 %v5697_v11, %v2646_v28  ;;  %v6220_v28 = vld [vmem:[#allocation136_spill] sm:$0xff] }
 0x698   :  { %v2978_v22 = vadd.f32 %v2977_v50, %v2809_v51  ;;  %v2814_v50 = vadd.f32 %v2813_v17, %v2645_v33  ;;  %v6222_v51 = vld [vmem:[#allocation45_spill] sm:$0xff] }
 0x69b   :  { %v3131_v32 = vpop.f32.mrf.mxu1 }
 0x69c   :  { %v3132_v9 = vadd.f32 %v3131_v32, %v2963_v8  ;;  %v2984_v10 = vpop.f32.mrf.mxu0 }
 0x69e   :  { %3261 = vst [vmem:[#allocation12 + $0xa0] sm:$0xff] %v3132_v9  ;;  %3170 = vmatmul.bf16.gmra.mxu1 %v6206_v0  ;;  %3041 = vmatmul.bf16.gmra.mxu0 %v5354_v37  ;;  %v2649_v43 = vpop.f32.mrf.mxu2  ;;  %v2818_v59 = vpop.f32.mrf.mxu3 }
 0x69f   :  { %v2650_v17 = vadd.f32 %v5697_v11, %v2649_v43 }
 0x6a3   :  { %v3133_v7 = vpop.f32.mrf.mxu1 }
 0x6a4   :  { %v3134_v60 = vadd.f32 %v3133_v7, %v2965_v14  ;;  %v2987_v2 = vpop.f32.mrf.mxu0  ;;  %v2980_v7 = vadd.f32 %v2979_v63, %v2811_v40  ;;  %v6218_v63 = vld [vmem:[#allocation135_spill] sm:$0xff] }
 0x6a6   :  { %3262 = vst [vmem:[#allocation12 + $0xa8] sm:$0xff] %v3134_v60  ;;  %v2651_v8 = vpop.f32.mrf.mxu2  ;;  %2708 = vmatmul.bf16.gmra.mxu2 %v6213_v27  ;;  %v2820_v37 = vpop.f32.mrf.mxu3  ;;  %2877 = vmatmul.bf16.gmra.mxu3 %v6214_v61 }
 0x6ab   :  { %v3136_v48 = vpop.f32.mrf.mxu1 }
 0x6ac   :  { %v3137_v25 = vadd.f32 %v3136_v48, %v2968_v55  ;;  %v2989_v32 = vpop.f32.mrf.mxu0  ;;  %v2983_v55 = vadd.f32 %v2982_v52, %v2814_v50  ;;  %v2819_v52 = vadd.f32 %v2818_v59, %v2650_v17  ;;  %v6226_v50 = vld [vmem:[#allocation140_spill] sm:$0xff] }
 0x6ae   :  { %3263 = vst [vmem:[#allocation12 + $0xb0] sm:$0xff] %v3137_v25  ;;  %3175 = vmatmul.bf16.gmra.mxu1 %v6209_v29  ;;  %3046 = vmatmul.bf16.gmra.mxu0 %v5392_v30  ;;  %v2654_v0 = vpop.f32.mrf.mxu2  ;;  %v2823_v23 = vpop.f32.mrf.mxu3  ;;  %v2816_v29 = vadd.f32 %v2815_v57, %v2647_v5  ;;  %v2988_v39 = vadd.f32 %v2987_v2, %v2819_v52 }
 0x6af   :  { %v2652_v57 = vadd.f32 %v5697_v11, %v2651_v8  ;;  %v2655_v49 = vadd.f32 %v5697_v11, %v2654_v0  ;;  %v6223_v8 = vld [vmem:[#allocation138_spill] sm:$0xff] }
 0x6b1   :  { %v2821_v43 = vadd.f32 %v2820_v37, %v2652_v57  ;;  %v2824_v2 = vadd.f32 %v2823_v23, %v2655_v49 }
 0x6b3   :  { %v3138_v58 = vpop.f32.mrf.mxu1  ;;  %v2990_v21 = vadd.f32 %v2989_v32, %v2821_v43  ;;  %v6224_v32 = vld [vmem:[#allocation139_spill] sm:$0xff] }
 0x6b4   :  { %v3139_v54 = vadd.f32 %v3138_v58, %v2970_v36  ;;  %v2992_v14 = vpop.f32.mrf.mxu0  ;;  %v2985_v36 = vadd.f32 %v2984_v10, %v2816_v29  ;;  %v6221_v10 = vld [vmem:[#allocation137_spill] sm:$0xff] }
 0x6b5   :  { %v2993_v27 = vadd.f32 %v2992_v14, %v2824_v2 }
 0x6b6   :  { %3264 = vst [vmem:[#allocation12 + $0xb8] sm:$0xff] %v3139_v54  ;;  %v2656_v53 = vpop.f32.mrf.mxu2  ;;  %2713 = vmatmul.bf16.gmra.mxu2 %v6216_v45  ;;  %v2825_v30 = vpop.f32.mrf.mxu3  ;;  %2882 = vmatmul.bf16.gmra.mxu3 %v6217_v62 }
 0x6b7   :  { %v2657_v37 = vadd.f32 %v5697_v11, %v2656_v53 }
 0x6bb   :  { %v3141_v6 = vpop.f32.mrf.mxu1 }
 0x6bc   :  { %v3142_v3 = vadd.f32 %v3141_v6, %v2973_v41  ;;  %v2994_v15 = vpop.f32.mrf.mxu0 }
 0x6be   :  { %3265 = vst [vmem:[#allocation12 + $0xc0] sm:$0xff] %v3142_v3  ;;  %3180 = vmatmul.bf16.gmra.mxu1 %v6212_v44  ;;  %3051 = vmatmul.bf16.gmra.mxu0 %v5419_v47  ;;  %v2659_v34 = vpop.f32.mrf.mxu2  ;;  %v2828_v31 = vpop.f32.mrf.mxu3 }
 0x6c3   :  { %v3143_v16 = vpop.f32.mrf.mxu1 }
 0x6c4   :  { %v3144_v46 = vadd.f32 %v3143_v16, %v2975_v13  ;;  %v2997_v35 = vpop.f32.mrf.mxu0 }
 0x6c6   :  { %3266 = vst [vmem:[#allocation12 + $0xc8] sm:$0xff] %v3144_v46  ;;  %v2661_v19 = vpop.f32.mrf.mxu2  ;;  %2718 = vmatmul.bf16.gmra.mxu2 %v6219_v4  ;;  %v2830_v47 = vpop.f32.mrf.mxu3  ;;  %2887 = vmatmul.bf16.gmra.mxu3 %v6220_v28 }
 0x6cb   :  { %v3146_v9 = vpop.f32.mrf.mxu1 }
 0x6cc   :  { %v3147_v56 = vadd.f32 %v3146_v9, %v2978_v22  ;;  %v2999_v41 = vpop.f32.mrf.mxu0 }
 0x6ce   :  { %3267 = vst [vmem:[#allocation12 + $0xd0] sm:$0xff] %v3147_v56  ;;  %3185 = vmatmul.bf16.gmra.mxu1 %v6215_v1  ;;  %3056 = vmatmul.bf16.gmra.mxu0 %v5448_v20  ;;  %v2664_v3 = vpop.f32.mrf.mxu2  ;;  %v2833_v44 = vpop.f32.mrf.mxu3  ;;  %v2826_v56 = vadd.f32 %v2825_v30, %v2657_v37  ;;  %v2660_v1 = vadd.f32 %v5697_v11, %v2659_v34 }
 0x6cf   :  { %v2662_v30 = vadd.f32 %v5697_v11, %v2661_v19  ;;  %v2665_v34 = vadd.f32 %v5697_v11, %v2664_v3 }
 0x6d0   :  { %v2995_v23 = vadd.f32 %v2994_v15, %v2826_v56  ;;  %v2829_v14 = vadd.f32 %v2828_v31, %v2660_v1  ;;  %v6227_v15 = vld [vmem:[#allocation141_spill] sm:$0xff] }
 0x6d2   :  { %v2998_v53 = vadd.f32 %v2997_v35, %v2829_v14  ;;  %v2834_v35 = vadd.f32 %v2833_v44, %v2665_v34 }
 0x6d3   :  { %v3148_v60 = vpop.f32.mrf.mxu1 }
 0x6d4   :  { %v3149_v18 = vadd.f32 %v3148_v60, %v2980_v7  ;;  %v3002_v59 = vpop.f32.mrf.mxu0 }
 0x6d6   :  { %3268 = vst [vmem:[#allocation12 + $0xd8] sm:$0xff] %v3149_v18  ;;  %v2666_v46 = vpop.f32.mrf.mxu2  ;;  %2723 = vmatmul.bf16.gmra.mxu2 %v6222_v51  ;;  %v2835_v20 = vpop.f32.mrf.mxu3  ;;  %2892 = vmatmul.bf16.gmra.mxu3 %v6223_v8  ;;  %v6225_v18 = vld [vmem:[#allocation51_spill] sm:$0xff] }
 0x6d7   :  { %v2667_v52 = vadd.f32 %v5697_v11, %v2666_v46 }
 0x6db   :  { %v3151_v48 = vpop.f32.mrf.mxu1 }
 0x6dc   :  { %v3152_v25 = vadd.f32 %v3151_v48, %v2983_v55  ;;  %v3004_v61 = vpop.f32.mrf.mxu0  ;;  %v2831_v48 = vadd.f32 %v2830_v47, %v2662_v30  ;;  %v6228_v47 = vld [vmem:[#allocation143_spill] sm:$0xff] }
 0x6de   :  { %3269 = vst [vmem:[#allocation12 + $0xe0] sm:$0xff] %v3152_v25  ;;  %3190 = vmatmul.bf16.gmra.mxu1 %v6218_v63  ;;  %3061 = vmatmul.bf16.gmra.mxu0 %v5475_v26  ;;  %v2669_v9 = vpop.f32.mrf.mxu2  ;;  %v2838_v0 = vpop.f32.mrf.mxu3  ;;  %v3000_v29 = vadd.f32 %v2999_v41, %v2831_v48 }
 0x6df   :  { %v2670_v41 = vadd.f32 %v5697_v11, %v2669_v9 }
 0x6e1   :  { %v2839_v43 = vadd.f32 %v2838_v0, %v2670_v41 }
 0x6e3   :  { %v3153_v58 = vpop.f32.mrf.mxu1 }
 0x6e4   :  { %v3154_v54 = vadd.f32 %v3153_v58, %v2985_v36  ;;  %v3007_v40 = vpop.f32.mrf.mxu0  ;;  %v3003_v58 = vadd.f32 %v3002_v59, %v2834_v35 }
 0x6e5   :  { %v3008_v59 = vadd.f32 %v3007_v40, %v2839_v43 }
 0x6e6   :  { %3270 = vst [vmem:[#allocation12 + $0xe8] sm:$0xff] %v3154_v54  ;;  %v2671_v60 = vpop.f32.mrf.mxu2  ;;  %2728 = vmatmul.bf16.gmra.mxu2 %v6225_v18  ;;  %v2840_v26 = vpop.f32.mrf.mxu3  ;;  %2897 = vmatmul.bf16.gmra.mxu3 %v6226_v50 }
 0x6eb   :  { %v3156_v12 = vpop.f32.mrf.mxu1 }
 0x6ec   :  { %v3157_v6 = vadd.f32 %v3156_v12, %v2988_v39  ;;  %v3009_v45 = vpop.f32.mrf.mxu0  ;;  %v2836_v39 = vadd.f32 %v2835_v20, %v2667_v52 }
 0x6ee   :  { %3271 = vst [vmem:[#allocation12 + $0xf0] sm:$0xff] %v3157_v6  ;;  %3195 = vmatmul.bf16.gmra.mxu1 %v6221_v10  ;;  %3066 = vmatmul.bf16.gmra.mxu0 %v5495_v42  ;;  %v2674_v5 = vpop.f32.mrf.mxu2  ;;  %v2843_v25 = vpop.f32.mrf.mxu3  ;;  %v3005_v6 = vadd.f32 %v3004_v61, %v2836_v39  ;;  %v6231_v39 = vld [vmem:[#allocation146_spill] sm:$0xff] }
 0x6ef   :  { %v2675_v8 = vadd.f32 %v5697_v11, %v2674_v5 }
 0x6f3   :  { %v3158_v13 = vpop.f32.mrf.mxu1 }
 0x6f4   :  { %v3159_v16 = vadd.f32 %v3158_v13, %v2990_v21  ;;  %v3012_v63 = vpop.f32.mrf.mxu0  ;;  %v2672_v13 = vadd.f32 %v5697_v11, %v2671_v60 }
 0x6f6   :  { %3272 = vst [vmem:[#allocation12 + $0xf8] sm:$0xff] %v3159_v16  ;;  %v2676_v36 = vpop.f32.mrf.mxu2  ;;  %v2845_v42 = vpop.f32.mrf.mxu3  ;;  %v2841_v51 = vadd.f32 %v2840_v26, %v2672_v13 }
 0x6f7   :  { %v2677_v0 = vadd.f32 %v5697_v11, %v2676_v36 }
 0x6f8   :  { %v3010_v61 = vadd.f32 %v3009_v45, %v2841_v51  ;;  %v6232_v51 = vld [vmem:[#allocation147_spill] sm:$0xff] }
 0x6fb   :  { %v3161_v22 = vpop.f32.mrf.mxu1 }
 0x6fc   :  { %v3162_v38 = vadd.f32 %v3161_v22, %v2993_v27  ;;  %v3014_v54 = vpop.f32.mrf.mxu0 }
 0x6fe   :  { %3273 = vst [vmem:[#allocation12 + $0x100] sm:$0xff] %v3162_v38  ;;  %3200 = vmatmul.bf16.gmra.mxu1 %v6224_v32  ;;  %v2679_v28 = vpop.f32.mrf.mxu2  ;;  %v2848_v57 = vpop.f32.mrf.mxu3  ;;  %v2844_v38 = vadd.f32 %v2843_v25, %v2675_v8  ;;  %v6230_v25 = vld [vmem:[#allocation145_spill] sm:$0xff] }
 0x6ff   :  { %v2680_v14 = vadd.f32 %v5697_v11, %v2679_v28 }
 0x700   :  { %v3013_v56 = vadd.f32 %v3012_v63, %v2844_v38 }
 0x703   :  { %v3163_v33 = vpop.f32.mrf.mxu1 }
 0x704   :  { %v3164_v7 = vadd.f32 %v3163_v33, %v2995_v23  ;;  %v3017_v12 = vpop.f32.mrf.mxu0 }
 0x706   :  { %3274 = vst [vmem:[#allocation12 + $0x108] sm:$0xff] %v3164_v7  ;;  %v2681_v44 = vpop.f32.mrf.mxu2  ;;  %v2850_v49 = vpop.f32.mrf.mxu3  ;;  %v2846_v7 = vadd.f32 %v2845_v42, %v2677_v0 }
 0x708   :  { %v3015_v18 = vadd.f32 %v3014_v54, %v2846_v7 }
 0x70b   :  { %v3166_v62 = vpop.f32.mrf.mxu1 }
 0x70c   :  { %v3167_v55 = vadd.f32 %v3166_v62, %v2998_v53  ;;  %v3019_v21 = vpop.f32.mrf.mxu0  ;;  %v2849_v53 = vadd.f32 %v2848_v57, %v2680_v14 }
 0x70e   :  { %3275 = vst [vmem:[#allocation12 + $0x110] sm:$0xff] %v3167_v55  ;;  %3205 = vmatmul.bf16.gmra.mxu1 %v6227_v15  ;;  %v2684_v46 = vpop.f32.mrf.mxu2  ;;  %v2853_v20 = vpop.f32.mrf.mxu3  ;;  %v3018_v62 = vadd.f32 %v3017_v12, %v2849_v53  ;;  %v2682_v55 = vadd.f32 %v5697_v11, %v2681_v44 }
 0x710   :  { %v2851_v34 = vadd.f32 %v2850_v49, %v2682_v55 }
 0x713   :  { %v3168_v31 = vpop.f32.mrf.mxu1 }
 0x714   :  { %v3169_v17 = vadd.f32 %v3168_v31, %v3000_v29  ;;  %v3022_v27 = vpop.f32.mrf.mxu0  ;;  %v2685_v29 = vadd.f32 %v5697_v11, %v2684_v46 }
 0x716   :  { %3276 = vst [vmem:[#allocation12 + $0x118] sm:$0xff] %v3169_v17  ;;  %v2686_v9 = vpop.f32.mrf.mxu2  ;;  %v2855_v32 = vpop.f32.mrf.mxu3  ;;  %v3020_v17 = vadd.f32 %v3019_v21, %v2851_v34  ;;  %v2854_v42 = vadd.f32 %v2853_v20, %v2685_v29 }
 0x718   :  { %v3023_v54 = vadd.f32 %v3022_v27, %v2854_v42 }
 0x71b   :  { %v3171_v19 = vpop.f32.mrf.mxu1 }
 0x71c   :  { %v3172_v4 = vadd.f32 %v3171_v19, %v3003_v58  ;;  %v3024_v40 = vpop.f32.mrf.mxu0  ;;  %v2687_v19 = vadd.f32 %v5697_v11, %v2686_v9 }
 0x71e   :  { %3277 = vst [vmem:[#allocation12 + $0x120] sm:$0xff] %v3172_v4  ;;  %3210 = vmatmul.bf16.gmra.mxu1 %v6228_v47  ;;  %v2689_v33 = vpop.f32.mrf.mxu2  ;;  %v2858_v60 = vpop.f32.mrf.mxu3  ;;  %v2856_v57 = vadd.f32 %v2855_v32, %v2687_v19 }
 0x71f   :  { %v2690_v12 = vadd.f32 %v5697_v11, %v2689_v33 }
 0x721   :  { %v2859_v44 = vadd.f32 %v2858_v60, %v2690_v12 }
 0x723   :  { %v3173_v3 = vpop.f32.mrf.mxu1 }
 0x724   :  { %v3174_v10 = vadd.f32 %v3173_v3, %v3005_v6  ;;  %v3027_v45 = vpop.f32.mrf.mxu0  ;;  %v3025_v6 = vadd.f32 %v3024_v40, %v2856_v57 }
 0x726   :  { %3278 = vst [vmem:[#allocation12 + $0x128] sm:$0xff] %v3174_v10  ;;  %v2691_v30 = vpop.f32.mrf.mxu2  ;;  %v2860_v15 = vpop.f32.mrf.mxu3 }
 0x727   :  { %v2692_v13 = vadd.f32 %v5697_v11, %v2691_v30 }
 0x729   :  { %v2861_v20 = vadd.f32 %v2860_v15, %v2692_v13 }
 0x72b   :  { %v3176_v16 = vpop.f32.mrf.mxu1 }
 0x72c   :  { %v3177_v2 = vadd.f32 %v3176_v16, %v3008_v59  ;;  %v3029_v63 = vpop.f32.mrf.mxu0  ;;  %v3028_v59 = vadd.f32 %v3027_v45, %v2859_v44 }
 0x72e   :  { %3279 = vst [vmem:[#allocation12 + $0x130] sm:$0xff] %v3177_v2  ;;  %3215 = vmatmul.bf16.gmra.mxu1 %v5332_v24  ;;  %v6229_v24 = vld [vmem:[#allocation144_spill] sm:$0xff]  ;;  %v2694_v31 = vpop.f32.mrf.mxu2  ;;  %v2863_v58 = vpop.f32.mrf.mxu3 }
 0x72f   :  { %v2695_v27 = vadd.f32 %v5697_v11, %v2694_v31 }
 0x731   :  { %v2864_v9 = vadd.f32 %v2863_v58, %v2695_v27 }
 0x733   :  { %v3178_v37 = vpop.f32.mrf.mxu1 }
 0x734   :  { %v3179_v22 = vadd.f32 %v3178_v37, %v3010_v61  ;;  %v3032_v52 = vpop.f32.mrf.mxu0  ;;  %v3030_v61 = vadd.f32 %v3029_v63, %v2861_v20 }
 0x736   :  { %3280 = vst [vmem:[#allocation12 + $0x138] sm:$0xff] %v3179_v22  ;;  %v2696_v28 = vpop.f32.mrf.mxu2  ;;  %v2865_v41 = vpop.f32.mrf.mxu3 }
 0x73b   :  { %v3181_v1 = vpop.f32.mrf.mxu1 }
 0x73c   :  { %v3182_v23 = vadd.f32 %v3181_v1, %v3013_v56  ;;  %v3034_v10 = vpop.f32.mrf.mxu0  ;;  %v3033_v56 = vadd.f32 %v3032_v52, %v2864_v9  ;;  %v5830_v1 = vld [vmem:[%s5854_s4 + $0x1] ss:$0 sm:$0xff]  ;;  %s4392_s4 = smov [#allocation12]  }
 0x73d   :  { %v2697_v40 = vadd.f32 %v5830_v1, %v2696_v28  ;;  %s3309_s7 = sshll.u32 %s4392_s4, 4  ;;  %s3310_s7 = int_to_ptr.vmem [resolvable:$true] %s3309_s7 }
 0x73e   :  { %3281 = vst [vmem:[#allocation12 + $0x140] sm:$0xff] %v3182_v23  ;;  %3220 = vmatmul.bf16.gmra.mxu1 %v6229_v24  ;;  %v2699_v49 = vpop.f32.mrf.mxu2  ;;  %v2868_v21 = vpop.f32.mrf.mxu3 }
 0x73f   :  { %v2866_v11 = vadd.f32 %v2865_v41, %v2697_v40  ;;  %v2700_v7 = vadd.f32 %v5830_v1, %v2699_v49 }
 0x741   :  { %v3035_v60 = vadd.f32 %v3034_v10, %v2866_v11  ;;  %v2869_v53 = vadd.f32 %v2868_v21, %v2700_v7 }
 0x743   :  { %v3183_v26 = vpop.f32.mrf.mxu1 }
 0x744   :  { %v3184_v50 = vadd.f32 %v3183_v26, %v3015_v18  ;;  %v3037_v46 = vpop.f32.mrf.mxu0 }
 0x745   :  { %v3038_v30 = vadd.f32 %v3037_v46, %v2869_v53 }
 0x746   :  { %3282 = vst [vmem:[#allocation12 + $0x148] sm:$0xff] %v3184_v50  ;;  %v2701_v8 = vpop.f32.mrf.mxu2  ;;  %v2870_v22 = vpop.f32.mrf.mxu3 }
 0x74b   :  { %v3186_v5 = vpop.f32.mrf.mxu1 }
 0x74c   :  { %v3187_v48 = vadd.f32 %v3186_v5, %v3018_v62  ;;  %v3039_v32 = vpop.f32.mrf.mxu0  ;;  %v2702_v62 = vadd.f32 %v5830_v1, %v2701_v8 }
 0x74e   :  { %3283 = vst [vmem:[#allocation12 + $0x150] sm:$0xff] %v3187_v48  ;;  %3225 = vmatmul.bf16.gmra.mxu1 %v6230_v25  ;;  %v2704_v0 = vpop.f32.mrf.mxu2  ;;  %v2873_v24 = vpop.f32.mrf.mxu3  ;;  %v2871_v25 = vadd.f32 %v2870_v22, %v2702_v62 }
 0x74f   :  { %v2705_v34 = vadd.f32 %v5830_v1, %v2704_v0 }
 0x750   :  { %v3040_v29 = vadd.f32 %v3039_v32, %v2871_v25 }
 0x753   :  { %v3188_v35 = vpop.f32.mrf.mxu1 }
 0x754   :  { %v3189_v36 = vadd.f32 %v3188_v35, %v3020_v17  ;;  %v3042_v14 = vpop.f32.mrf.mxu0  ;;  %v2874_v35 = vadd.f32 %v2873_v24, %v2705_v34 }
 0x756   :  { %3284 = vst [vmem:[#allocation12 + $0x158] sm:$0xff] %v3189_v36  ;;  %v2706_v26 = vpop.f32.mrf.mxu2  ;;  %v2875_v45 = vpop.f32.mrf.mxu3  ;;  %v3043_v58 = vadd.f32 %v3042_v14, %v2874_v35 }
 0x75b   :  { %v3191_v4 = vpop.f32.mrf.mxu1 }
 0x75c   :  { %v3192_v47 = vadd.f32 %v3191_v4, %v3023_v54  ;;  %v3044_v5 = vpop.f32.mrf.mxu0  ;;  %v2707_v54 = vadd.f32 %v5830_v1, %v2706_v26 }
 0x75e   :  { %3285 = vst [vmem:[#allocation12 + $0x160] sm:$0xff] %v3192_v47  ;;  %3230 = vmatmul.bf16.gmra.mxu1 %v6231_v39  ;;  %v2709_v48 = vpop.f32.mrf.mxu2  ;;  %v2878_v63 = vpop.f32.mrf.mxu3  ;;  %v2876_v28 = vadd.f32 %v2875_v45, %v2707_v54 }
 0x75f   :  { %v2710_v39 = vadd.f32 %v5830_v1, %v2709_v48 }
 0x760   :  { %v3045_v41 = vadd.f32 %v3044_v5, %v2876_v28 }
 0x763   :  { %v3193_v3 = vpop.f32.mrf.mxu1 }
 0x764   :  { %v3194_v43 = vadd.f32 %v3193_v3, %v3025_v6  ;;  %v3047_v36 = vpop.f32.mrf.mxu0  ;;  %v2879_v3 = vadd.f32 %v2878_v63, %v2710_v39 }
 0x766   :  { %3286 = vst [vmem:[#allocation12 + $0x168] sm:$0xff] %v3194_v43  ;;  %v2711_v42 = vpop.f32.mrf.mxu2  ;;  %v2880_v19 = vpop.f32.mrf.mxu3  ;;  %v3048_v43 = vadd.f32 %v3047_v36, %v2879_v3 }
 0x767   :  { %v2712_v49 = vadd.f32 %v5830_v1, %v2711_v42 }
 0x76b   :  { %v3196_v16 = vpop.f32.mrf.mxu1 }
 0x76c   :  { %v3197_v2 = vadd.f32 %v3196_v16, %v3028_v59  ;;  %v3049_v47 = vpop.f32.mrf.mxu0  ;;  %v2881_v16 = vadd.f32 %v2880_v19, %v2712_v49 }
 0x76e   :  { %3287 = vst [vmem:[#allocation12 + $0x170] sm:$0xff] %v3197_v2  ;;  %3235 = vmatmul.bf16.gmra.mxu1 %v6232_v51  ;;  %v2714_v57 = vpop.f32.mrf.mxu2  ;;  %v2883_v10 = vpop.f32.mrf.mxu3  ;;  %v3050_v51 = vadd.f32 %v3049_v47, %v2881_v16 }
 0x76f   :  { %v2715_v46 = vadd.f32 %v5830_v1, %v2714_v57 }
 0x773   :  { %v3198_v37 = vpop.f32.mrf.mxu1 }
 0x774   :  { %v3199_v38 = vadd.f32 %v3198_v37, %v3030_v61  ;;  %v3052_v44 = vpop.f32.mrf.mxu0  ;;  %v2884_v61 = vadd.f32 %v2883_v10, %v2715_v46 }
 0x776   :  { %3288 = vst [vmem:[#allocation12 + $0x178] sm:$0xff] %v3199_v38  ;;  %v2716_v21 = vpop.f32.mrf.mxu2  ;;  %v2885_v2 = vpop.f32.mrf.mxu3  ;;  %v3053_v22 = vadd.f32 %v3052_v44, %v2884_v61 }
 0x777   :  { %v2717_v9 = vadd.f32 %v5830_v1, %v2716_v21 }
 0x779   :  { %v2886_v40 = vadd.f32 %v2885_v2, %v2717_v9 }
 0x77b   :  { %v3201_v23 = vpop.f32.mrf.mxu1 }
 0x77c   :  { %v3202_v33 = vadd.f32 %v3201_v23, %v3033_v56  ;;  %v3054_v8 = vpop.f32.mrf.mxu0 }
 0x77d   :  { %v3055_v24 = vadd.f32 %v3054_v8, %v2886_v40 }
 0x77e   :  { %3289 = vst [vmem:[#allocation12 + $0x180] sm:$0xff] %v3202_v33  ;;  %v2719_v37 = vpop.f32.mrf.mxu2  ;;  %v2888_v38 = vpop.f32.mrf.mxu3 }
 0x77f   :  { %v2720_v33 = vadd.f32 %v5830_v1, %v2719_v37 }
 0x783   :  { %v3203_v18 = vpop.f32.mrf.mxu1 }
 0x784   :  { %v3204_v50 = vadd.f32 %v3203_v18, %v3035_v60  ;;  %v3057_v0 = vpop.f32.mrf.mxu0  ;;  %v2889_v60 = vadd.f32 %v2888_v38, %v2720_v33 }
 0x786   :  { %3290 = vst [vmem:[#allocation12 + $0x188] sm:$0xff] %v3204_v50  ;;  %v2721_v23 = vpop.f32.mrf.mxu2  ;;  %v2890_v7 = vpop.f32.mrf.mxu3  ;;  %v3058_v26 = vadd.f32 %v3057_v0, %v2889_v60 }
 0x787   :  { %v2722_v53 = vadd.f32 %v5830_v1, %v2721_v23 }
 0x78b   :  { %v3206_v55 = vpop.f32.mrf.mxu1 }
 0x78c   :  { %v3207_v15 = vadd.f32 %v3206_v55, %v3038_v30  ;;  %v3059_v18 = vpop.f32.mrf.mxu0  ;;  %v2891_v55 = vadd.f32 %v2890_v7, %v2722_v53 }
 0x78e   :  { %3291 = vst [vmem:[#allocation12 + $0x190] sm:$0xff] %v3207_v15  ;;  %v2724_v50 = vpop.f32.mrf.mxu2  ;;  %v2893_v62 = vpop.f32.mrf.mxu3  ;;  %v3060_v48 = vadd.f32 %v3059_v18, %v2891_v55 }
 0x78f   :  { %v2725_v5 = vadd.f32 %v5830_v1, %v2724_v50 }
 0x793   :  { %v3208_v31 = vpop.f32.mrf.mxu1 }
 0x794   :  { %v3209_v17 = vadd.f32 %v3208_v31, %v3040_v29  ;;  %v3062_v15 = vpop.f32.mrf.mxu0  ;;  %v2894_v29 = vadd.f32 %v2893_v62, %v2725_v5 }
 0x796   :  { %3292 = vst [vmem:[#allocation12 + $0x198] sm:$0xff] %v3209_v17  ;;  %v2726_v34 = vpop.f32.mrf.mxu2  ;;  %v2895_v31 = vpop.f32.mrf.mxu3  ;;  %v3063_v17 = vadd.f32 %v3062_v15, %v2894_v29 }
 0x797   :  { %v2727_v35 = vadd.f32 %v5830_v1, %v2726_v34 }
 0x79b   :  { %v3211_v52 = vpop.f32.mrf.mxu1 }
 0x79c   :  { %v3212_v4 = vadd.f32 %v3211_v52, %v3043_v58  ;;  %v3064_v42 = vpop.f32.mrf.mxu0  ;;  %v2896_v52 = vadd.f32 %v2895_v31, %v2727_v35 }
 0x79e   :  { %3293 = vst [vmem:[#allocation12 + $0x1a0] sm:$0xff] %v3212_v4  ;;  %v2729_v54 = vpop.f32.mrf.mxu2  ;;  %v2898_v4 = vpop.f32.mrf.mxu3  ;;  %v3065_v28 = vadd.f32 %v3064_v42, %v2896_v52 }
 0x79f   :  { %v2730_v19 = vadd.f32 %v5830_v1, %v2729_v54 }
 0x7a1   :  { %v2899_v57 = vadd.f32 %v2898_v4, %v2730_v19 }
 0x7a3   :  { %v3213_v12 = vpop.f32.mrf.mxu1 }
 0x7a4   :  { %v3214_v6 = vadd.f32 %v3213_v12, %v3045_v41  ;;  %v3067_v41 = vpop.f32.mrf.mxu0 }
 0x7a6   :  { %3294 = vst [vmem:[#allocation12 + $0x1a8] sm:$0xff] %v3214_v6  ;;  %v2731_v12 = vpop.f32.mrf.mxu2  ;;  %v3068_v6 = vadd.f32 %v3067_v41, %v2899_v57 }
 0x7a7   :  { %v2732_v3 = vadd.f32 %v5830_v1, %v2731_v12 }
 0x7ab   :  { %v3216_v59 = vpop.f32.mrf.mxu1 }
 0x7ac   :  { %v3217_v13 = vadd.f32 %v3216_v59, %v3048_v43  ;;  %v2900_v43 = vpop.f32.mrf.mxu3  ;;  %v3069_v59 = vpop.f32.mrf.mxu0 }
 0x7ad   :  { %v2901_v49 = vadd.f32 %v2900_v43, %v2732_v3 }
 0x7ae   :  { %3295 = vst [vmem:[#allocation12 + $0x1b0] sm:$0xff] %v3217_v13 }
 0x7af   :  { %v3070_v21 = vadd.f32 %v3069_v59, %v2901_v49 }
 0x7b3   :  { %v3218_v20 = vpop.f32.mrf.mxu1 }
 0x7b4   :  { %v3219_v27 = vadd.f32 %v3218_v20, %v3050_v51 }
 0x7b6   :  { %3296 = vst [vmem:[#allocation12 + $0x1b8] sm:$0xff] %v3219_v27 }
 0x7bb   :  { %v3221_v32 = vpop.f32.mrf.mxu1 }
 0x7bc   :  { %v3222_v56 = vadd.f32 %v3221_v32, %v3053_v22 }
 0x7be   :  { %3297 = vst [vmem:[#allocation12 + $0x1c0] sm:$0xff] %v3222_v56 }
 0x7c3   :  { %v3223_v11 = vpop.f32.mrf.mxu1 }
 0x7c4   :  { %v3224_v14 = vadd.f32 %v3223_v11, %v3055_v24 }
 0x7c6   :  { %3298 = vst [vmem:[#allocation12 + $0x1c8] sm:$0xff] %v3224_v14 }
 0x7cb   :  { %v3226_v45 = vpop.f32.mrf.mxu1 }
 0x7cc   :  { %v3227_v30 = vadd.f32 %v3226_v45, %v3058_v26 }
 0x7ce   :  { %3299 = vst [vmem:[#allocation12 + $0x1d0] sm:$0xff] %v3227_v30 }
 0x7d3   :  { %v3228_v25 = vpop.f32.mrf.mxu1 }
 0x7d4   :  { %v3229_v63 = vadd.f32 %v3228_v25, %v3060_v48 }
 0x7d6   :  { %3300 = vst [vmem:[#allocation12 + $0x1d8] sm:$0xff] %v3229_v63 }
 0x7db   :  { %v3231_v36 = vpop.f32.mrf.mxu1 }
 0x7dc   :  { %v3232_v58 = vadd.f32 %v3231_v36, %v3063_v17 }
 0x7de   :  { %3301 = vst [vmem:[#allocation12 + $0x1e0] sm:$0xff] %v3232_v58 }
 0x7e3   :  { %v3233_v47 = vpop.f32.mrf.mxu1 }
 0x7e4   :  { %v3234_v39 = vadd.f32 %v3233_v47, %v3065_v28 }
 0x7e6   :  { %3302 = vst [vmem:[#allocation12 + $0x1e8] sm:$0xff] %v3234_v39 }
 0x7eb   :  { %v3236_v10 = vpop.f32.mrf.mxu1 }
 0x7ec   :  { %v3237_v44 = vadd.f32 %v3236_v10, %v3068_v6 }
 0x7ee   :  { %3303 = vst [vmem:[#allocation12 + $0x1f0] sm:$0xff] %v3237_v44 }
 0x7f3   :  { %v3238_v13 = vpop.f32.mrf.mxu1 }
 0x7f4   :  { %v3239_v16 = vadd.f32 %v3238_v13, %v3070_v21 }
 0x7f6   :  { %3304 = vst [vmem:[#allocation12 + $0x1f8] sm:$0xff] %v3239_v16 }
 0x7f7   :  { %3317 = dma.vmem_to_hbm [thread:$0]  %s3310_s7, 8192, %s3312_s10, [#allocation4], %s4393_s1, %s4393_s1, %s4394_s11  }
 0x7f8   :  { %4381 = dma.done.wait [#allocation4], 8192  }
 0x7f9   :  { %4382 = vsyncadd [#allocation4], 4294959104 }
 0x7fa   :  { %3322 = vsyncpa [#allocation3], 1 }
 0x7fb   :  { %3323 = vsyncpa [#allocation7], 1 }
 0x7fc   :  { %3324 = vsyncpa [#allocation10], 1 }
 0x7fd   :  { %3325 = vsyncpa [#allocation4], 1 }
 0x7fe   :  { %3326 = vsyncpa [#allocation5], 1 }

</bundles_post_ra>
